<compile_context>
chip_gen: v5e
topology: v5e:2x2
jax: 0.10.0
libtpu: 0.0.40
codegen_flags: <defaults>
</compile_context>

<pallas_src>
import jax
import jax.numpy as jnp
from jax.experimental import pallas as pl
from jax.experimental.pallas import tpu as pltpu


def _round_up(x, m):
    return (x + m - 1) // m * m


# ----------------------------- Pallas kernels ------------------------------

def _conv_pool_kernel(pa_ref, pb_ref, pc_ref, pd_ref, w_ref, b_ref, o_ref):
    """Fused conv (+bias +ReLU) + 2x2/stride-2 maxpool.

    pa..pd hold the im2col patch rows of the four positions of each pool
    window.  Because ReLU is monotone and the bias is shared,
    max_i relu(p_i @ w + b) == relu(max_i(p_i @ w) + b), so the pool is a
    free VPU max on data already resident in VMEM.
    """
    w = w_ref[...]

    def mm(p_ref):
        return jnp.dot(p_ref[...], w, preferred_element_type=jnp.float32)

    y = jnp.maximum(jnp.maximum(mm(pa_ref), mm(pb_ref)),
                    jnp.maximum(mm(pc_ref), mm(pd_ref)))
    y = jnp.maximum(y + b_ref[...], 0.0)
    o_ref[...] = y.astype(o_ref.dtype)


def _mm_relu_kernel(x_ref, w_ref, b_ref, o_ref):
    """y = relu(x @ w + b) with f32 accumulation."""
    y = jnp.dot(x_ref[...], w_ref[...], preferred_element_type=jnp.float32)
    o_ref[...] = jnp.maximum(y + b_ref[...], 0.0).astype(o_ref.dtype)


def _head_kernel(x_ref, w1_ref, b1_ref, w2_ref, b2_ref, o_ref):
    """FC1 + ReLU + FC2 + softmax, fully fused (one HBM read/write per row)."""
    h = jnp.dot(x_ref[...], w1_ref[...], preferred_element_type=jnp.float32)
    h = jnp.maximum(h + b1_ref[...], 0.0)
    logits = jnp.dot(h.astype(w2_ref.dtype), w2_ref[...],
                     preferred_element_type=jnp.float32)
    logits = logits + b2_ref[...]
    m = jnp.max(logits, axis=-1, keepdims=True)
    e = jnp.exp(logits - m)
    inv = pl.reciprocal(jnp.sum(e, axis=-1, keepdims=True), approx=True)
    o_ref[...] = (e * inv).astype(o_ref.dtype)


# ------------------------- gridded pallas wrappers --------------------------

_PARALLEL = pltpu.CompilerParams(dimension_semantics=("parallel",))


def _row_spec(tile_m, k):
    return pl.BlockSpec((tile_m, k), lambda i: (i, 0))


def _full_spec(shape):
    return pl.BlockSpec(shape, lambda i: (0, 0))


def _pick_tile(m, tile_m):
    tm = min(tile_m, _round_up(m, 8))       # multiple of 8 (sublane rule)
    return tm, _round_up(m, tm)


def _pad_rows(x, m_pad):
    pad = m_pad - x.shape[0]
    return jnp.pad(x, ((0, pad), (0, 0))) if pad else x


def _patches_3x3_pad1(x_nhwc):
    """Patch tensor (N, H, W, 9*C): lane-axis concat of 9 shifted slabs.

    Feature order is (dy, dx, ci) which matches the weight reordering done at
    init time -- no big XLA transpose, only pad + concat (cheap plumbing)."""
    N, H, W, C = x_nhwc.shape
    xp = jnp.pad(x_nhwc, ((0, 0), (1, 1), (1, 1), (0, 0)))
    return jnp.concatenate(
        [xp[:, dy:dy + H, dx:dx + W, :] for dy in range(3) for dx in range(3)],
        axis=-1)


def conv_relu_pool(x_nhwc, w, b, *, tile_m=512):
    """3x3/stride-1/pad-1 conv + bias + ReLU + 2x2/stride-2 maxpool."""
    N, H, W, C = x_nhwc.shape
    cout = w.shape[1]
    hp, wp = H // 2, W // 2
    k = 9 * C
    m = N * hp * wp
    tm, m_pad = _pick_tile(m, tile_m)

    patches = _patches_3x3_pad1(x_nhwc)
    # One patch matrix per pool position; together they partition the conv
    # output rows, so total HBM traffic equals a single im2col matrix.
    mats = [
        _pad_rows(patches[:, oy::2, ox::2, :].reshape(m, k), m_pad)
        for oy in range(2) for ox in range(2)
    ]

    out = pl.pallas_call(
        _conv_pool_kernel,
        out_shape=jax.ShapeDtypeStruct((m_pad, cout), jnp.bfloat16),
        grid=(m_pad // tm,),
        in_specs=[_row_spec(tm, k)] * 4 + [_full_spec((k, cout)),
                                           _full_spec((1, cout))],
        out_specs=_row_spec(tm, cout),
        compiler_params=_PARALLEL,
    )(*mats, w, b)
    return out[:m].reshape(N, hp, wp, cout)


def conv_relu(x_nhwc, w, b, *, tile_m=512):
    """3x3/stride-1/pad-1 conv + bias + ReLU (no pool)."""
    N, H, W, C = x_nhwc.shape
    cout = w.shape[1]
    k = 9 * C
    m = N * H * W
    tm, m_pad = _pick_tile(m, tile_m)
    p = _pad_rows(_patches_3x3_pad1(x_nhwc).reshape(m, k), m_pad)

    out = pl.pallas_call(
        _mm_relu_kernel,
        out_shape=jax.ShapeDtypeStruct((m_pad, cout), jnp.bfloat16),
        grid=(m_pad // tm,),
        in_specs=[_row_spec(tm, k), _full_spec((k, cout)), _full_spec((1, cout))],
        out_specs=_row_spec(tm, cout),
        compiler_params=_PARALLEL,
    )(p, w, b)
    return out[:m].reshape(N, H, W, cout)


def head(x, w1, b1, w2, b2, *, tile_b=128):
    """Fused FC1 + ReLU + FC2 + softmax, gridded over batch rows."""
    n, k = x.shape
    n_out = w2.shape[1]
    tb, n_pad = _pick_tile(n, tile_b)
    xp = _pad_rows(x, n_pad)

    out = pl.pallas_call(
        _head_kernel,
        out_shape=jax.ShapeDtypeStruct((n_pad, n_out), jnp.float32),
        grid=(n_pad // tb,),
        in_specs=[_row_spec(tb, k),
                  _full_spec(w1.shape), _full_spec(b1.shape),
                  _full_spec(w2.shape), _full_spec(b2.shape)],
        out_specs=_row_spec(tb, n_out),
        compiler_params=_PARALLEL,
    )(xp, w1, b1, w2, b2)
    return out[:n]


# ------------------------------ forward pass --------------------------------

def net_forward(x_nchw, kparams):
    (w1, b1, w2, b2, w3, b3, fw1, fb1, fw2, fb2) = kparams
    N = x_nchw.shape[0]
    # NCHW -> NHWC is a pure reshape because Cin == 1.
    x = x_nchw.reshape(N, 28, 28, 1).astype(jnp.bfloat16)

    y = conv_relu_pool(x, w1, b1)            # (N, 14, 14, 16)
    y = conv_relu_pool(y, w2, b2)            # (N,  7,  7, 32)
    y = conv_relu(y, w3, b3)                 # (N,  7,  7, 64)

    # NHWC flatten; the NCHW-Flatten permutation is folded into fw1 at init.
    flat = y.reshape(N, 7 * 7 * 64)
    return head(flat, fw1, fb1, fw2, fb2)    # (N, 10) float32


# --------------------- parameters (PyTorch layout) + conversion --------------

def init_torch_params(key):
    """Random params in PyTorch layouts (Conv2d OIHW, Linear (out, in))."""
    ks = jax.random.split(key, 10)

    def conv_w(k, cout, cin):
        return jax.random.normal(k, (cout, cin, 3, 3), jnp.float32) / jnp.sqrt(cin * 9.0)

    def lin_w(k, nout, nin):
        return jax.random.normal(k, (nout, nin), jnp.float32) / jnp.sqrt(float(nin))

    def bias(k, n):
        return 0.01 * jax.random.normal(k, (n,), jnp.float32)

    return (conv_w(ks[0], 16, 1), bias(ks[1], 16),
            conv_w(ks[2], 32, 16), bias(ks[3], 32),
            conv_w(ks[4], 64, 32), bias(ks[5], 64),
            lin_w(ks[6], 128, 7 * 7 * 64), bias(ks[7], 128),
            lin_w(ks[8], 10, 128), bias(ks[9], 10))


def convert_params(tparams):
    """PyTorch-layout params -> kernel-friendly layouts (done once, at init)."""
    (cw1, cb1, cw2, cb2, cw3, cb3, lw1, lb1, lw2, lb2) = tparams

    def conv_w(w):
        # (Cout, Cin, 3, 3) -> rows in (dy, dx, ci) patch order -> (9*Cin, Cout)
        return jnp.transpose(w, (2, 3, 1, 0)).reshape(-1, w.shape[0]).astype(jnp.bfloat16)

    def fc1_w(w):
        # (128, 3136) with columns in NCHW-flatten (c, h, w) order
        # -> rows in NHWC-flatten (h, w, c) order -> (3136, 128)
        w = w.reshape(w.shape[0], 64, 7, 7)
        w = jnp.transpose(w, (2, 3, 1, 0))
        return w.reshape(7 * 7 * 64, w.shape[-1]).astype(jnp.bfloat16)

    def fc2_w(w):
        return jnp.transpose(w).astype(jnp.bfloat16)

    def b2d(b):
        return b.reshape(1, -1).astype(jnp.float32)

    return (conv_w(cw1), b2d(cb1), conv_w(cw2), b2d(cb2), conv_w(cw3), b2d(cb3),
            fc1_w(lw1), b2d(lb1), fc2_w(lw2), b2d(lb2))


# ------------------------- pure-JAX reference (f32) --------------------------

def reference_forward(x_nchw, tparams):
    (cw1, cb1, cw2, cb2, cw3, cb3, lw1, lb1, lw2, lb2) = tparams

    def conv(x, w, b):
        y = jax.lax.conv_general_dilated(
            x, w, window_strides=(1, 1), padding=((1, 1), (1, 1)),
            dimension_numbers=("NCHW", "OIHW", "NCHW"))
        return jax.nn.relu(y + b[None, :, None, None])

    def pool(x):
        return jnp.maximum(
            jnp.maximum(x[:, :, 0::2, 0::2], x[:, :, 0::2, 1::2]),
            jnp.maximum(x[:, :, 1::2, 0::2], x[:, :, 1::2, 1::2]))

    y = pool(conv(x_nchw, cw1, cb1))
    y = pool(conv(y, cw2, cb2))
    y = conv(y, cw3, cb3)
    flat = y.reshape(y.shape[0], -1)            # torch.nn.Flatten on NCHW
    h = jax.nn.relu(flat @ lw1.T + lb1)
    logits = h @ lw2.T + lb2
    return jax.nn.softmax(logits, axis=1)


# ---------------------------------- main ------------------------------------

if __name__ == "__main__":
    key = jax.random.PRNGKey(0)
    k_x, k_p = jax.random.split(key)

    # MNIST-shaped input: batch=2, 1 channel, 28x28 (required by the 7*7*64 FC).
    x = jax.random.normal(k_x, (2, 1, 28, 28), jnp.float32)
    tparams = init_torch_params(k_p)
    kparams = convert_params(tparams)

    fwd = jax.jit(net_forward)
    out = jax.block_until_ready(fwd(x, kparams))

    assert out.shape == (2, 10), out.shape
    assert bool(jnp.all(jnp.isfinite(out)))
    row_sums = jnp.sum(out, axis=1)
    assert bool(jnp.allclose(row_sums, 1.0, atol=5e-3)), row_sums

    # Check against a pure-JAX f32 reference (validates conv lowering, pooling
    # fusion, and the weight/flatten permutations; bf16 MXU inputs -> loose tol).
    ref = jax.block_until_ready(jax.jit(reference_forward)(x, tparams))
    max_err = float(jnp.max(jnp.abs(out - ref)))
    assert max_err < 5e-2, max_err

    print("KERNEL_OK")
</pallas_src>

<mosaic_0001>
module attributes {stable_mosaic.version = 11 : i64} {
  func.func @_conv_pool_kernel(%arg0: i32, %arg1: memref<392x9xbf16, #tpu.memory_space<vmem>>, %arg2: memref<392x9xbf16, #tpu.memory_space<vmem>>, %arg3: memref<392x9xbf16, #tpu.memory_space<vmem>>, %arg4: memref<392x9xbf16, #tpu.memory_space<vmem>>, %arg5: memref<9x16xbf16, #tpu.memory_space<vmem>>, %arg6: memref<1x16xf32, #tpu.memory_space<vmem>>, %arg7: memref<392x16xbf16, #tpu.memory_space<vmem>>) attributes {dimension_semantics = [#tpu.dimension_semantics<parallel>], iteration_bounds = array<i64: 1>, scalar_prefetch = 0 : i64, scratch_operands = 0 : i64, tpu.core_type = #tpu.core_type<tc>, window_params = [{transform_indices = @transform_0, window_bounds = array<i64: 392, 9>}, {transform_indices = @transform_1, window_bounds = array<i64: 392, 9>}, {transform_indices = @transform_2, window_bounds = array<i64: 392, 9>}, {transform_indices = @transform_3, window_bounds = array<i64: 392, 9>}, {pipeline_mode = #tpu.pipeline_mode<synchronous>, transform_indices = @transform_4, window_bounds = array<i64: 9, 16>}, {pipeline_mode = #tpu.pipeline_mode<synchronous>, transform_indices = @transform_5, window_bounds = array<i64: 1, 16>}, {transform_indices = @transform_6, window_bounds = array<i64: 392, 16>}]} {
    %c0 = arith.constant 0 : index
    %c0_0 = arith.constant 0 : index
    %0 = vector.load %arg5[%c0, %c0_0] : memref<9x16xbf16, #tpu.memory_space<vmem>>, vector<9x16xbf16>
    %c0_1 = arith.constant 0 : index
    %c0_2 = arith.constant 0 : index
    %1 = vector.load %arg1[%c0_1, %c0_2] : memref<392x9xbf16, #tpu.memory_space<vmem>>, vector<392x9xbf16>
    %cst = arith.constant dense<0.000000e+00> : vector<392x16xf32>
    %2 = tpu.matmul %1, %0, %cst {dimension_numbers = #tpu.dot_dimension_numbers<[1], [0], [0], [1], [0, 0, 1, 1], [], []>} : vector<392x9xbf16>, vector<9x16xbf16>, vector<392x16xf32> -> vector<392x16xf32>
    %c0_3 = arith.constant 0 : index
    %c0_4 = arith.constant 0 : index
    %3 = vector.load %arg2[%c0_3, %c0_4] : memref<392x9xbf16, #tpu.memory_space<vmem>>, vector<392x9xbf16>
    %cst_5 = arith.constant dense<0.000000e+00> : vector<392x16xf32>
    %4 = tpu.matmul %3, %0, %cst_5 {dimension_numbers = #tpu.dot_dimension_numbers<[1], [0], [0], [1], [0, 0, 1, 1], [], []>} : vector<392x9xbf16>, vector<9x16xbf16>, vector<392x16xf32> -> vector<392x16xf32>
    %5 = arith.maximumf %2, %4 : vector<392x16xf32>
    %c0_6 = arith.constant 0 : index
    %c0_7 = arith.constant 0 : index
    %6 = vector.load %arg3[%c0_6, %c0_7] : memref<392x9xbf16, #tpu.memory_space<vmem>>, vector<392x9xbf16>
    %cst_8 = arith.constant dense<0.000000e+00> : vector<392x16xf32>
    %7 = tpu.matmul %6, %0, %cst_8 {dimension_numbers = #tpu.dot_dimension_numbers<[1], [0], [0], [1], [0, 0, 1, 1], [], []>} : vector<392x9xbf16>, vector<9x16xbf16>, vector<392x16xf32> -> vector<392x16xf32>
    %c0_9 = arith.constant 0 : index
    %c0_10 = arith.constant 0 : index
    %8 = vector.load %arg4[%c0_9, %c0_10] : memref<392x9xbf16, #tpu.memory_space<vmem>>, vector<392x9xbf16>
    %cst_11 = arith.constant dense<0.000000e+00> : vector<392x16xf32>
    %9 = tpu.matmul %8, %0, %cst_11 {dimension_numbers = #tpu.dot_dimension_numbers<[1], [0], [0], [1], [0, 0, 1, 1], [], []>} : vector<392x9xbf16>, vector<9x16xbf16>, vector<392x16xf32> -> vector<392x16xf32>
    %10 = arith.maximumf %7, %9 : vector<392x16xf32>
    %11 = arith.maximumf %5, %10 : vector<392x16xf32>
    %c0_12 = arith.constant 0 : index
    %c0_13 = arith.constant 0 : index
    %12 = vector.load %arg6[%c0_12, %c0_13] : memref<1x16xf32, #tpu.memory_space<vmem>>, vector<1x16xf32>
    %13 = vector.broadcast %12 : vector<1x16xf32> to vector<392x16xf32>
    %14 = arith.addf %11, %13 : vector<392x16xf32>
    %cst_14 = arith.constant 0.000000e+00 : f32
    %15 = vector.broadcast %cst_14 : f32 to vector<392x16xf32>
    %16 = arith.maximumf %14, %15 : vector<392x16xf32>
    %17 = arith.truncf %16 : vector<392x16xf32> to vector<392x16xbf16>
    %c0_15 = arith.constant 0 : index
    %c0_16 = arith.constant 0 : index
    %18 = vector.load %arg7[%c0_15, %c0_16] : memref<392x16xbf16, #tpu.memory_space<vmem>>, vector<392x16xbf16>
    tpu.vector_store %arg7[%c0_15, %c0_16], %17 {strides = array<i32>} : memref<392x16xbf16, #tpu.memory_space<vmem>>, vector<392x16xbf16>,
    return
  }
  func.func @transform_0(%arg0: i32) -> (i32, i32) {
    %c0_i32 = arith.constant 0 : i32
    %c0_i32_0 = arith.constant 0 : i32
    return %arg0, %c0_i32 : i32, i32
  }
  func.func @transform_1(%arg0: i32) -> (i32, i32) {
    %c0_i32 = arith.constant 0 : i32
    %c0_i32_0 = arith.constant 0 : i32
    return %arg0, %c0_i32 : i32, i32
  }
  func.func @transform_2(%arg0: i32) -> (i32, i32) {
    %c0_i32 = arith.constant 0 : i32
    %c0_i32_0 = arith.constant 0 : i32
    return %arg0, %c0_i32 : i32, i32
  }
  func.func @transform_3(%arg0: i32) -> (i32, i32) {
    %c0_i32 = arith.constant 0 : i32
    %c0_i32_0 = arith.constant 0 : i32
    return %arg0, %c0_i32 : i32, i32
  }
  func.func @transform_4(%arg0: i32) -> (i32, i32) {
    %c0_i32 = arith.constant 0 : i32
    %c0_i32_0 = arith.constant 0 : i32
    %c0_i32_1 = arith.constant 0 : i32
    return %c0_i32, %c0_i32_0 : i32, i32
  }
  func.func @transform_5(%arg0: i32) -> (i32, i32) {
    %c0_i32 = arith.constant 0 : i32
    %c0_i32_0 = arith.constant 0 : i32
    %c0_i32_1 = arith.constant 0 : i32
    return %c0_i32, %c0_i32_0 : i32, i32
  }
  func.func @transform_6(%arg0: i32) -> (i32, i32) {
    %c0_i32 = arith.constant 0 : i32
    %c0_i32_0 = arith.constant 0 : i32
    return %arg0, %c0_i32 : i32, i32
  }
}

module attributes {stable_mosaic.version = 11 : i64} {
  func.func @_conv_pool_kernel(%arg0: i32, %arg1: memref<104x144xbf16, #tpu.memory_space<vmem>>, %arg2: memref<104x144xbf16, #tpu.memory_space<vmem>>, %arg3: memref<104x144xbf16, #tpu.memory_space<vmem>>, %arg4: memref<104x144xbf16, #tpu.memory_space<vmem>>, %arg5: memref<144x32xbf16, #tpu.memory_space<vmem>>, %arg6: memref<1x32xf32, #tpu.memory_space<vmem>>, %arg7: memref<104x32xbf16, #tpu.memory_space<vmem>>) attributes {dimension_semantics = [#tpu.dimension_semantics<parallel>], iteration_bounds = array<i64: 1>, scalar_prefetch = 0 : i64, scratch_operands = 0 : i64, tpu.core_type = #tpu.core_type<tc>, window_params = [{transform_indices = @transform_0, window_bounds = array<i64: 104, 144>}, {transform_indices = @transform_1, window_bounds = array<i64: 104, 144>}, {transform_indices = @transform_2, window_bounds = array<i64: 104, 144>}, {transform_indices = @transform_3, window_bounds = array<i64: 104, 144>}, {pipeline_mode = #tpu.pipeline_mode<synchronous>, transform_indices = @transform_4, window_bounds = array<i64: 144, 32>}, {pipeline_mode = #tpu.pipeline_mode<synchronous>, transform_indices = @transform_5, window_bounds = array<i64: 1, 32>}, {transform_indices = @transform_6, window_bounds = array<i64: 104, 32>}]} {
    %c0 = arith.constant 0 : index
    %c0_0 = arith.constant 0 : index
    %0 = vector.load %arg5[%c0, %c0_0] : memref<144x32xbf16, #tpu.memory_space<vmem>>, vector<144x32xbf16>
    %c0_1 = arith.constant 0 : index
    %c0_2 = arith.constant 0 : index
    %1 = vector.load %arg1[%c0_1, %c0_2] : memref<104x144xbf16, #tpu.memory_space<vmem>>, vector<104x144xbf16>
    %cst = arith.constant dense<0.000000e+00> : vector<104x32xf32>
    %2 = tpu.matmul %1, %0, %cst {dimension_numbers = #tpu.dot_dimension_numbers<[1], [0], [0], [1], [0, 0, 1, 1], [], []>} : vector<104x144xbf16>, vector<144x32xbf16>, vector<104x32xf32> -> vector<104x32xf32>
    %c0_3 = arith.constant 0 : index
    %c0_4 = arith.constant 0 : index
    %3 = vector.load %arg2[%c0_3, %c0_4] : memref<104x144xbf16, #tpu.memory_space<vmem>>, vector<104x144xbf16>
    %cst_5 = arith.constant dense<0.000000e+00> : vector<104x32xf32>
    %4 = tpu.matmul %3, %0, %cst_5 {dimension_numbers = #tpu.dot_dimension_numbers<[1], [0], [0], [1], [0, 0, 1, 1], [], []>} : vector<104x144xbf16>, vector<144x32xbf16>, vector<104x32xf32> -> vector<104x32xf32>
    %5 = arith.maximumf %2, %4 : vector<104x32xf32>
    %c0_6 = arith.constant 0 : index
    %c0_7 = arith.constant 0 : index
    %6 = vector.load %arg3[%c0_6, %c0_7] : memref<104x144xbf16, #tpu.memory_space<vmem>>, vector<104x144xbf16>
    %cst_8 = arith.constant dense<0.000000e+00> : vector<104x32xf32>
    %7 = tpu.matmul %6, %0, %cst_8 {dimension_numbers = #tpu.dot_dimension_numbers<[1], [0], [0], [1], [0, 0, 1, 1], [], []>} : vector<104x144xbf16>, vector<144x32xbf16>, vector<104x32xf32> -> vector<104x32xf32>
    %c0_9 = arith.constant 0 : index
    %c0_10 = arith.constant 0 : index
    %8 = vector.load %arg4[%c0_9, %c0_10] : memref<104x144xbf16, #tpu.memory_space<vmem>>, vector<104x144xbf16>
    %cst_11 = arith.constant dense<0.000000e+00> : vector<104x32xf32>
    %9 = tpu.matmul %8, %0, %cst_11 {dimension_numbers = #tpu.dot_dimension_numbers<[1], [0], [0], [1], [0, 0, 1, 1], [], []>} : vector<104x144xbf16>, vector<144x32xbf16>, vector<104x32xf32> -> vector<104x32xf32>
    %10 = arith.maximumf %7, %9 : vector<104x32xf32>
    %11 = arith.maximumf %5, %10 : vector<104x32xf32>
    %c0_12 = arith.constant 0 : index
    %c0_13 = arith.constant 0 : index
    %12 = vector.load %arg6[%c0_12, %c0_13] : memref<1x32xf32, #tpu.memory_space<vmem>>, vector<1x32xf32>
    %13 = vector.broadcast %12 : vector<1x32xf32> to vector<104x32xf32>
    %14 = arith.addf %11, %13 : vector<104x32xf32>
    %cst_14 = arith.constant 0.000000e+00 : f32
    %15 = vector.broadcast %cst_14 : f32 to vector<104x32xf32>
    %16 = arith.maximumf %14, %15 : vector<104x32xf32>
    %17 = arith.truncf %16 : vector<104x32xf32> to vector<104x32xbf16>
    %c0_15 = arith.constant 0 : index
    %c0_16 = arith.constant 0 : index
    %18 = vector.load %arg7[%c0_15, %c0_16] : memref<104x32xbf16, #tpu.memory_space<vmem>>, vector<104x32xbf16>
    tpu.vector_store %arg7[%c0_15, %c0_16], %17 {strides = array<i32>} : memref<104x32xbf16, #tpu.memory_space<vmem>>, vector<104x32xbf16>,
    return
  }
  func.func @transform_0(%arg0: i32) -> (i32, i32) {
    %c0_i32 = arith.constant 0 : i32
    %c0_i32_0 = arith.constant 0 : i32
    return %arg0, %c0_i32 : i32, i32
  }
  func.func @transform_1(%arg0: i32) -> (i32, i32) {
    %c0_i32 = arith.constant 0 : i32
    %c0_i32_0 = arith.constant 0 : i32
    return %arg0, %c0_i32 : i32, i32
  }
  func.func @transform_2(%arg0: i32) -> (i32, i32) {
    %c0_i32 = arith.constant 0 : i32
    %c0_i32_0 = arith.constant 0 : i32
    return %arg0, %c0_i32 : i32, i32
  }
  func.func @transform_3(%arg0: i32) -> (i32, i32) {
    %c0_i32 = arith.constant 0 : i32
    %c0_i32_0 = arith.constant 0 : i32
    return %arg0, %c0_i32 : i32, i32
  }
  func.func @transform_4(%arg0: i32) -> (i32, i32) {
    %c0_i32 = arith.constant 0 : i32
    %c0_i32_0 = arith.constant 0 : i32
    %c0_i32_1 = arith.constant 0 : i32
    return %c0_i32, %c0_i32_0 : i32, i32
  }
  func.func @transform_5(%arg0: i32) -> (i32, i32) {
    %c0_i32 = arith.constant 0 : i32
    %c0_i32_0 = arith.constant 0 : i32
    %c0_i32_1 = arith.constant 0 : i32
    return %c0_i32, %c0_i32_0 : i32, i32
  }
  func.func @transform_6(%arg0: i32) -> (i32, i32) {
    %c0_i32 = arith.constant 0 : i32
    %c0_i32_0 = arith.constant 0 : i32
    return %arg0, %c0_i32 : i32, i32
  }
}

module attributes {stable_mosaic.version = 11 : i64} {
  func.func @_mm_relu_kernel(%arg0: i32, %arg1: memref<104x288xbf16, #tpu.memory_space<vmem>>, %arg2: memref<288x64xbf16, #tpu.memory_space<vmem>>, %arg3: memref<1x64xf32, #tpu.memory_space<vmem>>, %arg4: memref<104x64xbf16, #tpu.memory_space<vmem>>) attributes {dimension_semantics = [#tpu.dimension_semantics<parallel>], iteration_bounds = array<i64: 1>, scalar_prefetch = 0 : i64, scratch_operands = 0 : i64, tpu.core_type = #tpu.core_type<tc>, window_params = [{transform_indices = @transform_0, window_bounds = array<i64: 104, 288>}, {pipeline_mode = #tpu.pipeline_mode<synchronous>, transform_indices = @transform_1, window_bounds = array<i64: 288, 64>}, {pipeline_mode = #tpu.pipeline_mode<synchronous>, transform_indices = @transform_2, window_bounds = array<i64: 1, 64>}, {transform_indices = @transform_3, window_bounds = array<i64: 104, 64>}]} {
    %c0 = arith.constant 0 : index
    %c0_0 = arith.constant 0 : index
    %0 = vector.load %arg1[%c0, %c0_0] : memref<104x288xbf16, #tpu.memory_space<vmem>>, vector<104x288xbf16>
    %c0_1 = arith.constant 0 : index
    %c0_2 = arith.constant 0 : index
    %1 = vector.load %arg2[%c0_1, %c0_2] : memref<288x64xbf16, #tpu.memory_space<vmem>>, vector<288x64xbf16>
    %cst = arith.constant dense<0.000000e+00> : vector<104x64xf32>
    %2 = tpu.matmul %0, %1, %cst {dimension_numbers = #tpu.dot_dimension_numbers<[1], [0], [0], [1], [0, 0, 1, 1], [], []>} : vector<104x288xbf16>, vector<288x64xbf16>, vector<104x64xf32> -> vector<104x64xf32>
    %c0_3 = arith.constant 0 : index
    %c0_4 = arith.constant 0 : index
    %3 = vector.load %arg3[%c0_3, %c0_4] : memref<1x64xf32, #tpu.memory_space<vmem>>, vector<1x64xf32>
    %4 = vector.broadcast %3 : vector<1x64xf32> to vector<104x64xf32>
    %5 = arith.addf %2, %4 : vector<104x64xf32>
    %cst_5 = arith.constant 0.000000e+00 : f32
    %6 = vector.broadcast %cst_5 : f32 to vector<104x64xf32>
    %7 = arith.maximumf %5, %6 : vector<104x64xf32>
    %8 = arith.truncf %7 : vector<104x64xf32> to vector<104x64xbf16>
    %c0_6 = arith.constant 0 : index
    %c0_7 = arith.constant 0 : index
    %9 = vector.load %arg4[%c0_6, %c0_7] : memref<104x64xbf16, #tpu.memory_space<vmem>>, vector<104x64xbf16>
    tpu.vector_store %arg4[%c0_6, %c0_7], %8 {strides = array<i32>} : memref<104x64xbf16, #tpu.memory_space<vmem>>, vector<104x64xbf16>,
    return
  }
  func.func @transform_0(%arg0: i32) -> (i32, i32) {
    %c0_i32 = arith.constant 0 : i32
    %c0_i32_0 = arith.constant 0 : i32
    return %arg0, %c0_i32 : i32, i32
  }
  func.func @transform_1(%arg0: i32) -> (i32, i32) {
    %c0_i32 = arith.constant 0 : i32
    %c0_i32_0 = arith.constant 0 : i32
    %c0_i32_1 = arith.constant 0 : i32
    return %c0_i32, %c0_i32_0 : i32, i32
  }
  func.func @transform_2(%arg0: i32) -> (i32, i32) {
    %c0_i32 = arith.constant 0 : i32
    %c0_i32_0 = arith.constant 0 : i32
    %c0_i32_1 = arith.constant 0 : i32
    return %c0_i32, %c0_i32_0 : i32, i32
  }
  func.func @transform_3(%arg0: i32) -> (i32, i32) {
    %c0_i32 = arith.constant 0 : i32
    %c0_i32_0 = arith.constant 0 : i32
    return %arg0, %c0_i32 : i32, i32
  }
}

module attributes {stable_mosaic.version = 11 : i64} {
  func.func @_head_kernel(%arg0: i32, %arg1: memref<8x3136xbf16, #tpu.memory_space<vmem>>, %arg2: memref<3136x128xbf16, #tpu.memory_space<vmem>>, %arg3: memref<1x128xf32, #tpu.memory_space<vmem>>, %arg4: memref<128x10xbf16, #tpu.memory_space<vmem>>, %arg5: memref<1x10xf32, #tpu.memory_space<vmem>>, %arg6: memref<8x10xf32, #tpu.memory_space<vmem>>) attributes {dimension_semantics = [#tpu.dimension_semantics<parallel>], iteration_bounds = array<i64: 1>, scalar_prefetch = 0 : i64, scratch_operands = 0 : i64, tpu.core_type = #tpu.core_type<tc>, window_params = [{transform_indices = @transform_0, window_bounds = array<i64: 8, 3136>}, {pipeline_mode = #tpu.pipeline_mode<synchronous>, transform_indices = @transform_1, window_bounds = array<i64: 3136, 128>}, {pipeline_mode = #tpu.pipeline_mode<synchronous>, transform_indices = @transform_2, window_bounds = array<i64: 1, 128>}, {pipeline_mode = #tpu.pipeline_mode<synchronous>, transform_indices = @transform_3, window_bounds = array<i64: 128, 10>}, {pipeline_mode = #tpu.pipeline_mode<synchronous>, transform_indices = @transform_4, window_bounds = array<i64: 1, 10>}, {transform_indices = @transform_5, window_bounds = array<i64: 8, 10>}]} {
    %c0 = arith.constant 0 : index
    %c0_0 = arith.constant 0 : index
    %0 = vector.load %arg1[%c0, %c0_0] : memref<8x3136xbf16, #tpu.memory_space<vmem>>, vector<8x3136xbf16>
    %c0_1 = arith.constant 0 : index
    %c0_2 = arith.constant 0 : index
    %1 = vector.load %arg2[%c0_1, %c0_2] : memref<3136x128xbf16, #tpu.memory_space<vmem>>, vector<3136x128xbf16>
    %cst = arith.constant dense<0.000000e+00> : vector<8x128xf32>
    %2 = tpu.matmul %0, %1, %cst {dimension_numbers = #tpu.dot_dimension_numbers<[1], [0], [0], [1], [0, 0, 1, 1], [], []>} : vector<8x3136xbf16>, vector<3136x128xbf16>, vector<8x128xf32> -> vector<8x128xf32>
    %c0_3 = arith.constant 0 : index
    %c0_4 = arith.constant 0 : index
    %3 = vector.load %arg3[%c0_3, %c0_4] : memref<1x128xf32, #tpu.memory_space<vmem>>, vector<1x128xf32>
    %4 = vector.broadcast %3 : vector<1x128xf32> to vector<8x128xf32>
    %5 = arith.addf %2, %4 : vector<8x128xf32>
    %cst_5 = arith.constant 0.000000e+00 : f32
    %6 = vector.broadcast %cst_5 : f32 to vector<8x128xf32>
    %7 = arith.maximumf %5, %6 : vector<8x128xf32>
    %8 = arith.truncf %7 : vector<8x128xf32> to vector<8x128xbf16>
    %c0_6 = arith.constant 0 : index
    %c0_7 = arith.constant 0 : index
    %9 = vector.load %arg4[%c0_6, %c0_7] : memref<128x10xbf16, #tpu.memory_space<vmem>>, vector<128x10xbf16>
    %cst_8 = arith.constant dense<0.000000e+00> : vector<8x10xf32>
    %10 = tpu.matmul %8, %9, %cst_8 {dimension_numbers = #tpu.dot_dimension_numbers<[1], [0], [0], [1], [0, 0, 1, 1], [], []>} : vector<8x128xbf16>, vector<128x10xbf16>, vector<8x10xf32> -> vector<8x10xf32>
    %c0_9 = arith.constant 0 : index
    %c0_10 = arith.constant 0 : index
    %11 = vector.load %arg5[%c0_9, %c0_10] : memref<1x10xf32, #tpu.memory_space<vmem>>, vector<1x10xf32>
    %12 = vector.broadcast %11 : vector<1x10xf32> to vector<8x10xf32>
    %13 = arith.addf %10, %12 : vector<8x10xf32>
    %cst_11 = arith.constant dense<0xFF800000> : vector<8xf32>
    %14 = vector.multi_reduction <maximumf>, %13, %cst_11 [1] : vector<8x10xf32> to vector<8xf32>
    %15 = vector.shape_cast %14 : vector<8xf32> to vector<8x1xf32>
    %16 = vector.broadcast %15 : vector<8x1xf32> to vector<8x10xf32>
    %17 = arith.subf %13, %16 : vector<8x10xf32>
    %18 = math.exp %17 : vector<8x10xf32>
    %cst_12 = arith.constant dense<0.000000e+00> : vector<8xf32>
    %19 = vector.multi_reduction <add>, %18, %cst_12 [1] : vector<8x10xf32> to vector<8xf32>
    %20 = vector.shape_cast %19 : vector<8xf32> to vector<8x1xf32>
    %21 = tpu.reciprocal %20 {approx = true} : vector<8x1xf32> -> vector<8x1xf32>
    %22 = vector.broadcast %21 : vector<8x1xf32> to vector<8x10xf32>
    %23 = arith.mulf %18, %22 : vector<8x10xf32>
    %c0_13 = arith.constant 0 : index
    %c0_14 = arith.constant 0 : index
    %24 = vector.load %arg6[%c0_13, %c0_14] : memref<8x10xf32, #tpu.memory_space<vmem>>, vector<8x10xf32>
    tpu.vector_store %arg6[%c0_13, %c0_14], %23 {strides = array<i32>} : memref<8x10xf32, #tpu.memory_space<vmem>>, vector<8x10xf32>,
    return
  }
  func.func @transform_0(%arg0: i32) -> (i32, i32) {
    %c0_i32 = arith.constant 0 : i32
    %c0_i32_0 = arith.constant 0 : i32
    return %arg0, %c0_i32 : i32, i32
  }
  func.func @transform_1(%arg0: i32) -> (i32, i32) {
    %c0_i32 = arith.constant 0 : i32
    %c0_i32_0 = arith.constant 0 : i32
    %c0_i32_1 = arith.constant 0 : i32
    return %c0_i32, %c0_i32_0 : i32, i32
  }
  func.func @transform_2(%arg0: i32) -> (i32, i32) {
    %c0_i32 = arith.constant 0 : i32
    %c0_i32_0 = arith.constant 0 : i32
    %c0_i32_1 = arith.constant 0 : i32
    return %c0_i32, %c0_i32_0 : i32, i32
  }
  func.func @transform_3(%arg0: i32) -> (i32, i32) {
    %c0_i32 = arith.constant 0 : i32
    %c0_i32_0 = arith.constant 0 : i32
    %c0_i32_1 = arith.constant 0 : i32
    return %c0_i32, %c0_i32_0 : i32, i32
  }
  func.func @transform_4(%arg0: i32) -> (i32, i32) {
    %c0_i32 = arith.constant 0 : i32
    %c0_i32_0 = arith.constant 0 : i32
    %c0_i32_1 = arith.constant 0 : i32
    return %c0_i32, %c0_i32_0 : i32, i32
  }
  func.func @transform_5(%arg0: i32) -> (i32, i32) {
    %c0_i32 = arith.constant 0 : i32
    %c0_i32_0 = arith.constant 0 : i32
    return %arg0, %c0_i32 : i32, i32
  }
}

</mosaic_0001>

<bundles_post_ra>
// kernel: net_forward.4
= control target key start
LH: loop header
LB: loop body
LE: loop exit
PB: predicated region body
PF: predicated region fallthrough
CT: control target
= control target key end

     0   :  { %vm279_vm0 = vcmask 1043456   ;;  %vm280_vm1 = vcmask 1044480   ;;  %v2499_v2 = vmov 65535   ;;  %vm203_vm2 = vcmask 72704   ;;  %s3196_s4 = inlined_call_operand.vmem [shape: bf16[9,16], index: 4, kind: input, shape index: {}]   ;;  %s3197_s0 = inlined_call_operand.vmem [shape: bf16[392,9], index: 0, kind: input, shape index: {}]   ;;  %s3198_s1 = inlined_call_operand.vmem [shape: bf16[392,9], index: 1, kind: input, shape index: {}]   ;;  %s3199_s2 = inlined_call_operand.vmem [shape: bf16[392,9], index: 2, kind: input, shape index: {}]   ;;  %s3200_s3 = inlined_call_operand.vmem [shape: bf16[392,9], index: 3, kind: input, shape index: {}]   ;;  %s3201_s5 = inlined_call_operand.vmem [shape: f32[1,16], index: 5, kind: input, shape index: {}]   ;;  %s3202_s6 = inlined_call_operand.vmem [shape: bf16[392,16], index: 6, kind: output, shape index: {}]  }
   0x1   :  { %v2009_v0 = vld [vmem:[%s3196_s4] sm:$0xf]  ;;  %v2399_v1 = vld [vmem:[%s3196_s4] sm:$0x10]  ;;  %v281_v3 = vsel %vm279_vm0, 4294967295, %v2499_v2  ;;  %v2401_v11 = vld [vmem:[%s3197_s0 + $0x8] sm:$0xff] }
   0x2   :  { %v2010_v4 = vor.u32 %v2399_v1, %v2009_v0  ;;  %v282_v5 = vsel %vm280_vm1, %v281_v3, 0  ;;  %v2400_v7 = vld [vmem:[%s3197_s0] sm:$0xff]  ;;  %v2425_v12 = vld [vmem:[%s3198_s1 + $0x8] sm:$0xff]  ;;  %v2402_v15 = vld [vmem:[%s3197_s0 + $0x10] sm:$0xff]  ;;  %vm1857_vm3 = vcmask 125952  }
   0x3   :  { %v2424_v8 = vld [vmem:[%s3198_s1] sm:$0xff]  ;;  %v2449_v13 = vld [vmem:[%s3199_s2 + $0x8] sm:$0xff]  ;;  %v2426_v16 = vld [vmem:[%s3198_s1 + $0x10] sm:$0xff] }
   0x4   :  { %v284_v6 = vand.u32 %v2010_v4, %v282_v5  ;;  %v2448_v9 = vld [vmem:[%s3199_s2] sm:$0xff]  ;;  %v2473_v14 = vld [vmem:[%s3200_s3 + $0x8] sm:$0xff]  ;;  %v2450_v17 = vld [vmem:[%s3199_s2 + $0x10] sm:$0xff] }
   0x5   :  { %v2472_v10 = vld [vmem:[%s3200_s3] sm:$0xff]  ;;  %v2474_v18 = vld [vmem:[%s3200_s3 + $0x10] sm:$0xff]  ;;  %v2403_v19 = vld [vmem:[%s3197_s0 + $0x18] sm:$0xff] }
   0x6   :  { %293 = vmatpush.bf16.msra.mxu0 %v284_v6  ;;  %673 = vmatpush.bf16.msra.mxu1 %v284_v6  ;;  %v2427_v20 = vld [vmem:[%s3198_s1 + $0x18] sm:$0xff]  ;;  %v2404_v23 = vld [vmem:[%s3197_s0 + $0x20] sm:$0xff]  ;;  %v2405_v27 = vld [vmem:[%s3197_s0 + $0x28] sm:$0xff] }
   0x7   :  { %1102 = vmatpush.bf16.msra.mxu2 %v284_v6  ;;  %1482 = vmatpush.bf16.msra.mxu3 %v284_v6  ;;  %v2451_v21 = vld [vmem:[%s3199_s2 + $0x18] sm:$0xff]  ;;  %v2428_v24 = vld [vmem:[%s3198_s1 + $0x20] sm:$0xff]  ;;  %v2429_v28 = vld [vmem:[%s3198_s1 + $0x28] sm:$0xff] }
   0x8   :  { %v2475_v22 = vld [vmem:[%s3200_s3 + $0x18] sm:$0xff]  ;;  %v2452_v25 = vld [vmem:[%s3199_s2 + $0x20] sm:$0xff]  ;;  %v2453_v29 = vld [vmem:[%s3199_s2 + $0x28] sm:$0xff] }
   0x9   :  { %2011 = vmatmul.msk.bf16.vlgmr.msra.gmra.mxu0 %vm203_vm2, %v2400_v7  ;;  %2132 = vmatmul.msk.bf16.vlgmr.msra.gmra.mxu1 %vm203_vm2, %v2424_v8  ;;  %v2476_v26 = vld [vmem:[%s3200_s3 + $0x20] sm:$0xff]  ;;  %v2477_v30 = vld [vmem:[%s3200_s3 + $0x28] sm:$0xff]  ;;  %v2406_v31 = vld [vmem:[%s3197_s0 + $0x30] sm:$0xff] }
   0xa   :  { %2253 = vmatmul.msk.bf16.vlgmr.msra.gmra.mxu2 %vm203_vm2, %v2448_v9  ;;  %2374 = vmatmul.msk.bf16.vlgmr.msra.gmra.mxu3 %vm203_vm2, %v2472_v10  ;;  %v2430_v32 = vld [vmem:[%s3198_s1 + $0x30] sm:$0xff]  ;;  %v2407_v35 = vld [vmem:[%s3197_s0 + $0x38] sm:$0xff]  ;;  %v2408_v39 = vld [vmem:[%s3197_s0 + $0x40] sm:$0xff] }
   0xb   :  { %v2454_v33 = vld [vmem:[%s3199_s2 + $0x30] sm:$0xff]  ;;  %v2431_v36 = vld [vmem:[%s3198_s1 + $0x38] sm:$0xff]  ;;  %v2432_v40 = vld [vmem:[%s3198_s1 + $0x40] sm:$0xff] }
   0xc   :  { %v2478_v34 = vld [vmem:[%s3200_s3 + $0x30] sm:$0xff]  ;;  %v2455_v37 = vld [vmem:[%s3199_s2 + $0x38] sm:$0xff]  ;;  %v2456_v43 = vld [vmem:[%s3199_s2 + $0x40] sm:$0xff] }
   0xd   :  { %v2479_v38 = vld [vmem:[%s3200_s3 + $0x38] sm:$0xff]  ;;  %v2480_v44 = vld [vmem:[%s3200_s3 + $0x40] sm:$0xff]  ;;  %v2409_v57 = vld [vmem:[%s3197_s0 + $0x48] sm:$0xff] }
   0xe   :  { %v2688_v49 = vld [vmem:[%s3201_s5] ss:$0 sm:$0xff]  ;;  %v2433_v58 = vld [vmem:[%s3198_s1 + $0x48] sm:$0xff] }
   0xf   :  { %v2457_v0 = vld [vmem:[%s3199_s2 + $0x48] sm:$0xff] }
  0x10   :  { %v2481_v1 = vld [vmem:[%s3200_s3 + $0x48] sm:$0xff] }
  0x19   :  { %2012 = vmatmul.msk.bf16.gmra.mxu0 %vm203_vm2, %v2401_v11  ;;  %2133 = vmatmul.msk.bf16.gmra.mxu1 %vm203_vm2, %v2425_v12 }
  0x1a   :  { %2254 = vmatmul.msk.bf16.gmra.mxu2 %vm203_vm2, %v2449_v13  ;;  %2375 = vmatmul.msk.bf16.gmra.mxu3 %vm203_vm2, %v2473_v14 }
  0x29   :  { %2013 = vmatmul.msk.bf16.gmra.mxu0 %vm203_vm2, %v2402_v15  ;;  %2134 = vmatmul.msk.bf16.gmra.mxu1 %vm203_vm2, %v2426_v16 }
  0x2a   :  { %2255 = vmatmul.msk.bf16.gmra.mxu2 %vm203_vm2, %v2450_v17  ;;  %2376 = vmatmul.msk.bf16.gmra.mxu3 %vm203_vm2, %v2474_v18  ;;  %v2410_v17 = vld [vmem:[%s3197_s0 + $0x50] sm:$0xff] }
  0x2b   :  { %v2434_v18 = vld [vmem:[%s3198_s1 + $0x50] sm:$0xff] }
  0x39   :  { %2014 = vmatmul.msk.bf16.gmra.mxu0 %vm203_vm2, %v2403_v19  ;;  %2135 = vmatmul.msk.bf16.gmra.mxu1 %vm203_vm2, %v2427_v20 }
  0x3a   :  { %2256 = vmatmul.msk.bf16.gmra.mxu2 %vm203_vm2, %v2451_v21  ;;  %2377 = vmatmul.msk.bf16.gmra.mxu3 %vm203_vm2, %v2475_v22 }
  0x49   :  { %2015 = vmatmul.msk.bf16.gmra.mxu0 %vm203_vm2, %v2404_v23  ;;  %2136 = vmatmul.msk.bf16.gmra.mxu1 %vm203_vm2, %v2428_v24  ;;  %v2458_v24 = vld [vmem:[%s3199_s2 + $0x50] sm:$0xff] }
  0x4a   :  { %2257 = vmatmul.msk.bf16.gmra.mxu2 %vm203_vm2, %v2452_v25  ;;  %2378 = vmatmul.msk.bf16.gmra.mxu3 %vm203_vm2, %v2476_v26  ;;  %v2482_v25 = vld [vmem:[%s3200_s3 + $0x50] sm:$0xff] }
  0x59   :  { %2016 = vmatmul.msk.bf16.gmra.mxu0 %vm203_vm2, %v2405_v27  ;;  %2137 = vmatmul.msk.bf16.gmra.mxu1 %vm203_vm2, %v2429_v28 }
  0x5a   :  { %2258 = vmatmul.msk.bf16.gmra.mxu2 %vm203_vm2, %v2453_v29  ;;  %2379 = vmatmul.msk.bf16.gmra.mxu3 %vm203_vm2, %v2477_v30 }
  0x69   :  { %2017 = vmatmul.msk.bf16.gmra.mxu0 %vm203_vm2, %v2406_v31  ;;  %2138 = vmatmul.msk.bf16.gmra.mxu1 %vm203_vm2, %v2430_v32 }
  0x6a   :  { %2259 = vmatmul.msk.bf16.gmra.mxu2 %vm203_vm2, %v2454_v33  ;;  %2380 = vmatmul.msk.bf16.gmra.mxu3 %vm203_vm2, %v2478_v34 }
  0x79   :  { %2018 = vmatmul.msk.bf16.gmra.mxu0 %vm203_vm2, %v2407_v35  ;;  %2139 = vmatmul.msk.bf16.gmra.mxu1 %vm203_vm2, %v2431_v36 }
  0x7a   :  { %2260 = vmatmul.msk.bf16.gmra.mxu2 %vm203_vm2, %v2455_v37  ;;  %2381 = vmatmul.msk.bf16.gmra.mxu3 %vm203_vm2, %v2479_v38 }
  0x86   :  { %v295_v41 = vpop.f32.mrf.mxu0  ;;  %v675_v42 = vpop.f32.mrf.mxu1 }
  0x87   :  { %v799_v45 = vmax.f32 %v295_v41, %v675_v42  ;;  %v2411_v41 = vld [vmem:[%s3197_s0 + $0x58] sm:$0xff] }
  0x88   :  { %v2435_v42 = vld [vmem:[%s3198_s1 + $0x58] sm:$0xff] }
  0x89   :  { %2019 = vmatmul.msk.bf16.gmra.mxu0 %vm203_vm2, %v2408_v39  ;;  %2140 = vmatmul.msk.bf16.gmra.mxu1 %vm203_vm2, %v2432_v40 }
  0x8a   :  { %2261 = vmatmul.msk.bf16.gmra.mxu2 %vm203_vm2, %v2456_v43  ;;  %2382 = vmatmul.msk.bf16.gmra.mxu3 %vm203_vm2, %v2480_v44 }
  0x8d   :  { %v1104_v46 = vpop.f32.mrf.mxu2  ;;  %v1484_v47 = vpop.f32.mrf.mxu3 }
  0x8e   :  { %v1608_v48 = vmax.f32 %v1104_v46, %v1484_v47  ;;  %v297_v50 = vpop.f32.mrf.mxu0  ;;  %v677_v51 = vpop.f32.mrf.mxu1 }
  0x8f   :  { %v800_v60 = vmax.f32 %v297_v50, %v677_v51  ;;  %v2483_v50 = vld [vmem:[%s3200_s3 + $0x58] sm:$0xff] }
  0x90   :  { %v1657_v52 = vmax.f32 %v799_v45, %v1608_v48  ;;  %v2459_v48 = vld [vmem:[%s3199_s2 + $0x58] sm:$0xff] }
  0x92   :  { %v1710_v53 = vadd.f32 %v2688_v49, %v1657_v52 }
  0x94   :  { %v1759_v54 = vmax.f32 %v1710_v53, 0.0 }
  0x95   :  { %v1106_v55 = vpop.f32.mrf.mxu2  ;;  %v1486_v56 = vpop.f32.mrf.mxu3 }
  0x96   :  { %v1808_v59 = vpack.c.bf16 %v1759_v54, %v1759_v54  ;;  %v1609_v61 = vmax.f32 %v1106_v55, %v1486_v56  ;;  %v300_v62 = vpop.f32.mrf.mxu0  ;;  %v680_v63 = vpop.f32.mrf.mxu1 }
  0x97   :  { %v801_v5 = vmax.f32 %v300_v62, %v680_v63 }
  0x98   :  { %1858 = vst.msk [vmem:[%s3202_s6] sm:$0xf] %vm1857_vm3, %v1808_v59  ;;  %v1658_v2 = vmax.f32 %v800_v60, %v1609_v61 }
  0x99   :  { %2020 = vmatmul.msk.bf16.gmra.mxu0 %vm203_vm2, %v2409_v57  ;;  %2141 = vmatmul.msk.bf16.gmra.mxu1 %vm203_vm2, %v2433_v58 }
  0x9a   :  { %v1711_v3 = vadd.f32 %v2688_v49, %v1658_v2  ;;  %2262 = vmatmul.msk.bf16.gmra.mxu2 %vm203_vm2, %v2457_v0  ;;  %2383 = vmatmul.msk.bf16.gmra.mxu3 %vm203_vm2, %v2481_v1  ;;  %v2412_v2 = vld [vmem:[%s3197_s0 + $0x60] sm:$0xff] }
  0x9c   :  { %v1760_v4 = vmax.f32 %v1711_v3, 0.0  ;;  %v2436_v3 = vld [vmem:[%s3198_s1 + $0x60] sm:$0xff] }
  0x9d   :  { %v1109_v6 = vpop.f32.mrf.mxu2  ;;  %v1489_v7 = vpop.f32.mrf.mxu3 }
  0x9e   :  { %v1809_v8 = vpack.c.bf16 %v1760_v4, %v1760_v4  ;;  %v1610_v9 = vmax.f32 %v1109_v6, %v1489_v7  ;;  %v302_v10 = vpop.f32.mrf.mxu0  ;;  %v682_v11 = vpop.f32.mrf.mxu1 }
  0x9f   :  { %v802_v20 = vmax.f32 %v302_v10, %v682_v11  ;;  %v2484_v10 = vld [vmem:[%s3200_s3 + $0x60] sm:$0xff] }
  0xa0   :  { %1859 = vst.msk [vmem:[%s3202_s6 + $0x4] sm:$0xf] %vm1857_vm3, %v1809_v8  ;;  %v1659_v12 = vmax.f32 %v801_v5, %v1610_v9  ;;  %v2460_v9 = vld [vmem:[%s3199_s2 + $0x60] sm:$0xff] }
  0xa2   :  { %v1712_v13 = vadd.f32 %v2688_v49, %v1659_v12 }
  0xa4   :  { %v1761_v14 = vmax.f32 %v1712_v13, 0.0 }
  0xa5   :  { %v1111_v15 = vpop.f32.mrf.mxu2  ;;  %v1491_v16 = vpop.f32.mrf.mxu3 }
  0xa6   :  { %v1810_v19 = vpack.c.bf16 %v1761_v14, %v1761_v14  ;;  %v1611_v21 = vmax.f32 %v1111_v15, %v1491_v16  ;;  %v305_v22 = vpop.f32.mrf.mxu0  ;;  %v685_v23 = vpop.f32.mrf.mxu1 }
  0xa7   :  { %v803_v29 = vmax.f32 %v305_v22, %v685_v23 }
  0xa8   :  { %1860 = vst.msk [vmem:[%s3202_s6 + $0x8] sm:$0xf] %vm1857_vm3, %v1810_v19  ;;  %v1660_v26 = vmax.f32 %v802_v20, %v1611_v21 }
  0xa9   :  { %2021 = vmatmul.msk.bf16.gmra.mxu0 %vm203_vm2, %v2410_v17  ;;  %2142 = vmatmul.msk.bf16.gmra.mxu1 %vm203_vm2, %v2434_v18 }
  0xaa   :  { %v1713_v27 = vadd.f32 %v2688_v49, %v1660_v26  ;;  %2263 = vmatmul.msk.bf16.gmra.mxu2 %vm203_vm2, %v2458_v24  ;;  %2384 = vmatmul.msk.bf16.gmra.mxu3 %vm203_vm2, %v2482_v25  ;;  %v2413_v26 = vld [vmem:[%s3197_s0 + $0x68] sm:$0xff] }
  0xac   :  { %v1762_v28 = vmax.f32 %v1713_v27, 0.0  ;;  %v2437_v27 = vld [vmem:[%s3198_s1 + $0x68] sm:$0xff] }
  0xad   :  { %v1114_v30 = vpop.f32.mrf.mxu2  ;;  %v1494_v31 = vpop.f32.mrf.mxu3 }
  0xae   :  { %v1811_v32 = vpack.c.bf16 %v1762_v28, %v1762_v28  ;;  %v1612_v33 = vmax.f32 %v1114_v30, %v1494_v31  ;;  %v307_v34 = vpop.f32.mrf.mxu0  ;;  %v687_v35 = vpop.f32.mrf.mxu1 }
  0xaf   :  { %v804_v44 = vmax.f32 %v307_v34, %v687_v35  ;;  %v2485_v34 = vld [vmem:[%s3200_s3 + $0x68] sm:$0xff] }
  0xb0   :  { %1861 = vst.msk [vmem:[%s3202_s6 + $0xc] sm:$0xf] %vm1857_vm3, %v1811_v32  ;;  %v1661_v36 = vmax.f32 %v803_v29, %v1612_v33  ;;  %v2461_v33 = vld [vmem:[%s3199_s2 + $0x68] sm:$0xff] }
  0xb2   :  { %v1714_v37 = vadd.f32 %v2688_v49, %v1661_v36 }
  0xb4   :  { %v1763_v38 = vmax.f32 %v1714_v37, 0.0 }
  0xb5   :  { %v1116_v39 = vpop.f32.mrf.mxu2  ;;  %v1496_v40 = vpop.f32.mrf.mxu3 }
  0xb6   :  { %v1812_v43 = vpack.c.bf16 %v1763_v38, %v1763_v38  ;;  %v1613_v45 = vmax.f32 %v1116_v39, %v1496_v40  ;;  %v310_v46 = vpop.f32.mrf.mxu0  ;;  %v690_v47 = vpop.f32.mrf.mxu1 }
  0xb7   :  { %v805_v54 = vmax.f32 %v310_v46, %v690_v47 }
  0xb8   :  { %1862 = vst.msk [vmem:[%s3202_s6 + $0x10] sm:$0xf] %vm1857_vm3, %v1812_v43  ;;  %v1662_v51 = vmax.f32 %v804_v44, %v1613_v45 }
  0xb9   :  { %2022 = vmatmul.msk.bf16.gmra.mxu0 %vm203_vm2, %v2411_v41  ;;  %2143 = vmatmul.msk.bf16.gmra.mxu1 %vm203_vm2, %v2435_v42 }
  0xba   :  { %v1715_v52 = vadd.f32 %v2688_v49, %v1662_v51  ;;  %2264 = vmatmul.msk.bf16.gmra.mxu2 %vm203_vm2, %v2459_v48  ;;  %2385 = vmatmul.msk.bf16.gmra.mxu3 %vm203_vm2, %v2483_v50  ;;  %v2414_v51 = vld [vmem:[%s3197_s0 + $0x70] sm:$0xff] }
  0xbc   :  { %v1764_v53 = vmax.f32 %v1715_v52, 0.0  ;;  %v2438_v52 = vld [vmem:[%s3198_s1 + $0x70] sm:$0xff] }
  0xbd   :  { %v1119_v55 = vpop.f32.mrf.mxu2  ;;  %v1499_v56 = vpop.f32.mrf.mxu3 }
  0xbe   :  { %v1813_v57 = vpack.c.bf16 %v1764_v53, %v1764_v53  ;;  %v1614_v58 = vmax.f32 %v1119_v55, %v1499_v56  ;;  %v312_v59 = vpop.f32.mrf.mxu0  ;;  %v692_v60 = vpop.f32.mrf.mxu1 }
  0xbf   :  { %v806_v5 = vmax.f32 %v312_v59, %v692_v60  ;;  %v2486_v59 = vld [vmem:[%s3200_s3 + $0x70] sm:$0xff] }
  0xc0   :  { %1863 = vst.msk [vmem:[%s3202_s6 + $0x14] sm:$0xf] %vm1857_vm3, %v1813_v57  ;;  %v1663_v61 = vmax.f32 %v805_v54, %v1614_v58  ;;  %v2462_v58 = vld [vmem:[%s3199_s2 + $0x70] sm:$0xff] }
  0xc2   :  { %v1716_v62 = vadd.f32 %v2688_v49, %v1663_v61 }
  0xc4   :  { %v1765_v63 = vmax.f32 %v1716_v62, 0.0 }
  0xc5   :  { %v1121_v0 = vpop.f32.mrf.mxu2  ;;  %v1501_v1 = vpop.f32.mrf.mxu3 }
  0xc6   :  { %v1814_v4 = vpack.c.bf16 %v1765_v63, %v1765_v63  ;;  %v1615_v6 = vmax.f32 %v1121_v0, %v1501_v1  ;;  %v315_v7 = vpop.f32.mrf.mxu0  ;;  %v695_v8 = vpop.f32.mrf.mxu1 }
  0xc7   :  { %v807_v14 = vmax.f32 %v315_v7, %v695_v8 }
  0xc8   :  { %1864 = vst.msk [vmem:[%s3202_s6 + $0x18] sm:$0xf] %vm1857_vm3, %v1814_v4  ;;  %v1664_v11 = vmax.f32 %v806_v5, %v1615_v6 }
  0xc9   :  { %2023 = vmatmul.msk.bf16.gmra.mxu0 %vm203_vm2, %v2412_v2  ;;  %2144 = vmatmul.msk.bf16.gmra.mxu1 %vm203_vm2, %v2436_v3 }
  0xca   :  { %v1717_v12 = vadd.f32 %v2688_v49, %v1664_v11  ;;  %2265 = vmatmul.msk.bf16.gmra.mxu2 %vm203_vm2, %v2460_v9  ;;  %2386 = vmatmul.msk.bf16.gmra.mxu3 %vm203_vm2, %v2484_v10  ;;  %v2415_v11 = vld [vmem:[%s3197_s0 + $0x78] sm:$0xff] }
  0xcc   :  { %v1766_v13 = vmax.f32 %v1717_v12, 0.0  ;;  %v2439_v12 = vld [vmem:[%s3198_s1 + $0x78] sm:$0xff] }
  0xcd   :  { %v1124_v15 = vpop.f32.mrf.mxu2  ;;  %v1504_v16 = vpop.f32.mrf.mxu3 }
  0xce   :  { %v1815_v17 = vpack.c.bf16 %v1766_v13, %v1766_v13  ;;  %v1616_v18 = vmax.f32 %v1124_v15, %v1504_v16  ;;  %v317_v19 = vpop.f32.mrf.mxu0  ;;  %v697_v20 = vpop.f32.mrf.mxu1 }
  0xcf   :  { %v808_v29 = vmax.f32 %v317_v19, %v697_v20  ;;  %v2487_v19 = vld [vmem:[%s3200_s3 + $0x78] sm:$0xff] }
  0xd0   :  { %1865 = vst.msk [vmem:[%s3202_s6 + $0x1c] sm:$0xf] %vm1857_vm3, %v1815_v17  ;;  %v1665_v21 = vmax.f32 %v807_v14, %v1616_v18  ;;  %v2463_v18 = vld [vmem:[%s3199_s2 + $0x78] sm:$0xff] }
  0xd2   :  { %v1718_v22 = vadd.f32 %v2688_v49, %v1665_v21 }
  0xd4   :  { %v1767_v23 = vmax.f32 %v1718_v22, 0.0 }
  0xd5   :  { %v1126_v24 = vpop.f32.mrf.mxu2  ;;  %v1506_v25 = vpop.f32.mrf.mxu3 }
  0xd6   :  { %v1816_v28 = vpack.c.bf16 %v1767_v23, %v1767_v23  ;;  %v1617_v30 = vmax.f32 %v1126_v24, %v1506_v25  ;;  %v320_v31 = vpop.f32.mrf.mxu0  ;;  %v700_v32 = vpop.f32.mrf.mxu1 }
  0xd7   :  { %v809_v38 = vmax.f32 %v320_v31, %v700_v32 }
  0xd8   :  { %1866 = vst.msk [vmem:[%s3202_s6 + $0x20] sm:$0xf] %vm1857_vm3, %v1816_v28  ;;  %v1666_v35 = vmax.f32 %v808_v29, %v1617_v30 }
  0xd9   :  { %2024 = vmatmul.msk.bf16.gmra.mxu0 %vm203_vm2, %v2413_v26  ;;  %2145 = vmatmul.msk.bf16.gmra.mxu1 %vm203_vm2, %v2437_v27 }
  0xda   :  { %v1719_v36 = vadd.f32 %v2688_v49, %v1666_v35  ;;  %2266 = vmatmul.msk.bf16.gmra.mxu2 %vm203_vm2, %v2461_v33  ;;  %2387 = vmatmul.msk.bf16.gmra.mxu3 %vm203_vm2, %v2485_v34  ;;  %v2416_v35 = vld [vmem:[%s3197_s0 + $0x80] sm:$0xff] }
  0xdc   :  { %v1768_v37 = vmax.f32 %v1719_v36, 0.0  ;;  %v2440_v36 = vld [vmem:[%s3198_s1 + $0x80] sm:$0xff] }
  0xdd   :  { %v1129_v39 = vpop.f32.mrf.mxu2  ;;  %v1509_v40 = vpop.f32.mrf.mxu3 }
  0xde   :  { %v1817_v41 = vpack.c.bf16 %v1768_v37, %v1768_v37  ;;  %v1618_v42 = vmax.f32 %v1129_v39, %v1509_v40  ;;  %v322_v43 = vpop.f32.mrf.mxu0  ;;  %v702_v44 = vpop.f32.mrf.mxu1 }
  0xdf   :  { %v810_v54 = vmax.f32 %v322_v43, %v702_v44  ;;  %v2488_v43 = vld [vmem:[%s3200_s3 + $0x80] sm:$0xff] }
  0xe0   :  { %1867 = vst.msk [vmem:[%s3202_s6 + $0x24] sm:$0xf] %vm1857_vm3, %v1817_v41  ;;  %v1667_v45 = vmax.f32 %v809_v38, %v1618_v42  ;;  %v2464_v42 = vld [vmem:[%s3199_s2 + $0x80] sm:$0xff] }
  0xe2   :  { %v1720_v46 = vadd.f32 %v2688_v49, %v1667_v45 }
  0xe4   :  { %v1769_v47 = vmax.f32 %v1720_v46, 0.0 }
  0xe5   :  { %v1131_v48 = vpop.f32.mrf.mxu2  ;;  %v1511_v50 = vpop.f32.mrf.mxu3 }
  0xe6   :  { %v1818_v53 = vpack.c.bf16 %v1769_v47, %v1769_v47  ;;  %v1619_v55 = vmax.f32 %v1131_v48, %v1511_v50  ;;  %v325_v56 = vpop.f32.mrf.mxu0  ;;  %v705_v57 = vpop.f32.mrf.mxu1 }
  0xe7   :  { %v811_v63 = vmax.f32 %v325_v56, %v705_v57 }
  0xe8   :  { %1868 = vst.msk [vmem:[%s3202_s6 + $0x28] sm:$0xf] %vm1857_vm3, %v1818_v53  ;;  %v1668_v60 = vmax.f32 %v810_v54, %v1619_v55 }
  0xe9   :  { %2025 = vmatmul.msk.bf16.gmra.mxu0 %vm203_vm2, %v2414_v51  ;;  %2146 = vmatmul.msk.bf16.gmra.mxu1 %vm203_vm2, %v2438_v52 }
  0xea   :  { %v1721_v61 = vadd.f32 %v2688_v49, %v1668_v60  ;;  %2267 = vmatmul.msk.bf16.gmra.mxu2 %vm203_vm2, %v2462_v58  ;;  %2388 = vmatmul.msk.bf16.gmra.mxu3 %vm203_vm2, %v2486_v59  ;;  %v2417_v60 = vld [vmem:[%s3197_s0 + $0x88] sm:$0xff] }
  0xec   :  { %v1770_v62 = vmax.f32 %v1721_v61, 0.0  ;;  %v2441_v61 = vld [vmem:[%s3198_s1 + $0x88] sm:$0xff] }
  0xed   :  { %v1134_v0 = vpop.f32.mrf.mxu2  ;;  %v1514_v1 = vpop.f32.mrf.mxu3 }
  0xee   :  { %v1819_v2 = vpack.c.bf16 %v1770_v62, %v1770_v62  ;;  %v1620_v3 = vmax.f32 %v1134_v0, %v1514_v1  ;;  %v327_v4 = vpop.f32.mrf.mxu0  ;;  %v707_v5 = vpop.f32.mrf.mxu1 }
  0xef   :  { %v812_v14 = vmax.f32 %v327_v4, %v707_v5  ;;  %v2489_v4 = vld [vmem:[%s3200_s3 + $0x88] sm:$0xff] }
  0xf0   :  { %1869 = vst.msk [vmem:[%s3202_s6 + $0x2c] sm:$0xf] %vm1857_vm3, %v1819_v2  ;;  %v1669_v6 = vmax.f32 %v811_v63, %v1620_v3  ;;  %v2465_v3 = vld [vmem:[%s3199_s2 + $0x88] sm:$0xff] }
  0xf2   :  { %v1722_v7 = vadd.f32 %v2688_v49, %v1669_v6 }
  0xf4   :  { %v1771_v8 = vmax.f32 %v1722_v7, 0.0 }
  0xf5   :  { %v1136_v9 = vpop.f32.mrf.mxu2  ;;  %v1516_v10 = vpop.f32.mrf.mxu3 }
  0xf6   :  { %v1820_v13 = vpack.c.bf16 %v1771_v8, %v1771_v8  ;;  %v1621_v15 = vmax.f32 %v1136_v9, %v1516_v10  ;;  %v330_v16 = vpop.f32.mrf.mxu0  ;;  %v710_v17 = vpop.f32.mrf.mxu1 }
  0xf7   :  { %v813_v23 = vmax.f32 %v330_v16, %v710_v17 }
  0xf8   :  { %1870 = vst.msk [vmem:[%s3202_s6 + $0x30] sm:$0xf] %vm1857_vm3, %v1820_v13  ;;  %v1670_v20 = vmax.f32 %v812_v14, %v1621_v15 }
  0xf9   :  { %2026 = vmatmul.msk.bf16.gmra.mxu0 %vm203_vm2, %v2415_v11  ;;  %2147 = vmatmul.msk.bf16.gmra.mxu1 %vm203_vm2, %v2439_v12 }
  0xfa   :  { %v1723_v21 = vadd.f32 %v2688_v49, %v1670_v20  ;;  %2268 = vmatmul.msk.bf16.gmra.mxu2 %vm203_vm2, %v2463_v18  ;;  %2389 = vmatmul.msk.bf16.gmra.mxu3 %vm203_vm2, %v2487_v19  ;;  %v2418_v20 = vld [vmem:[%s3197_s0 + $0x90] sm:$0xff] }
  0xfc   :  { %v1772_v22 = vmax.f32 %v1723_v21, 0.0  ;;  %v2442_v21 = vld [vmem:[%s3198_s1 + $0x90] sm:$0xff] }
  0xfd   :  { %v1139_v24 = vpop.f32.mrf.mxu2  ;;  %v1519_v25 = vpop.f32.mrf.mxu3 }
  0xfe   :  { %v1821_v26 = vpack.c.bf16 %v1772_v22, %v1772_v22  ;;  %v1622_v27 = vmax.f32 %v1139_v24, %v1519_v25  ;;  %v332_v28 = vpop.f32.mrf.mxu0  ;;  %v712_v29 = vpop.f32.mrf.mxu1 }
  0xff   :  { %v814_v38 = vmax.f32 %v332_v28, %v712_v29  ;;  %v2490_v28 = vld [vmem:[%s3200_s3 + $0x90] sm:$0xff] }
 0x100   :  { %1871 = vst.msk [vmem:[%s3202_s6 + $0x34] sm:$0xf] %vm1857_vm3, %v1821_v26  ;;  %v1671_v30 = vmax.f32 %v813_v23, %v1622_v27  ;;  %v2466_v27 = vld [vmem:[%s3199_s2 + $0x90] sm:$0xff] }
 0x102   :  { %v1724_v31 = vadd.f32 %v2688_v49, %v1671_v30 }
 0x104   :  { %v1773_v32 = vmax.f32 %v1724_v31, 0.0 }
 0x105   :  { %v1141_v33 = vpop.f32.mrf.mxu2  ;;  %v1521_v34 = vpop.f32.mrf.mxu3 }
 0x106   :  { %v1822_v37 = vpack.c.bf16 %v1773_v32, %v1773_v32  ;;  %v1623_v39 = vmax.f32 %v1141_v33, %v1521_v34  ;;  %v335_v40 = vpop.f32.mrf.mxu0  ;;  %v715_v41 = vpop.f32.mrf.mxu1 }
 0x107   :  { %v815_v47 = vmax.f32 %v335_v40, %v715_v41 }
 0x108   :  { %1872 = vst.msk [vmem:[%s3202_s6 + $0x38] sm:$0xf] %vm1857_vm3, %v1822_v37  ;;  %v1672_v44 = vmax.f32 %v814_v38, %v1623_v39 }
 0x109   :  { %2027 = vmatmul.msk.bf16.gmra.mxu0 %vm203_vm2, %v2416_v35  ;;  %2148 = vmatmul.msk.bf16.gmra.mxu1 %vm203_vm2, %v2440_v36 }
 0x10a   :  { %v1725_v45 = vadd.f32 %v2688_v49, %v1672_v44  ;;  %2269 = vmatmul.msk.bf16.gmra.mxu2 %vm203_vm2, %v2464_v42  ;;  %2390 = vmatmul.msk.bf16.gmra.mxu3 %vm203_vm2, %v2488_v43  ;;  %v2419_v44 = vld [vmem:[%s3197_s0 + $0x98] sm:$0xff] }
 0x10c   :  { %v1774_v46 = vmax.f32 %v1725_v45, 0.0  ;;  %v2443_v45 = vld [vmem:[%s3198_s1 + $0x98] sm:$0xff] }
 0x10d   :  { %v1144_v48 = vpop.f32.mrf.mxu2  ;;  %v1524_v50 = vpop.f32.mrf.mxu3 }
 0x10e   :  { %v1823_v51 = vpack.c.bf16 %v1774_v46, %v1774_v46  ;;  %v1624_v52 = vmax.f32 %v1144_v48, %v1524_v50  ;;  %v337_v53 = vpop.f32.mrf.mxu0  ;;  %v717_v54 = vpop.f32.mrf.mxu1 }
 0x10f   :  { %v816_v63 = vmax.f32 %v337_v53, %v717_v54  ;;  %v2491_v53 = vld [vmem:[%s3200_s3 + $0x98] sm:$0xff] }
 0x110   :  { %1873 = vst.msk [vmem:[%s3202_s6 + $0x3c] sm:$0xf] %vm1857_vm3, %v1823_v51  ;;  %v1673_v55 = vmax.f32 %v815_v47, %v1624_v52  ;;  %v2467_v52 = vld [vmem:[%s3199_s2 + $0x98] sm:$0xff] }
 0x112   :  { %v1726_v56 = vadd.f32 %v2688_v49, %v1673_v55 }
 0x114   :  { %v1775_v57 = vmax.f32 %v1726_v56, 0.0 }
 0x115   :  { %v1146_v58 = vpop.f32.mrf.mxu2  ;;  %v1526_v59 = vpop.f32.mrf.mxu3 }
 0x116   :  { %v1824_v62 = vpack.c.bf16 %v1775_v57, %v1775_v57  ;;  %v1625_v0 = vmax.f32 %v1146_v58, %v1526_v59  ;;  %v340_v1 = vpop.f32.mrf.mxu0  ;;  %v720_v2 = vpop.f32.mrf.mxu1 }
 0x117   :  { %v817_v8 = vmax.f32 %v340_v1, %v720_v2 }
 0x118   :  { %1874 = vst.msk [vmem:[%s3202_s6 + $0x40] sm:$0xf] %vm1857_vm3, %v1824_v62  ;;  %v1674_v5 = vmax.f32 %v816_v63, %v1625_v0 }
 0x119   :  { %2028 = vmatmul.msk.bf16.gmra.mxu0 %vm203_vm2, %v2417_v60  ;;  %2149 = vmatmul.msk.bf16.gmra.mxu1 %vm203_vm2, %v2441_v61 }
 0x11a   :  { %v1727_v6 = vadd.f32 %v2688_v49, %v1674_v5  ;;  %2270 = vmatmul.msk.bf16.gmra.mxu2 %vm203_vm2, %v2465_v3  ;;  %2391 = vmatmul.msk.bf16.gmra.mxu3 %vm203_vm2, %v2489_v4  ;;  %v2420_v5 = vld [vmem:[%s3197_s0 + $0xa0] sm:$0xff] }
 0x11c   :  { %v1776_v7 = vmax.f32 %v1727_v6, 0.0  ;;  %v2444_v6 = vld [vmem:[%s3198_s1 + $0xa0] sm:$0xff] }
 0x11d   :  { %v1149_v9 = vpop.f32.mrf.mxu2  ;;  %v1529_v10 = vpop.f32.mrf.mxu3 }
 0x11e   :  { %v1825_v11 = vpack.c.bf16 %v1776_v7, %v1776_v7  ;;  %v1626_v12 = vmax.f32 %v1149_v9, %v1529_v10  ;;  %v342_v13 = vpop.f32.mrf.mxu0  ;;  %v722_v14 = vpop.f32.mrf.mxu1 }
 0x11f   :  { %v818_v23 = vmax.f32 %v342_v13, %v722_v14  ;;  %v2492_v13 = vld [vmem:[%s3200_s3 + $0xa0] sm:$0xff] }
 0x120   :  { %1875 = vst.msk [vmem:[%s3202_s6 + $0x44] sm:$0xf] %vm1857_vm3, %v1825_v11  ;;  %v1675_v15 = vmax.f32 %v817_v8, %v1626_v12  ;;  %v2468_v12 = vld [vmem:[%s3199_s2 + $0xa0] sm:$0xff] }
 0x122   :  { %v1728_v16 = vadd.f32 %v2688_v49, %v1675_v15 }
 0x124   :  { %v1777_v17 = vmax.f32 %v1728_v16, 0.0 }
 0x125   :  { %v1151_v18 = vpop.f32.mrf.mxu2  ;;  %v1531_v19 = vpop.f32.mrf.mxu3 }
 0x126   :  { %v1826_v22 = vpack.c.bf16 %v1777_v17, %v1777_v17  ;;  %v1627_v24 = vmax.f32 %v1151_v18, %v1531_v19  ;;  %v345_v25 = vpop.f32.mrf.mxu0  ;;  %v725_v26 = vpop.f32.mrf.mxu1 }
 0x127   :  { %v819_v32 = vmax.f32 %v345_v25, %v725_v26 }
 0x128   :  { %1876 = vst.msk [vmem:[%s3202_s6 + $0x48] sm:$0xf] %vm1857_vm3, %v1826_v22  ;;  %v1676_v29 = vmax.f32 %v818_v23, %v1627_v24 }
 0x129   :  { %2029 = vmatmul.msk.bf16.gmra.mxu0 %vm203_vm2, %v2418_v20  ;;  %2150 = vmatmul.msk.bf16.gmra.mxu1 %vm203_vm2, %v2442_v21 }
 0x12a   :  { %v1729_v30 = vadd.f32 %v2688_v49, %v1676_v29  ;;  %2271 = vmatmul.msk.bf16.gmra.mxu2 %vm203_vm2, %v2466_v27  ;;  %2392 = vmatmul.msk.bf16.gmra.mxu3 %vm203_vm2, %v2490_v28  ;;  %v2421_v29 = vld [vmem:[%s3197_s0 + $0xa8] sm:$0xff] }
 0x12c   :  { %v1778_v31 = vmax.f32 %v1729_v30, 0.0  ;;  %v2445_v30 = vld [vmem:[%s3198_s1 + $0xa8] sm:$0xff] }
 0x12d   :  { %v1154_v33 = vpop.f32.mrf.mxu2  ;;  %v1534_v34 = vpop.f32.mrf.mxu3 }
 0x12e   :  { %v1827_v35 = vpack.c.bf16 %v1778_v31, %v1778_v31  ;;  %v1628_v36 = vmax.f32 %v1154_v33, %v1534_v34  ;;  %v347_v37 = vpop.f32.mrf.mxu0  ;;  %v727_v38 = vpop.f32.mrf.mxu1 }
 0x12f   :  { %v820_v47 = vmax.f32 %v347_v37, %v727_v38  ;;  %v2493_v37 = vld [vmem:[%s3200_s3 + $0xa8] sm:$0xff] }
 0x130   :  { %1877 = vst.msk [vmem:[%s3202_s6 + $0x4c] sm:$0xf] %vm1857_vm3, %v1827_v35  ;;  %v1677_v39 = vmax.f32 %v819_v32, %v1628_v36  ;;  %v2469_v36 = vld [vmem:[%s3199_s2 + $0xa8] sm:$0xff] }
 0x132   :  { %v1730_v40 = vadd.f32 %v2688_v49, %v1677_v39 }
 0x134   :  { %v1779_v41 = vmax.f32 %v1730_v40, 0.0 }
 0x135   :  { %v1156_v42 = vpop.f32.mrf.mxu2  ;;  %v1536_v43 = vpop.f32.mrf.mxu3 }
 0x136   :  { %v1828_v46 = vpack.c.bf16 %v1779_v41, %v1779_v41  ;;  %v1629_v48 = vmax.f32 %v1156_v42, %v1536_v43  ;;  %v350_v50 = vpop.f32.mrf.mxu0  ;;  %v730_v51 = vpop.f32.mrf.mxu1 }
 0x137   :  { %v821_v57 = vmax.f32 %v350_v50, %v730_v51 }
 0x138   :  { %1878 = vst.msk [vmem:[%s3202_s6 + $0x50] sm:$0xf] %vm1857_vm3, %v1828_v46  ;;  %v1678_v54 = vmax.f32 %v820_v47, %v1629_v48 }
 0x139   :  { %2030 = vmatmul.msk.bf16.gmra.mxu0 %vm203_vm2, %v2419_v44  ;;  %2151 = vmatmul.msk.bf16.gmra.mxu1 %vm203_vm2, %v2443_v45 }
 0x13a   :  { %v1731_v55 = vadd.f32 %v2688_v49, %v1678_v54  ;;  %2272 = vmatmul.msk.bf16.gmra.mxu2 %vm203_vm2, %v2467_v52  ;;  %2393 = vmatmul.msk.bf16.gmra.mxu3 %vm203_vm2, %v2491_v53  ;;  %v2422_v54 = vld [vmem:[%s3197_s0 + $0xb0] sm:$0xff] }
 0x13c   :  { %v1780_v56 = vmax.f32 %v1731_v55, 0.0  ;;  %v2446_v55 = vld [vmem:[%s3198_s1 + $0xb0] sm:$0xff] }
 0x13d   :  { %v1159_v58 = vpop.f32.mrf.mxu2  ;;  %v1539_v59 = vpop.f32.mrf.mxu3 }
 0x13e   :  { %v1829_v60 = vpack.c.bf16 %v1780_v56, %v1780_v56  ;;  %v1630_v61 = vmax.f32 %v1159_v58, %v1539_v59  ;;  %v352_v62 = vpop.f32.mrf.mxu0  ;;  %v732_v63 = vpop.f32.mrf.mxu1 }
 0x13f   :  { %v822_v8 = vmax.f32 %v352_v62, %v732_v63  ;;  %v2494_v62 = vld [vmem:[%s3200_s3 + $0xb0] sm:$0xff] }
 0x140   :  { %1879 = vst.msk [vmem:[%s3202_s6 + $0x54] sm:$0xf] %vm1857_vm3, %v1829_v60  ;;  %v1679_v0 = vmax.f32 %v821_v57, %v1630_v61  ;;  %v2470_v61 = vld [vmem:[%s3199_s2 + $0xb0] sm:$0xff] }
 0x142   :  { %v1732_v1 = vadd.f32 %v2688_v49, %v1679_v0 }
 0x144   :  { %v1781_v2 = vmax.f32 %v1732_v1, 0.0 }
 0x145   :  { %v1161_v3 = vpop.f32.mrf.mxu2  ;;  %v1541_v4 = vpop.f32.mrf.mxu3 }
 0x146   :  { %v1830_v7 = vpack.c.bf16 %v1781_v2, %v1781_v2  ;;  %v1631_v9 = vmax.f32 %v1161_v3, %v1541_v4  ;;  %v355_v10 = vpop.f32.mrf.mxu0  ;;  %v735_v11 = vpop.f32.mrf.mxu1 }
 0x147   :  { %v823_v17 = vmax.f32 %v355_v10, %v735_v11 }
 0x148   :  { %1880 = vst.msk [vmem:[%s3202_s6 + $0x58] sm:$0xf] %vm1857_vm3, %v1830_v7  ;;  %v1680_v14 = vmax.f32 %v822_v8, %v1631_v9 }
 0x149   :  { %2031 = vmatmul.msk.bf16.gmra.mxu0 %vm203_vm2, %v2420_v5  ;;  %2152 = vmatmul.msk.bf16.gmra.mxu1 %vm203_vm2, %v2444_v6 }
 0x14a   :  { %v1733_v15 = vadd.f32 %v2688_v49, %v1680_v14  ;;  %2273 = vmatmul.msk.bf16.gmra.mxu2 %vm203_vm2, %v2468_v12  ;;  %2394 = vmatmul.msk.bf16.gmra.mxu3 %vm203_vm2, %v2492_v13  ;;  %v2423_v14 = vld [vmem:[%s3197_s0 + $0xb8] sm:$0xff] }
 0x14c   :  { %v1782_v16 = vmax.f32 %v1733_v15, 0.0  ;;  %v2447_v15 = vld [vmem:[%s3198_s1 + $0xb8] sm:$0xff] }
 0x14d   :  { %v1164_v18 = vpop.f32.mrf.mxu2  ;;  %v1544_v19 = vpop.f32.mrf.mxu3 }
 0x14e   :  { %v1831_v20 = vpack.c.bf16 %v1782_v16, %v1782_v16  ;;  %v1632_v21 = vmax.f32 %v1164_v18, %v1544_v19  ;;  %v357_v22 = vpop.f32.mrf.mxu0  ;;  %v737_v23 = vpop.f32.mrf.mxu1 }
 0x14f   :  { %v824_v32 = vmax.f32 %v357_v22, %v737_v23  ;;  %v2495_v22 = vld [vmem:[%s3200_s3 + $0xb8] sm:$0xff] }
 0x150   :  { %1881 = vst.msk [vmem:[%s3202_s6 + $0x5c] sm:$0xf] %vm1857_vm3, %v1831_v20  ;;  %v1681_v24 = vmax.f32 %v823_v17, %v1632_v21  ;;  %v2471_v21 = vld [vmem:[%s3199_s2 + $0xb8] sm:$0xff] }
 0x152   :  { %v1734_v25 = vadd.f32 %v2688_v49, %v1681_v24 }
 0x154   :  { %v1783_v26 = vmax.f32 %v1734_v25, 0.0 }
 0x155   :  { %v1166_v27 = vpop.f32.mrf.mxu2  ;;  %v1546_v28 = vpop.f32.mrf.mxu3 }
 0x156   :  { %v1832_v31 = vpack.c.bf16 %v1783_v26, %v1783_v26  ;;  %v1633_v33 = vmax.f32 %v1166_v27, %v1546_v28  ;;  %v360_v34 = vpop.f32.mrf.mxu0  ;;  %v740_v35 = vpop.f32.mrf.mxu1 }
 0x157   :  { %v825_v41 = vmax.f32 %v360_v34, %v740_v35  ;;  %v467_v34 = vld [vmem:[%s3198_s1 + $0xc0] sm:$0xf] }
 0x158   :  { %1882 = vst.msk [vmem:[%s3202_s6 + $0x60] sm:$0xf] %vm1857_vm3, %v1832_v31  ;;  %v1682_v38 = vmax.f32 %v824_v32, %v1633_v33  ;;  %v74_v33 = vld [vmem:[%s3197_s0 + $0xc0] sm:$0xf] }
 0x159   :  { %2032 = vmatmul.msk.bf16.gmra.mxu0 %vm203_vm2, %v2421_v29  ;;  %2153 = vmatmul.msk.bf16.gmra.mxu1 %vm203_vm2, %v2445_v30  ;;  %v896_v35 = vld [vmem:[%s3199_s2 + $0xc0] sm:$0xf] }
 0x15a   :  { %v1735_v39 = vadd.f32 %v2688_v49, %v1682_v38  ;;  %2274 = vmatmul.msk.bf16.gmra.mxu2 %vm203_vm2, %v2469_v36  ;;  %2395 = vmatmul.msk.bf16.gmra.mxu3 %vm203_vm2, %v2493_v37  ;;  %v1276_v36 = vld [vmem:[%s3200_s3 + $0xc0] sm:$0xf]  ;;  %v172_v38 = vunpack.c.l.b16 %v74_v33 }
 0x15c   :  { %v1784_v40 = vmax.f32 %v1735_v39, 0.0  ;;  %v565_v39 = vunpack.c.l.b16 %v467_v34 }
 0x15d   :  { %v1169_v42 = vpop.f32.mrf.mxu2  ;;  %v1549_v43 = vpop.f32.mrf.mxu3 }
 0x15e   :  { %v1833_v44 = vpack.c.bf16 %v1784_v40, %v1784_v40  ;;  %v1634_v45 = vmax.f32 %v1169_v42, %v1549_v43  ;;  %v362_v46 = vpop.f32.mrf.mxu0  ;;  %v742_v47 = vpop.f32.mrf.mxu1  ;;  %v994_v40 = vunpack.c.l.b16 %v896_v35  ;;  %v1374_v42 = vunpack.c.l.b16 %v1276_v36 }
 0x15f   :  { %v826_v57 = vmax.f32 %v362_v46, %v742_v47  ;;  %v197_v46 = vpack.c.b16 %v172_v38, %v172_v38  ;;  %v590_v47 = vpack.c.b16 %v565_v39, %v565_v39 }
 0x160   :  { %1883 = vst.msk [vmem:[%s3202_s6 + $0x64] sm:$0xf] %vm1857_vm3, %v1833_v44  ;;  %v1683_v48 = vmax.f32 %v825_v41, %v1634_v45 }
 0x162   :  { %v1736_v50 = vadd.f32 %v2688_v49, %v1683_v48  ;;  %v1019_v48 = vpack.c.b16 %v994_v40, %v994_v40 }
 0x164   :  { %v1785_v51 = vmax.f32 %v1736_v50, 0.0 }
 0x165   :  { %v1171_v52 = vpop.f32.mrf.mxu2  ;;  %v1551_v53 = vpop.f32.mrf.mxu3 }
 0x166   :  { %v1834_v56 = vpack.c.bf16 %v1785_v51, %v1785_v51  ;;  %v1635_v58 = vmax.f32 %v1171_v52, %v1551_v53  ;;  %v365_v59 = vpop.f32.mrf.mxu0  ;;  %v745_v60 = vpop.f32.mrf.mxu1 }
 0x167   :  { %v827_v2 = vmax.f32 %v365_v59, %v745_v60 }
 0x168   :  { %1884 = vst.msk [vmem:[%s3202_s6 + $0x68] sm:$0xf] %vm1857_vm3, %v1834_v56  ;;  %v1684_v63 = vmax.f32 %v826_v57, %v1635_v58 }
 0x169   :  { %2033 = vmatmul.msk.bf16.gmra.mxu0 %vm203_vm2, %v2422_v54  ;;  %2154 = vmatmul.msk.bf16.gmra.mxu1 %vm203_vm2, %v2446_v55  ;;  %v1399_v55 = vpack.c.b16 %v1374_v42, %v1374_v42 }
 0x16a   :  { %v1737_v0 = vadd.f32 %v2688_v49, %v1684_v63  ;;  %2275 = vmatmul.msk.bf16.gmra.mxu2 %vm203_vm2, %v2470_v61  ;;  %2396 = vmatmul.msk.bf16.gmra.mxu3 %vm203_vm2, %v2494_v62 }
 0x16c   :  { %v1786_v1 = vmax.f32 %v1737_v0, 0.0 }
 0x16d   :  { %v1174_v3 = vpop.f32.mrf.mxu2  ;;  %v1554_v4 = vpop.f32.mrf.mxu3 }
 0x16e   :  { %v1835_v5 = vpack.c.bf16 %v1786_v1, %v1786_v1  ;;  %v1636_v6 = vmax.f32 %v1174_v3, %v1554_v4  ;;  %v367_v7 = vpop.f32.mrf.mxu0  ;;  %v747_v8 = vpop.f32.mrf.mxu1 }
 0x16f   :  { %v828_v17 = vmax.f32 %v367_v7, %v747_v8 }
 0x170   :  { %1885 = vst.msk [vmem:[%s3202_s6 + $0x6c] sm:$0xf] %vm1857_vm3, %v1835_v5  ;;  %v1685_v9 = vmax.f32 %v827_v2, %v1636_v6 }
 0x172   :  { %v1738_v10 = vadd.f32 %v2688_v49, %v1685_v9 }
 0x174   :  { %v1787_v11 = vmax.f32 %v1738_v10, 0.0 }
 0x175   :  { %v1176_v12 = vpop.f32.mrf.mxu2  ;;  %v1556_v13 = vpop.f32.mrf.mxu3 }
 0x176   :  { %v1836_v16 = vpack.c.bf16 %v1787_v11, %v1787_v11  ;;  %v1637_v18 = vmax.f32 %v1176_v12, %v1556_v13  ;;  %v370_v19 = vpop.f32.mrf.mxu0  ;;  %v750_v20 = vpop.f32.mrf.mxu1 }
 0x177   :  { %v829_v26 = vmax.f32 %v370_v19, %v750_v20 }
 0x178   :  { %1886 = vst.msk [vmem:[%s3202_s6 + $0x70] sm:$0xf] %vm1857_vm3, %v1836_v16  ;;  %v1686_v23 = vmax.f32 %v828_v17, %v1637_v18 }
 0x179   :  { %2034 = vmatmul.msk.bf16.gmra.mxu0 %vm203_vm2, %v2423_v14  ;;  %2155 = vmatmul.msk.bf16.gmra.mxu1 %vm203_vm2, %v2447_v15 }
 0x17a   :  { %v1739_v24 = vadd.f32 %v2688_v49, %v1686_v23  ;;  %2276 = vmatmul.msk.bf16.gmra.mxu2 %vm203_vm2, %v2471_v21  ;;  %2397 = vmatmul.msk.bf16.gmra.mxu3 %vm203_vm2, %v2495_v22  ;;  %v3119_v23 = vld [vmem:[%s3201_s5] ss:$0 sm:$0xff] }
 0x17c   :  { %v1788_v25 = vmax.f32 %v1739_v24, 0.0 }
 0x17d   :  { %v1179_v27 = vpop.f32.mrf.mxu2  ;;  %v1559_v28 = vpop.f32.mrf.mxu3 }
 0x17e   :  { %v1837_v29 = vpack.c.bf16 %v1788_v25, %v1788_v25  ;;  %v1638_v30 = vmax.f32 %v1179_v27, %v1559_v28  ;;  %v372_v31 = vpop.f32.mrf.mxu0  ;;  %v752_v32 = vpop.f32.mrf.mxu1 }
 0x17f   :  { %v830_v51 = vmax.f32 %v372_v31, %v752_v32 }
 0x180   :  { %1887 = vst.msk [vmem:[%s3202_s6 + $0x74] sm:$0xf] %vm1857_vm3, %v1837_v29  ;;  %v1687_v37 = vmax.f32 %v829_v26, %v1638_v30 }
 0x182   :  { %v1740_v41 = vadd.f32 %v2688_v49, %v1687_v37 }
 0x184   :  { %v1789_v43 = vmax.f32 %v1740_v41, 0.0 }
 0x185   :  { %v1181_v44 = vpop.f32.mrf.mxu2  ;;  %v1561_v45 = vpop.f32.mrf.mxu3 }
 0x186   :  { %v1838_v50 = vpack.c.bf16 %v1789_v43, %v1789_v43  ;;  %v1639_v52 = vmax.f32 %v1181_v44, %v1561_v45  ;;  %v375_v53 = vpop.f32.mrf.mxu0  ;;  %v755_v54 = vpop.f32.mrf.mxu1 }
 0x187   :  { %v831_v59 = vmax.f32 %v375_v53, %v755_v54 }
 0x188   :  { %1888 = vst.msk [vmem:[%s3202_s6 + $0x78] sm:$0xf] %vm1857_vm3, %v1838_v50  ;;  %v1688_v56 = vmax.f32 %v830_v51, %v1639_v52 }
 0x189   :  { %2035 = vmatmul.msk.bf16.gmra.mxu0 %vm203_vm2, %v197_v46  ;;  %2156 = vmatmul.msk.bf16.gmra.mxu1 %vm203_vm2, %v590_v47 }
 0x18a   :  { %v1741_v57 = vadd.f32 %v2688_v49, %v1688_v56  ;;  %2277 = vmatmul.msk.bf16.gmra.mxu2 %vm203_vm2, %v1019_v48  ;;  %2398 = vmatmul.msk.bf16.gmra.mxu3 %vm203_vm2, %v1399_v55 }
 0x18c   :  { %v1790_v58 = vmax.f32 %v1741_v57, 0.0 }
 0x18d   :  { %v1184_v60 = vpop.f32.mrf.mxu2  ;;  %v1564_v61 = vpop.f32.mrf.mxu3 }
 0x18e   :  { %v1839_v62 = vpack.c.bf16 %v1790_v58, %v1790_v58  ;;  %v1640_v63 = vmax.f32 %v1184_v60, %v1564_v61  ;;  %v377_v0 = vpop.f32.mrf.mxu0  ;;  %v757_v1 = vpop.f32.mrf.mxu1 }
 0x18f   :  { %v832_v8 = vmax.f32 %v377_v0, %v757_v1 }
 0x190   :  { %1889 = vst.msk [vmem:[%s3202_s6 + $0x7c] sm:$0xf] %vm1857_vm3, %v1839_v62  ;;  %v1689_v2 = vmax.f32 %v831_v59, %v1640_v63 }
 0x192   :  { %v1742_v3 = vadd.f32 %v2688_v49, %v1689_v2 }
 0x194   :  { %v1791_v4 = vmax.f32 %v1742_v3, 0.0 }
 0x195   :  { %v1186_v5 = vpop.f32.mrf.mxu2  ;;  %v1566_v6 = vpop.f32.mrf.mxu3 }
 0x196   :  { %v1840_v7 = vpack.c.bf16 %v1791_v4, %v1791_v4  ;;  %v1641_v9 = vmax.f32 %v1186_v5, %v1566_v6  ;;  %v380_v10 = vpop.f32.mrf.mxu0  ;;  %v760_v11 = vpop.f32.mrf.mxu1 }
 0x197   :  { %v833_v15 = vmax.f32 %v380_v10, %v760_v11 }
 0x198   :  { %1890 = vst.msk [vmem:[%s3202_s6 + $0x80] sm:$0xf] %vm1857_vm3, %v1840_v7  ;;  %v1690_v12 = vmax.f32 %v832_v8, %v1641_v9 }
 0x19a   :  { %v1743_v13 = vadd.f32 %v2688_v49, %v1690_v12 }
 0x19c   :  { %v1792_v14 = vmax.f32 %v1743_v13, 0.0 }
 0x19d   :  { %v1189_v16 = vpop.f32.mrf.mxu2  ;;  %v1569_v17 = vpop.f32.mrf.mxu3 }
 0x19e   :  { %v1841_v18 = vpack.c.bf16 %v1792_v14, %v1792_v14  ;;  %v1642_v19 = vmax.f32 %v1189_v16, %v1569_v17  ;;  %v382_v20 = vpop.f32.mrf.mxu0  ;;  %v762_v21 = vpop.f32.mrf.mxu1 }
 0x19f   :  { %v834_v28 = vmax.f32 %v382_v20, %v762_v21 }
 0x1a0   :  { %1891 = vst.msk [vmem:[%s3202_s6 + $0x84] sm:$0xf] %vm1857_vm3, %v1841_v18  ;;  %v1691_v22 = vmax.f32 %v833_v15, %v1642_v19 }
 0x1a2   :  { %v1744_v49 = vadd.f32 %v3119_v23, %v1691_v22 }
 0x1a4   :  { %v1793_v24 = vmax.f32 %v1744_v49, 0.0 }
 0x1a5   :  { %v1191_v25 = vpop.f32.mrf.mxu2  ;;  %v1571_v26 = vpop.f32.mrf.mxu3 }
 0x1a6   :  { %v1842_v27 = vpack.c.bf16 %v1793_v24, %v1793_v24  ;;  %v1643_v29 = vmax.f32 %v1191_v25, %v1571_v26  ;;  %v385_v30 = vpop.f32.mrf.mxu0  ;;  %v765_v31 = vpop.f32.mrf.mxu1 }
 0x1a7   :  { %v835_v35 = vmax.f32 %v385_v30, %v765_v31 }
 0x1a8   :  { %1892 = vst.msk [vmem:[%s3202_s6 + $0x88] sm:$0xf] %vm1857_vm3, %v1842_v27  ;;  %v1692_v32 = vmax.f32 %v834_v28, %v1643_v29 }
 0x1aa   :  { %v1745_v33 = vadd.f32 %v3119_v23, %v1692_v32 }
 0x1ac   :  { %v1794_v34 = vmax.f32 %v1745_v33, 0.0 }
 0x1ad   :  { %v1194_v36 = vpop.f32.mrf.mxu2  ;;  %v1574_v37 = vpop.f32.mrf.mxu3 }
 0x1ae   :  { %v1843_v38 = vpack.c.bf16 %v1794_v34, %v1794_v34  ;;  %v1644_v39 = vmax.f32 %v1194_v36, %v1574_v37  ;;  %v387_v40 = vpop.f32.mrf.mxu0  ;;  %v767_v41 = vpop.f32.mrf.mxu1 }
 0x1af   :  { %v836_v48 = vmax.f32 %v387_v40, %v767_v41 }
 0x1b0   :  { %1893 = vst.msk [vmem:[%s3202_s6 + $0x8c] sm:$0xf] %vm1857_vm3, %v1843_v38  ;;  %v1693_v42 = vmax.f32 %v835_v35, %v1644_v39 }
 0x1b2   :  { %v1746_v43 = vadd.f32 %v3119_v23, %v1693_v42 }
 0x1b4   :  { %v1795_v44 = vmax.f32 %v1746_v43, 0.0 }
 0x1b5   :  { %v1196_v45 = vpop.f32.mrf.mxu2  ;;  %v1576_v46 = vpop.f32.mrf.mxu3 }
 0x1b6   :  { %v1844_v47 = vpack.c.bf16 %v1795_v44, %v1795_v44  ;;  %v1645_v50 = vmax.f32 %v1196_v45, %v1576_v46  ;;  %v390_v51 = vpop.f32.mrf.mxu0  ;;  %v770_v52 = vpop.f32.mrf.mxu1 }
 0x1b7   :  { %v837_v56 = vmax.f32 %v390_v51, %v770_v52 }
 0x1b8   :  { %1894 = vst.msk [vmem:[%s3202_s6 + $0x90] sm:$0xf] %vm1857_vm3, %v1844_v47  ;;  %v1694_v53 = vmax.f32 %v836_v48, %v1645_v50 }
 0x1ba   :  { %v1747_v54 = vadd.f32 %v3119_v23, %v1694_v53 }
 0x1bc   :  { %v1796_v55 = vmax.f32 %v1747_v54, 0.0 }
 0x1bd   :  { %v1199_v57 = vpop.f32.mrf.mxu2  ;;  %v1579_v58 = vpop.f32.mrf.mxu3 }
 0x1be   :  { %v1845_v59 = vpack.c.bf16 %v1796_v55, %v1796_v55  ;;  %v1646_v60 = vmax.f32 %v1199_v57, %v1579_v58  ;;  %v392_v61 = vpop.f32.mrf.mxu0  ;;  %v772_v62 = vpop.f32.mrf.mxu1 }
 0x1bf   :  { %v838_v5 = vmax.f32 %v392_v61, %v772_v62 }
 0x1c0   :  { %1895 = vst.msk [vmem:[%s3202_s6 + $0x94] sm:$0xf] %vm1857_vm3, %v1845_v59  ;;  %v1695_v63 = vmax.f32 %v837_v56, %v1646_v60 }
 0x1c2   :  { %v1748_v0 = vadd.f32 %v3119_v23, %v1695_v63 }
 0x1c4   :  { %v1797_v1 = vmax.f32 %v1748_v0, 0.0 }
 0x1c5   :  { %v1201_v2 = vpop.f32.mrf.mxu2  ;;  %v1581_v3 = vpop.f32.mrf.mxu3 }
 0x1c6   :  { %v1846_v4 = vpack.c.bf16 %v1797_v1, %v1797_v1  ;;  %v1647_v6 = vmax.f32 %v1201_v2, %v1581_v3  ;;  %v395_v7 = vpop.f32.mrf.mxu0  ;;  %v775_v8 = vpop.f32.mrf.mxu1 }
 0x1c7   :  { %v839_v12 = vmax.f32 %v395_v7, %v775_v8 }
 0x1c8   :  { %1896 = vst.msk [vmem:[%s3202_s6 + $0x98] sm:$0xf] %vm1857_vm3, %v1846_v4  ;;  %v1696_v9 = vmax.f32 %v838_v5, %v1647_v6 }
 0x1ca   :  { %v1749_v10 = vadd.f32 %v3119_v23, %v1696_v9 }
 0x1cc   :  { %v1798_v11 = vmax.f32 %v1749_v10, 0.0 }
 0x1cd   :  { %v1204_v13 = vpop.f32.mrf.mxu2  ;;  %v1584_v14 = vpop.f32.mrf.mxu3 }
 0x1ce   :  { %v1847_v15 = vpack.c.bf16 %v1798_v11, %v1798_v11  ;;  %v1648_v16 = vmax.f32 %v1204_v13, %v1584_v14  ;;  %v397_v17 = vpop.f32.mrf.mxu0  ;;  %v777_v18 = vpop.f32.mrf.mxu1 }
 0x1cf   :  { %v840_v25 = vmax.f32 %v397_v17, %v777_v18 }
 0x1d0   :  { %1897 = vst.msk [vmem:[%s3202_s6 + $0x9c] sm:$0xf] %vm1857_vm3, %v1847_v15  ;;  %v1697_v19 = vmax.f32 %v839_v12, %v1648_v16 }
 0x1d2   :  { %v1750_v20 = vadd.f32 %v3119_v23, %v1697_v19 }
 0x1d4   :  { %v1799_v21 = vmax.f32 %v1750_v20, 0.0 }
 0x1d5   :  { %v1206_v22 = vpop.f32.mrf.mxu2  ;;  %v1586_v49 = vpop.f32.mrf.mxu3 }
 0x1d6   :  { %v1848_v24 = vpack.c.bf16 %v1799_v21, %v1799_v21  ;;  %v1649_v26 = vmax.f32 %v1206_v22, %v1586_v49  ;;  %v400_v27 = vpop.f32.mrf.mxu0  ;;  %v780_v28 = vpop.f32.mrf.mxu1 }
 0x1d7   :  { %v841_v32 = vmax.f32 %v400_v27, %v780_v28 }
 0x1d8   :  { %1898 = vst.msk [vmem:[%s3202_s6 + $0xa0] sm:$0xf] %vm1857_vm3, %v1848_v24  ;;  %v1698_v29 = vmax.f32 %v840_v25, %v1649_v26 }
 0x1da   :  { %v1751_v30 = vadd.f32 %v3119_v23, %v1698_v29 }
 0x1dc   :  { %v1800_v31 = vmax.f32 %v1751_v30, 0.0 }
 0x1dd   :  { %v1209_v33 = vpop.f32.mrf.mxu2  ;;  %v1589_v34 = vpop.f32.mrf.mxu3 }
 0x1de   :  { %v1849_v35 = vpack.c.bf16 %v1800_v31, %v1800_v31  ;;  %v1650_v36 = vmax.f32 %v1209_v33, %v1589_v34  ;;  %v402_v37 = vpop.f32.mrf.mxu0  ;;  %v782_v38 = vpop.f32.mrf.mxu1 }
 0x1df   :  { %v842_v45 = vmax.f32 %v402_v37, %v782_v38 }
 0x1e0   :  { %1899 = vst.msk [vmem:[%s3202_s6 + $0xa4] sm:$0xf] %vm1857_vm3, %v1849_v35  ;;  %v1699_v39 = vmax.f32 %v841_v32, %v1650_v36 }
 0x1e2   :  { %v1752_v40 = vadd.f32 %v3119_v23, %v1699_v39 }
 0x1e4   :  { %v1801_v41 = vmax.f32 %v1752_v40, 0.0 }
 0x1e5   :  { %v1211_v42 = vpop.f32.mrf.mxu2  ;;  %v1591_v43 = vpop.f32.mrf.mxu3 }
 0x1e6   :  { %v1850_v44 = vpack.c.bf16 %v1801_v41, %v1801_v41  ;;  %v1651_v46 = vmax.f32 %v1211_v42, %v1591_v43  ;;  %v405_v47 = vpop.f32.mrf.mxu0  ;;  %v785_v48 = vpop.f32.mrf.mxu1 }
 0x1e7   :  { %v843_v53 = vmax.f32 %v405_v47, %v785_v48 }
 0x1e8   :  { %1900 = vst.msk [vmem:[%s3202_s6 + $0xa8] sm:$0xf] %vm1857_vm3, %v1850_v44  ;;  %v1700_v50 = vmax.f32 %v842_v45, %v1651_v46 }
 0x1ea   :  { %v1753_v51 = vadd.f32 %v3119_v23, %v1700_v50 }
 0x1ec   :  { %v1802_v52 = vmax.f32 %v1753_v51, 0.0 }
 0x1ed   :  { %v1214_v54 = vpop.f32.mrf.mxu2  ;;  %v1594_v55 = vpop.f32.mrf.mxu3 }
 0x1ee   :  { %v1851_v56 = vpack.c.bf16 %v1802_v52, %v1802_v52  ;;  %v1652_v57 = vmax.f32 %v1214_v54, %v1594_v55  ;;  %v407_v58 = vpop.f32.mrf.mxu0  ;;  %v787_v59 = vpop.f32.mrf.mxu1 }
 0x1ef   :  { %v844_v2 = vmax.f32 %v407_v58, %v787_v59 }
 0x1f0   :  { %1901 = vst.msk [vmem:[%s3202_s6 + $0xac] sm:$0xf] %vm1857_vm3, %v1851_v56  ;;  %v1701_v60 = vmax.f32 %v843_v53, %v1652_v57 }
 0x1f2   :  { %v1754_v61 = vadd.f32 %v3119_v23, %v1701_v60 }
 0x1f4   :  { %v1803_v62 = vmax.f32 %v1754_v61, 0.0 }
 0x1f5   :  { %v1216_v63 = vpop.f32.mrf.mxu2  ;;  %v1596_v0 = vpop.f32.mrf.mxu3 }
 0x1f6   :  { %v1852_v1 = vpack.c.bf16 %v1803_v62, %v1803_v62  ;;  %v1653_v3 = vmax.f32 %v1216_v63, %v1596_v0  ;;  %v410_v4 = vpop.f32.mrf.mxu0  ;;  %v790_v5 = vpop.f32.mrf.mxu1 }
 0x1f7   :  { %v845_v9 = vmax.f32 %v410_v4, %v790_v5 }
 0x1f8   :  { %1902 = vst.msk [vmem:[%s3202_s6 + $0xb0] sm:$0xf] %vm1857_vm3, %v1852_v1  ;;  %v1702_v6 = vmax.f32 %v844_v2, %v1653_v3 }
 0x1fa   :  { %v1755_v7 = vadd.f32 %v3119_v23, %v1702_v6 }
 0x1fc   :  { %v1804_v8 = vmax.f32 %v1755_v7, 0.0 }
 0x1fd   :  { %v1219_v10 = vpop.f32.mrf.mxu2  ;;  %v1599_v11 = vpop.f32.mrf.mxu3 }
 0x1fe   :  { %v1853_v12 = vpack.c.bf16 %v1804_v8, %v1804_v8  ;;  %v1654_v13 = vmax.f32 %v1219_v10, %v1599_v11  ;;  %v412_v14 = vpop.f32.mrf.mxu0  ;;  %v792_v15 = vpop.f32.mrf.mxu1 }
 0x1ff   :  { %v846_v22 = vmax.f32 %v412_v14, %v792_v15 }
 0x200   :  { %1903 = vst.msk [vmem:[%s3202_s6 + $0xb4] sm:$0xf] %vm1857_vm3, %v1853_v12  ;;  %v1703_v16 = vmax.f32 %v845_v9, %v1654_v13 }
 0x202   :  { %v1756_v17 = vadd.f32 %v3119_v23, %v1703_v16 }
 0x204   :  { %v1805_v18 = vmax.f32 %v1756_v17, 0.0 }
 0x205   :  { %v1221_v19 = vpop.f32.mrf.mxu2  ;;  %v1601_v20 = vpop.f32.mrf.mxu3 }
 0x206   :  { %v1854_v21 = vpack.c.bf16 %v1805_v18, %v1805_v18  ;;  %v1655_v49 = vmax.f32 %v1221_v19, %v1601_v20  ;;  %v415_v24 = vpop.f32.mrf.mxu0  ;;  %v795_v25 = vpop.f32.mrf.mxu1 }
 0x207   :  { %v847_v29 = vmax.f32 %v415_v24, %v795_v25 }
 0x208   :  { %1904 = vst.msk [vmem:[%s3202_s6 + $0xb8] sm:$0xf] %vm1857_vm3, %v1854_v21  ;;  %v1704_v26 = vmax.f32 %v846_v22, %v1655_v49 }
 0x20a   :  { %v1757_v27 = vadd.f32 %v3119_v23, %v1704_v26 }
 0x20c   :  { %v1806_v28 = vmax.f32 %v1757_v27, 0.0 }
 0x20d   :  { %v1224_v30 = vpop.f32.mrf.mxu2  ;;  %v1604_v31 = vpop.f32.mrf.mxu3 }
 0x20e   :  { %v1855_v32 = vpack.c.bf16 %v1806_v28, %v1806_v28  ;;  %v1656_v33 = vmax.f32 %v1224_v30, %v1604_v31  ;;  %v417_v34 = vpop.f32.mrf.mxu0  ;;  %v797_v35 = vpop.f32.mrf.mxu1 }
 0x210   :  { %1905 = vst.msk [vmem:[%s3202_s6 + $0xbc] sm:$0xf] %vm1857_vm3, %v1855_v32  ;;  %v1705_v36 = vmax.f32 %v847_v29, %v1656_v33 }
 0x212   :  { %v1758_v37 = vadd.f32 %v3119_v23, %v1705_v36 }
 0x214   :  { %v1807_v38 = vmax.f32 %v1758_v37, 0.0 }
 0x215   :  { %v1226_v39 = vpop.f32.mrf.mxu2  ;;  %v1606_v40 = vpop.f32.mrf.mxu3 }
 0x216   :  { %v1856_v41 = vpack.c.bf16 %v1807_v38, %v1807_v38 }
 0x218   :  { %1906 = vst.msk [vmem:[%s3202_s6 + $0xc0] sm:$0xf] %vm1857_vm3, %v1856_v41 }

// kernel: net_forward.5
= control target key start
LH: loop header
LB: loop body
LE: loop exit
PB: predicated region body
PF: predicated region fallthrough
CT: control target
= control target key end

     0   :  { %vm169_vm0 = vcmask 130048   ;;  %vm899_vm1 = vcmask 257024   ;;  %s1814_s4 = inlined_call_operand.vmem [shape: bf16[144,32], index: 4, kind: input, shape index: {}]   ;;  %s1815_s1 = inlined_call_operand.vmem [shape: bf16[104,144], index: 1, kind: input, shape index: {}]   ;;  %s1816_s0 = inlined_call_operand.vmem [shape: bf16[104,144], index: 0, kind: input, shape index: {}]   ;;  %s1817_s2 = inlined_call_operand.vmem [shape: bf16[104,144], index: 2, kind: input, shape index: {}]   ;;  %s1818_s3 = inlined_call_operand.vmem [shape: bf16[104,144], index: 3, kind: input, shape index: {}]   ;;  %s1819_s5 = inlined_call_operand.vmem [shape: f32[1,32], index: 5, kind: input, shape index: {}]   ;;  %s1820_s6 = inlined_call_operand.vmem [shape: bf16[104,32], index: 6, kind: output, shape index: {}]  }
   0x1   :  { %v1180_v0 = vld [vmem:[%s1814_s4 + $0x38] sm:$0xff]  ;;  %v1272_v1 = vld [vmem:[%s1814_s4 + $0x30] sm:$0xff]  ;;  %v1181_v2 = vld [vmem:[%s1814_s4 + $0x40] sm:$0xff] }
   0x2   :  { %191 = vmatpush.bf16.msra.mxu0 %v1180_v0  ;;  %371 = vmatpush.bf16.msra.mxu2 %v1180_v0  ;;  %v1194_v3 = vld [vmem:[%s1815_s1 + $0x4] sm:$0xf]  ;;  %v1012_v4 = vld [vmem:[%s1815_s1 + $0x8] sm:$0xf0]  ;;  %v1176_v11 = vld [vmem:[%s1814_s4 + $0x18] sm:$0xff] }
   0x3   :  { %v1015_v5 = vor.u32 %v1194_v3, %v1012_v4  ;;  %v1182_v6 = vld [vmem:[%s1816_s0 + $0x4] sm:$0xf]  ;;  %421 = vmatpush.bf16.msra.mxu3 %v1181_v2  ;;  %241 = vmatpush.bf16.msra.mxu1 %v1181_v2  ;;  %v921_v7 = vld [vmem:[%s1816_s0 + $0x8] sm:$0xf0]  ;;  %v1196_v12 = vld [vmem:[%s1815_s1 + $0x14] sm:$0xf] }
   0x4   :  { %v924_v8 = vor.u32 %v1182_v6, %v921_v7  ;;  %v1178_v9 = vld [vmem:[%s1814_s4 + $0x28] sm:$0xff]  ;;  %v1177_v10 = vld [vmem:[%s1814_s4 + $0x20] sm:$0xff]  ;;  %v1020_v13 = vld [vmem:[%s1815_s1 + $0x18] sm:$0xf0] }
   0x5   :  { %v1184_v14 = vld [vmem:[%s1816_s0 + $0x14] sm:$0xf]  ;;  %v929_v15 = vld [vmem:[%s1816_s0 + $0x18] sm:$0xf0]  ;;  %v1023_v17 = vor.u32 %v1196_v12, %v1020_v13  ;;  %v1174_v19 = vld [vmem:[%s1814_s4 + $0x8] sm:$0xff] }
   0x6   :  { %192 = vmatpush.bf16.msra.mxu0 %v1272_v1  ;;  %372 = vmatpush.bf16.msra.mxu2 %v1272_v1  ;;  %v1175_v16 = vld [vmem:[%s1814_s4 + $0x10] sm:$0xff]  ;;  %v932_v18 = vor.u32 %v1184_v14, %v929_v15  ;;  %v1173_v20 = vld [vmem:[%s1814_s4] sm:$0xff]  ;;  %v1183_v22 = vld [vmem:[%s1816_s0 + $0x4] sm:$0xf0] }
   0x7   :  { %614 = vmatpush.bf16.msrb.mxu3 %v1181_v2  ;;  %564 = vmatpush.bf16.msrb.mxu1 %v1180_v0  ;;  %v919_v21 = vld [vmem:[%s1816_s0] sm:$0xf]  ;;  %v1195_v24 = vld [vmem:[%s1815_s1 + $0x4] sm:$0xf0]  ;;  %v1198_v27 = vld [vmem:[%s1815_s1 + $0x24] sm:$0xf] }
   0x8   :  { %1056 = vmatmul.msk.bf16.vlgmr.msra.gmra.mxu3 %vm169_vm0, %v1015_v5  ;;  %1001 = vmatmul.msk.bf16.vlgmr.msra.gmra.mxu1 %vm169_vm0, %v924_v8  ;;  %v1010_v23 = vld [vmem:[%s1815_s1] sm:$0xf]  ;;  %v920_v25 = vor.u32 %v1183_v22, %v919_v21  ;;  %v1028_v28 = vld [vmem:[%s1815_s1 + $0x28] sm:$0xf0]  ;;  %v1186_v29 = vld [vmem:[%s1816_s0 + $0x24] sm:$0xf] }
   0x9   :  { %v1011_v26 = vor.u32 %v1195_v24, %v1010_v23  ;;  %v937_v30 = vld [vmem:[%s1816_s0 + $0x28] sm:$0xf0]  ;;  %v1031_v31 = vor.u32 %v1198_v27, %v1028_v28  ;;  %v927_v33 = vld [vmem:[%s1816_s0 + $0x10] sm:$0xf]  ;;  %v1185_v34 = vld [vmem:[%s1816_s0 + $0x14] sm:$0xf0] }
   0xa   :  { %193 = vmatpush.bf16.msra.mxu0 %v1178_v9  ;;  %373 = vmatpush.bf16.msra.mxu2 %v1178_v9  ;;  %v940_v32 = vor.u32 %v1186_v29, %v937_v30  ;;  %v1018_v35 = vld [vmem:[%s1815_s1 + $0x10] sm:$0xf]  ;;  %v1197_v36 = vld [vmem:[%s1815_s1 + $0x14] sm:$0xf0]  ;;  %v928_v37 = vor.u32 %v1185_v34, %v927_v33  ;;  %v1200_v39 = vld [vmem:[%s1815_s1 + $0x34] sm:$0xf] }
   0xb   :  { %565 = vmatpush.bf16.msrb.mxu1 %v1272_v1  ;;  %v1019_v38 = vor.u32 %v1197_v36, %v1018_v35  ;;  %v1036_v40 = vld [vmem:[%s1815_s1 + $0x38] sm:$0xf0]  ;;  %v1188_v41 = vld [vmem:[%s1816_s0 + $0x34] sm:$0xf]  ;;  %v935_v45 = vld [vmem:[%s1816_s0 + $0x20] sm:$0xf] }
   0xc   :  { %v945_v42 = vld [vmem:[%s1816_s0 + $0x38] sm:$0xf0]  ;;  %v1039_v43 = vor.u32 %v1200_v39, %v1036_v40  ;;  %v1187_v46 = vld [vmem:[%s1816_s0 + $0x24] sm:$0xf0]  ;;  %v1026_v47 = vld [vmem:[%s1815_s1 + $0x20] sm:$0xf] }
   0xd   :  { %v948_v44 = vor.u32 %v1188_v41, %v945_v42  ;;  %v1199_v48 = vld [vmem:[%s1815_s1 + $0x24] sm:$0xf0]  ;;  %v936_v49 = vor.u32 %v1187_v46, %v935_v45  ;;  %v1202_v51 = vld [vmem:[%s1815_s1 + $0x44] sm:$0xf]  ;;  %v1044_v52 = vld [vmem:[%s1815_s1 + $0x48] sm:$0xf0] }
   0xe   :  { %194 = vmatpush.bf16.msra.mxu0 %v1177_v10  ;;  %374 = vmatpush.bf16.msra.mxu2 %v1177_v10  ;;  %v1027_v50 = vor.u32 %v1199_v48, %v1026_v47  ;;  %v1190_v53 = vld [vmem:[%s1816_s0 + $0x44] sm:$0xf]  ;;  %v953_v54 = vld [vmem:[%s1816_s0 + $0x48] sm:$0xf0]  ;;  %v1047_v55 = vor.u32 %v1202_v51, %v1044_v52  ;;  %v943_v57 = vld [vmem:[%s1816_s0 + $0x30] sm:$0xf] }
   0xf   :  { %566 = vmatpush.bf16.msrb.mxu1 %v1178_v9  ;;  %v956_v56 = vor.u32 %v1190_v53, %v953_v54  ;;  %v1189_v58 = vld [vmem:[%s1816_s0 + $0x34] sm:$0xf0]  ;;  %v1034_v59 = vld [vmem:[%s1815_s1 + $0x30] sm:$0xf]  ;;  %v1204_v63 = vld [vmem:[%s1815_s1 + $0x54] sm:$0xf] }
  0x10   :  { %v1201_v60 = vld [vmem:[%s1815_s1 + $0x34] sm:$0xf0]  ;;  %v944_v61 = vor.u32 %v1189_v58, %v943_v57  ;;  %v951_v5 = vld [vmem:[%s1816_s0 + $0x40] sm:$0xf]  ;;  %v1191_v6 = vld [vmem:[%s1816_s0 + $0x44] sm:$0xf0] }
  0x11   :  { %v1035_v62 = vor.u32 %v1201_v60, %v1034_v59  ;;  %v1042_v7 = vld [vmem:[%s1815_s1 + $0x40] sm:$0xf]  ;;  %v1203_v8 = vld [vmem:[%s1815_s1 + $0x44] sm:$0xf0]  ;;  %v1206_v23 = vld [vmem:[%s1817_s2 + $0x4] sm:$0xf] }
  0x12   :  { %195 = vmatpush.bf16.msra.mxu0 %v1176_v11  ;;  %375 = vmatpush.bf16.msra.mxu2 %v1176_v11  ;;  %v1043_v12 = vor.u32 %v1203_v8, %v1042_v7  ;;  %v1067_v24 = vld [vmem:[%s1817_s2 + $0x8] sm:$0xf0]  ;;  %v1208_v33 = vld [vmem:[%s1817_s2 + $0x14] sm:$0xf]  ;;  %v1075_v34 = vld [vmem:[%s1817_s2 + $0x18] sm:$0xf0] }
  0x13   :  { %567 = vmatpush.bf16.msrb.mxu1 %v1177_v10  ;;  %v1070_v27 = vor.u32 %v1206_v23, %v1067_v24  ;;  %v1073_v35 = vld [vmem:[%s1817_s2 + $0x10] sm:$0xf]  ;;  %v1209_v36 = vld [vmem:[%s1817_s2 + $0x14] sm:$0xf0]  ;;  %v1120_v40 = vld [vmem:[%s1818_s3] sm:$0xf] }
  0x14   :  { %v1219_v41 = vld [vmem:[%s1818_s3 + $0x4] sm:$0xf0]  ;;  %v1218_v42 = vld [vmem:[%s1818_s3 + $0x4] sm:$0xf]  ;;  %v1221_v57 = vld [vmem:[%s1818_s3 + $0x14] sm:$0xf0] }
  0x15   :  { %v1121_v46 = vor.u32 %v1219_v41, %v1120_v40  ;;  %v1210_v48 = vld [vmem:[%s1817_s2 + $0x24] sm:$0xf]  ;;  %v1211_v51 = vld [vmem:[%s1817_s2 + $0x24] sm:$0xf0]  ;;  %v1220_v58 = vld [vmem:[%s1818_s3 + $0x14] sm:$0xf] }
  0x16   :  { %196 = vmatpush.bf16.msra.mxu0 %v1175_v16  ;;  %376 = vmatpush.bf16.msra.mxu2 %v1175_v16  ;;  %v1130_v59 = vld [vmem:[%s1818_s3 + $0x18] sm:$0xf0]  ;;  %v1144_v41 = vld [vmem:[%s1818_s3 + $0x30] sm:$0xf] }
  0x17   :  { %568 = vmatpush.bf16.msrb.mxu1 %v1176_v11 }
  0x18   :  { %1057 = vmatmul.msk.bf16.gmra.mxu3 %vm169_vm0, %v1023_v17  ;;  %1002 = vmatmul.msk.bf16.gmra.mxu1 %vm169_vm0, %v932_v18  ;;  %v959_v17 = vld [vmem:[%s1816_s0 + $0x50] sm:$0xf]  ;;  %v1193_v18 = vld [vmem:[%s1816_s0 + $0x54] sm:$0xf0] }
  0x19   :  { %v960_v21 = vor.u32 %v1193_v18, %v959_v17  ;;  %v1222_v17 = vld [vmem:[%s1818_s3 + $0x24] sm:$0xf]  ;;  %v1138_v18 = vld [vmem:[%s1818_s3 + $0x28] sm:$0xf0] }
  0x1a   :  { %197 = vmatpush.bf16.msra.mxu0 %v1174_v19  ;;  %377 = vmatpush.bf16.msra.mxu2 %v1174_v19  ;;  %v1141_v24 = vor.u32 %v1222_v17, %v1138_v18 }
  0x1b   :  { %569 = vmatpush.bf16.msrb.mxu1 %v1175_v16 }
  0x1e   :  { %198 = vmatpush.bf16.msra.mxu0 %v1173_v20  ;;  %378 = vmatpush.bf16.msra.mxu2 %v1173_v20 }
  0x1f   :  { %570 = vmatpush.bf16.msrb.mxu1 %v1174_v19 }
  0x21   :  { %199 = vmatmul.bf16.vlgmr.msra.gmra.mxu0 %v920_v25  ;;  %379 = vmatmul.bf16.vlgmr.msra.gmra.mxu2 %v1011_v26  ;;  %v1065_v25 = vld [vmem:[%s1817_s2] sm:$0xf]  ;;  %v1207_v26 = vld [vmem:[%s1817_s2 + $0x4] sm:$0xf0] }
  0x22   :  { %794 = vmatpush.bf16.msrb.mxu2 %v1181_v2  ;;  %744 = vmatpush.bf16.msrb.mxu0 %v1180_v0  ;;  %v1052_v0 = vld [vmem:[%s1815_s1 + $0x58] sm:$0xf0]  ;;  %v1066_v28 = vor.u32 %v1207_v26, %v1065_v25 }
  0x23   :  { %571 = vmatpush.bf16.msrb.mxu1 %v1173_v20  ;;  %v961_v2 = vld [vmem:[%s1816_s0 + $0x58] sm:$0xf0]  ;;  %v1055_v3 = vor.u32 %v1204_v63, %v1052_v0  ;;  %v1133_v63 = vor.u32 %v1220_v58, %v1130_v59 }
  0x26   :  { %745 = vmatpush.bf16.msrb.mxu0 %v1272_v1  ;;  %v1192_v1 = vld [vmem:[%s1816_s0 + $0x54] sm:$0xf] }
  0x27   :  { %v964_v4 = vor.u32 %v1192_v1, %v961_v2  ;;  %v1212_v2 = vld [vmem:[%s1817_s2 + $0x34] sm:$0xf] }
  0x28   :  { %1058 = vmatmul.msk.bf16.gmra.mxu3 %vm169_vm0, %v1031_v31  ;;  %1003 = vmatmul.msk.bf16.gmra.mxu1 %vm169_vm0, %v940_v32 }
  0x2a   :  { %746 = vmatpush.bf16.msrb.mxu0 %v1178_v9  ;;  %v289_v9 = vld [vmem:[%s1815_s1 + $0x60] sm:$0xff] }
  0x2b   :  { %v328_v13 = vunpack.c.h.b16 %v289_v9  ;;  %v327_v30 = vunpack.c.l.b16 %v289_v9 }
  0x2d   :  { %v342_v15 = vpack.c.b16 %v328_v13, %v328_v13  ;;  %v341_v32 = vpack.c.b16 %v327_v30, %v327_v30  ;;  %v1097_v30 = vld [vmem:[%s1817_s2 + $0x40] sm:$0xf] }
  0x2e   :  { %747 = vmatpush.bf16.msrb.mxu0 %v1177_v10  ;;  %v54_v10 = vld [vmem:[%s1816_s0 + $0x60] sm:$0xff] }
  0x2f   :  { %v93_v14 = vunpack.c.h.b16 %v54_v10  ;;  %v92_v29 = vunpack.c.l.b16 %v54_v10 }
  0x31   :  { %204 = vmatmul.bf16.gmra.mxu0 %v928_v37  ;;  %384 = vmatmul.bf16.gmra.mxu2 %v1019_v38  ;;  %v106_v31 = vpack.c.b16 %v92_v29, %v92_v29  ;;  %v1078_v37 = vor.u32 %v1208_v33, %v1075_v34  ;;  %v1074_v38 = vor.u32 %v1209_v36, %v1073_v35  ;;  %v1099_v29 = vld [vmem:[%s1817_s2 + $0x48] sm:$0xf0] }
  0x32   :  { %748 = vmatpush.bf16.msrb.mxu0 %v1176_v11  ;;  %v952_v11 = vor.u32 %v1191_v6, %v951_v5  ;;  %v1213_v5 = vld [vmem:[%s1817_s2 + $0x34] sm:$0xf0] }
  0x36   :  { %749 = vmatpush.bf16.msrb.mxu0 %v1175_v16  ;;  %v107_v16 = vpack.c.b16 %v93_v14, %v93_v14 }
  0x38   :  { %1059 = vmatmul.msk.bf16.gmra.mxu3 %vm169_vm0, %v1039_v43  ;;  %1004 = vmatmul.msk.bf16.gmra.mxu1 %vm169_vm0, %v948_v44  ;;  %v1122_v43 = vld [vmem:[%s1818_s3 + $0x8] sm:$0xf0] }
  0x39   :  { %v1125_v47 = vor.u32 %v1218_v42, %v1122_v43  ;;  %v1225_v42 = vld [vmem:[%s1818_s3 + $0x34] sm:$0xf0]  ;;  %v1224_v43 = vld [vmem:[%s1818_s3 + $0x34] sm:$0xf] }
  0x3a   :  { %750 = vmatpush.bf16.msrb.mxu0 %v1174_v19  ;;  %v1050_v19 = vld [vmem:[%s1815_s1 + $0x50] sm:$0xf] }
  0x3e   :  { %751 = vmatpush.bf16.msrb.mxu0 %v1173_v20  ;;  %v1205_v20 = vld [vmem:[%s1815_s1 + $0x54] sm:$0xf0] }
  0x3f   :  { %v1051_v22 = vor.u32 %v1205_v20, %v1050_v19 }
  0x41   :  { %209 = vmatmul.bf16.gmra.mxu0 %v936_v49  ;;  %389 = vmatmul.bf16.gmra.mxu2 %v1027_v50  ;;  %v1083_v49 = vld [vmem:[%s1817_s2 + $0x28] sm:$0xf0]  ;;  %v1081_v50 = vld [vmem:[%s1817_s2 + $0x20] sm:$0xf] }
  0x42   :  { %v1086_v53 = vor.u32 %v1210_v48, %v1083_v49  ;;  %v1082_v54 = vor.u32 %v1211_v51, %v1081_v50  ;;  %v1145_v49 = vor.u32 %v1225_v42, %v1144_v41  ;;  %v1162_v41 = vld [vmem:[%s1818_s3 + $0x58] sm:$0xf0] }
  0x48   :  { %1060 = vmatmul.msk.bf16.gmra.mxu3 %vm169_vm0, %v1047_v55  ;;  %1005 = vmatmul.msk.bf16.gmra.mxu1 %vm169_vm0, %v956_v56  ;;  %v1128_v56 = vld [vmem:[%s1818_s3 + $0x10] sm:$0xf] }
  0x51   :  { %214 = vmatmul.bf16.gmra.mxu0 %v944_v61  ;;  %394 = vmatmul.bf16.gmra.mxu2 %v1035_v62  ;;  %v1129_v62 = vor.u32 %v1221_v57, %v1128_v56  ;;  %v1105_v56 = vld [vmem:[%s1817_s2 + $0x50] sm:$0xf]  ;;  %v1217_v57 = vld [vmem:[%s1817_s2 + $0x54] sm:$0xf0] }
  0x58   :  { %1061 = vmatmul.msk.bf16.gmra.mxu3 %vm169_vm0, %v1055_v3  ;;  %1006 = vmatmul.msk.bf16.gmra.mxu1 %vm169_vm0, %v964_v4  ;;  %v1091_v3 = vld [vmem:[%s1817_s2 + $0x38] sm:$0xf0]  ;;  %v1089_v4 = vld [vmem:[%s1817_s2 + $0x30] sm:$0xf] }
  0x59   :  { %v1094_v7 = vor.u32 %v1212_v2, %v1091_v3  ;;  %v1090_v8 = vor.u32 %v1213_v5, %v1089_v4  ;;  %v1152_v4 = vld [vmem:[%s1818_s3 + $0x40] sm:$0xf]  ;;  %v1227_v5 = vld [vmem:[%s1818_s3 + $0x44] sm:$0xf0] }
  0x61   :  { %219 = vmatmul.bf16.gmra.mxu0 %v952_v11  ;;  %399 = vmatmul.bf16.gmra.mxu2 %v1043_v12 }
  0x68   :  { %1062 = vmatmul.msk.bf16.gmra.mxu3 %vm169_vm0, %v342_v15  ;;  %1007 = vmatmul.msk.bf16.gmra.mxu1 %vm169_vm0, %v107_v16  ;;  %v1136_v15 = vld [vmem:[%s1818_s3 + $0x20] sm:$0xf]  ;;  %v1223_v16 = vld [vmem:[%s1818_s3 + $0x24] sm:$0xf0] }
  0x69   :  { %v1137_v23 = vor.u32 %v1223_v16, %v1136_v15  ;;  %v1153_v16 = vor.u32 %v1227_v5, %v1152_v4 }
  0x71   :  { %224 = vmatmul.bf16.gmra.mxu0 %v960_v21  ;;  %404 = vmatmul.bf16.gmra.mxu2 %v1051_v22 }
  0x78   :  { %1111 = vmatmul.msk.bf16.vlgmr.msrb.gmra.mxu3 %vm169_vm0, %v1070_v27  ;;  %572 = vmatmul.bf16.vlgmr.msrb.gmra.mxu1 %v1066_v28  ;;  %v1214_v28 = vld [vmem:[%s1817_s2 + $0x44] sm:$0xf] }
  0x79   :  { %v1102_v33 = vor.u32 %v1214_v28, %v1099_v29 }
  0x81   :  { %229 = vmatmul.bf16.gmra.mxu0 %v106_v31  ;;  %409 = vmatmul.bf16.gmra.mxu2 %v341_v32  ;;  %v1215_v31 = vld [vmem:[%s1817_s2 + $0x44] sm:$0xf0] }
  0x82   :  { %v1098_v34 = vor.u32 %v1215_v31, %v1097_v30 }
  0x85   :  { %v243_v39 = vpop.f32.mrf.mxu1 }
  0x88   :  { %1112 = vmatmul.msk.bf16.gmra.mxu3 %vm169_vm0, %v1078_v37  ;;  %577 = vmatmul.bf16.gmra.mxu1 %v1074_v38 }
  0x8b   :  { %v423_v44 = vpop.f32.mrf.mxu3 }
  0x8d   :  { %v245_v45 = vpop.f32.mrf.mxu1 }
  0x91   :  { %752 = vmatmul.bf16.vlgmr.msrb.gmra.mxu0 %v1121_v46  ;;  %1166 = vmatmul.msk.bf16.vlgmr.msrb.gmra.mxu2 %vm169_vm0, %v1125_v47 }
  0x93   :  { %v425_v52 = vpop.f32.mrf.mxu3 }
  0x95   :  { %v248_v55 = vpop.f32.mrf.mxu1 }
  0x98   :  { %1113 = vmatmul.msk.bf16.gmra.mxu3 %vm169_vm0, %v1086_v53  ;;  %582 = vmatmul.bf16.gmra.mxu1 %v1082_v54  ;;  %v1216_v54 = vld [vmem:[%s1817_s2 + $0x54] sm:$0xf] }
  0x9b   :  { %v428_v60 = vpop.f32.mrf.mxu3 }
  0x9d   :  { %v250_v61 = vpop.f32.mrf.mxu1 }
  0x9e   :  { %v200_v0 = vpop.f32.mrf.mxu0 }
  0x9f   :  { %v1527_v1 = vadd.f32 %v243_v39, %v200_v0 }
  0xa1   :  { %757 = vmatmul.bf16.gmra.mxu0 %v1129_v62  ;;  %1167 = vmatmul.msk.bf16.gmra.mxu2 %vm169_vm0, %v1133_v63 }
  0xa3   :  { %v430_v6 = vpop.f32.mrf.mxu3 }
  0xa4   :  { %v380_v9 = vpop.f32.mrf.mxu2 }
  0xa5   :  { %v253_v10 = vpop.f32.mrf.mxu1  ;;  %v1542_v11 = vadd.f32 %v423_v44, %v380_v9  ;;  %v1146_v44 = vld [vmem:[%s1818_s3 + $0x38] sm:$0xf0] }
  0xa6   :  { %v202_v12 = vpop.f32.mrf.mxu0  ;;  %v1149_v50 = vor.u32 %v1224_v43, %v1146_v44 }
  0xa7   :  { %v457_v13 = vmax.f32 %v1527_v1, %v1542_v11  ;;  %v1546_v14 = vadd.f32 %v245_v45, %v202_v12  ;;  %v482_v12 = vld [vmem:[%s1817_s2 + $0x60] sm:$0xff] }
  0xa8   :  { %1114 = vmatmul.msk.bf16.gmra.mxu3 %vm169_vm0, %v1094_v7  ;;  %587 = vmatmul.bf16.gmra.mxu1 %v1090_v8  ;;  %v1154_v7 = vld [vmem:[%s1818_s3 + $0x48] sm:$0xf0] }
  0xab   :  { %v433_v19 = vpop.f32.mrf.mxu3 }
  0xac   :  { %v382_v20 = vpop.f32.mrf.mxu2 }
  0xad   :  { %v255_v21 = vpop.f32.mrf.mxu1  ;;  %v1561_v22 = vadd.f32 %v425_v52, %v382_v20 }
  0xae   :  { %v205_v25 = vpop.f32.mrf.mxu0 }
  0xaf   :  { %v458_v26 = vmax.f32 %v1546_v14, %v1561_v22  ;;  %v1565_v27 = vadd.f32 %v248_v55, %v205_v25  ;;  %v1107_v55 = vld [vmem:[%s1817_s2 + $0x58] sm:$0xf0] }
  0xb0   :  { %v1110_v59 = vor.u32 %v1216_v54, %v1107_v55 }
  0xb1   :  { %762 = vmatmul.bf16.gmra.mxu0 %v1137_v23  ;;  %1168 = vmatmul.msk.bf16.gmra.mxu2 %vm169_vm0, %v1141_v24  ;;  %v520_v23 = vunpack.c.l.b16 %v482_v12 }
  0xb3   :  { %v435_v32 = vpop.f32.mrf.mxu3  ;;  %v534_v28 = vpack.c.b16 %v520_v23, %v520_v23 }
  0xb4   :  { %v385_v35 = vpop.f32.mrf.mxu2 }
  0xb5   :  { %v258_v36 = vpop.f32.mrf.mxu1  ;;  %v1580_v37 = vadd.f32 %v428_v60, %v385_v35  ;;  %v1106_v60 = vor.u32 %v1217_v57, %v1105_v56  ;;  %v1160_v35 = vld [vmem:[%s1818_s3 + $0x50] sm:$0xf] }
  0xb6   :  { %v207_v38 = vpop.f32.mrf.mxu0 }
  0xb7   :  { %v459_v39 = vmax.f32 %v1565_v27, %v1580_v37  ;;  %v1584_v40 = vadd.f32 %v250_v61, %v207_v38  ;;  %v1228_v38 = vld [vmem:[%s1818_s3 + $0x54] sm:$0xf] }
  0xb8   :  { %1115 = vmatmul.msk.bf16.gmra.mxu3 %vm169_vm0, %v1102_v33  ;;  %592 = vmatmul.bf16.gmra.mxu1 %v1098_v34 }
  0xbb   :  { %v438_v45 = vpop.f32.mrf.mxu3 }
  0xbc   :  { %v387_v46 = vpop.f32.mrf.mxu2 }
  0xbd   :  { %v260_v47 = vpop.f32.mrf.mxu1  ;;  %v1599_v48 = vadd.f32 %v430_v6, %v387_v46  ;;  %v1226_v6 = vld [vmem:[%s1818_s3 + $0x44] sm:$0xf] }
  0xbe   :  { %v210_v51 = vpop.f32.mrf.mxu0  ;;  %v1157_v17 = vor.u32 %v1226_v6, %v1154_v7 }
  0xbf   :  { %v460_v52 = vmax.f32 %v1584_v40, %v1599_v48  ;;  %v1603_v53 = vadd.f32 %v253_v10, %v210_v51 }
  0xc1   :  { %767 = vmatmul.bf16.gmra.mxu0 %v1145_v49  ;;  %1169 = vmatmul.msk.bf16.gmra.mxu2 %vm169_vm0, %v1149_v50 }
  0xc3   :  { %v440_v58 = vpop.f32.mrf.mxu3 }
  0xc4   :  { %v390_v61 = vpop.f32.mrf.mxu2 }
  0xc5   :  { %v263_v62 = vpop.f32.mrf.mxu1  ;;  %v1618_v63 = vadd.f32 %v433_v19, %v390_v61 }
  0xc6   :  { %v212_v0 = vpop.f32.mrf.mxu0 }
  0xc7   :  { %v461_v2 = vmax.f32 %v1603_v53, %v1618_v63  ;;  %v1622_v3 = vadd.f32 %v255_v21, %v212_v0  ;;  %v521_v21 = vunpack.c.h.b16 %v482_v12 }
  0xc8   :  { %1116 = vmatmul.msk.bf16.gmra.mxu3 %vm169_vm0, %v1110_v59  ;;  %597 = vmatmul.bf16.gmra.mxu1 %v1106_v60 }
  0xc9   :  { %v535_v25 = vpack.c.b16 %v521_v21, %v521_v21 }
  0xcb   :  { %v443_v8 = vpop.f32.mrf.mxu3 }
  0xcc   :  { %v392_v9 = vpop.f32.mrf.mxu2 }
  0xcd   :  { %v265_v10 = vpop.f32.mrf.mxu1  ;;  %v1640_v15 = vadd.f32 %v435_v32, %v392_v9 }
  0xce   :  { %v215_v18 = vpop.f32.mrf.mxu0 }
  0xcf   :  { %v462_v19 = vmax.f32 %v1622_v3, %v1640_v15  ;;  %v1644_v20 = vadd.f32 %v258_v36, %v215_v18  ;;  %v1229_v36 = vld [vmem:[%s1818_s3 + $0x54] sm:$0xf0] }
  0xd0   :  { %v1161_v46 = vor.u32 %v1229_v36, %v1160_v35 }
  0xd1   :  { %772 = vmatmul.bf16.gmra.mxu0 %v1153_v16  ;;  %1170 = vmatmul.msk.bf16.gmra.mxu2 %vm169_vm0, %v1157_v17 }
  0xd3   :  { %v445_v24 = vpop.f32.mrf.mxu3 }
  0xd4   :  { %v395_v29 = vpop.f32.mrf.mxu2 }
  0xd5   :  { %v268_v30 = vpop.f32.mrf.mxu1  ;;  %v1647_v31 = vadd.f32 %v438_v45, %v395_v29 }
  0xd6   :  { %v217_v32 = vpop.f32.mrf.mxu0 }
  0xd7   :  { %v463_v33 = vmax.f32 %v1644_v20, %v1647_v31  ;;  %v1651_v34 = vadd.f32 %v260_v47, %v217_v32  ;;  %v1165_v47 = vor.u32 %v1228_v38, %v1162_v41 }
  0xd8   :  { %1117 = vmatmul.msk.bf16.gmra.mxu3 %vm169_vm0, %v535_v25  ;;  %602 = vmatmul.bf16.gmra.mxu1 %v534_v28 }
  0xdb   :  { %v448_v42 = vpop.f32.mrf.mxu3 }
  0xdc   :  { %v397_v43 = vpop.f32.mrf.mxu2 }
  0xdd   :  { %v270_v44 = vpop.f32.mrf.mxu1  ;;  %v1666_v45 = vadd.f32 %v440_v58, %v397_v43  ;;  %v662_v58 = vld [vmem:[%s1818_s3 + $0x60] sm:$0xff] }
  0xde   :  { %v220_v49 = vpop.f32.mrf.mxu0  ;;  %v701_v0 = vunpack.c.h.b16 %v662_v58 }
  0xdf   :  { %v464_v50 = vmax.f32 %v1651_v34, %v1666_v45  ;;  %v1670_v51 = vadd.f32 %v263_v62, %v220_v49  ;;  %v700_v62 = vunpack.c.l.b16 %v662_v58 }
  0xe1   :  { %777 = vmatmul.bf16.gmra.mxu0 %v1161_v46  ;;  %1171 = vmatmul.msk.bf16.gmra.mxu2 %vm169_vm0, %v1165_v47  ;;  %v714_v9 = vpack.c.b16 %v700_v62, %v700_v62 }
  0xe3   :  { %v450_v54 = vpop.f32.mrf.mxu3 }
  0xe4   :  { %v400_v55 = vpop.f32.mrf.mxu2 }
  0xe5   :  { %v273_v56 = vpop.f32.mrf.mxu1  ;;  %v1673_v57 = vadd.f32 %v443_v8, %v400_v55  ;;  %v715_v8 = vpack.c.b16 %v701_v0, %v701_v0 }
  0xe6   :  { %v222_v59 = vpop.f32.mrf.mxu0 }
  0xe7   :  { %v465_v60 = vmax.f32 %v1670_v51, %v1673_v57  ;;  %v1680_v61 = vadd.f32 %v265_v10, %v222_v59 }
  0xeb   :  { %v453_v4 = vpop.f32.mrf.mxu3 }
  0xec   :  { %v402_v5 = vpop.f32.mrf.mxu2 }
  0xed   :  { %v275_v6 = vpop.f32.mrf.mxu1  ;;  %v1682_v7 = vadd.f32 %v445_v24, %v402_v5 }
  0xee   :  { %v225_v12 = vpop.f32.mrf.mxu0 }
  0xef   :  { %v466_v16 = vmax.f32 %v1680_v61, %v1682_v7  ;;  %v1686_v17 = vadd.f32 %v268_v30, %v225_v12 }
  0xf1   :  { %782 = vmatmul.bf16.gmra.mxu0 %v714_v9  ;;  %1172 = vmatmul.msk.bf16.gmra.mxu2 %vm169_vm0, %v715_v8 }
  0xf3   :  { %v455_v10 = vpop.f32.mrf.mxu3 }
  0xf4   :  { %v405_v18 = vpop.f32.mrf.mxu2 }
  0xf5   :  { %v573_v21 = vpop.f32.mrf.mxu1  ;;  %v1689_v23 = vadd.f32 %v448_v42, %v405_v18 }
  0xf6   :  { %v227_v25 = vpop.f32.mrf.mxu0 }
  0xf7   :  { %v467_v24 = vmax.f32 %v1686_v17, %v1689_v23  ;;  %v1693_v28 = vadd.f32 %v270_v44, %v227_v25 }
  0xfb   :  { %v616_v29 = vpop.f32.mrf.mxu3 }
  0xfc   :  { %v407_v32 = vpop.f32.mrf.mxu2  ;;  %v617_v0 = vadd.f32 %v616_v29, %v573_v21 }
  0xfd   :  { %v575_v35 = vpop.f32.mrf.mxu1  ;;  %v1695_v36 = vadd.f32 %v450_v54, %v407_v32 }
  0xfe   :  { %v230_v30 = vpop.f32.mrf.mxu0 }
  0xff   :  { %v468_v38 = vmax.f32 %v1693_v28, %v1695_v36  ;;  %v1699_v41 = vadd.f32 %v273_v56, %v230_v30 }
 0x103   :  { %v618_v43 = vpop.f32.mrf.mxu3 }
 0x104   :  { %v410_v42 = vpop.f32.mrf.mxu2  ;;  %v619_v21 = vadd.f32 %v618_v43, %v575_v35 }
 0x105   :  { %v578_v46 = vpop.f32.mrf.mxu1  ;;  %v1701_v47 = vadd.f32 %v453_v4, %v410_v42  ;;  %v1708_v4 = vld [vmem:[%s1819_s5] ss:$0 sm:$0xff] }
 0x106   :  { %v232_v49 = vpop.f32.mrf.mxu0 }
 0x107   :  { %v469_v44 = vmax.f32 %v1699_v41, %v1701_v47 }
 0x10b   :  { %v621_v55 = vpop.f32.mrf.mxu3 }
 0x10c   :  { %v412_v59 = vpop.f32.mrf.mxu2 }
 0x10d   :  { %v580_v58 = vpop.f32.mrf.mxu1 }
 0x10e   :  { %v753_v54 = vpop.f32.mrf.mxu0 }
 0x113   :  { %v623_v62 = vpop.f32.mrf.mxu3 }
 0x114   :  { %v796_v5 = vpop.f32.mrf.mxu2 }
 0x115   :  { %v583_v6 = vpop.f32.mrf.mxu1  ;;  %v797_v9 = vadd.f32 %v796_v5, %v753_v54 }
 0x116   :  { %v755_v56 = vpop.f32.mrf.mxu0 }
 0x117   :  { %v830_v8 = vmax.f32 %v617_v0, %v797_v9 }
 0x119   :  { %v843_v12 = vmax.f32 %v457_v13, %v830_v8  ;;  %v622_v13 = vadd.f32 %v621_v55, %v578_v46 }
 0x11b   :  { %v626_v10 = vpop.f32.mrf.mxu3  ;;  %v860_v18 = vadd.f32 %v1708_v4, %v843_v12  ;;  %v624_v12 = vadd.f32 %v623_v62, %v580_v58 }
 0x11c   :  { %v798_v25 = vpop.f32.mrf.mxu2 }
 0x11d   :  { %v585_v32 = vpop.f32.mrf.mxu1  ;;  %v873_v29 = vmax.f32 %v860_v18, 0.0  ;;  %v799_v30 = vadd.f32 %v798_v25, %v755_v56 }
 0x11e   :  { %v758_v42 = vpop.f32.mrf.mxu0 }
 0x11f   :  { %v886_v49 = vpack.c.bf16 %v873_v29, %v873_v29  ;;  %v831_v59 = vmax.f32 %v619_v21, %v799_v30 }
 0x121   :  { %900 = vst.msk [vmem:[%s1820_s6] sm:$0xf] %vm899_vm1, %v886_v49  ;;  %v844_v1 = vmax.f32 %v458_v26, %v831_v59 }
 0x123   :  { %v628_v11 = vpop.f32.mrf.mxu3  ;;  %v861_v54 = vadd.f32 %v1708_v4, %v844_v1 }
 0x124   :  { %v801_v35 = vpop.f32.mrf.mxu2 }
 0x125   :  { %v588_v43 = vpop.f32.mrf.mxu1  ;;  %v874_v0 = vmax.f32 %v861_v54, 0.0  ;;  %v802_v5 = vadd.f32 %v801_v35, %v758_v42  ;;  %v629_v35 = vadd.f32 %v628_v11, %v585_v32 }
 0x126   :  { %v760_v9 = vpop.f32.mrf.mxu0 }
 0x127   :  { %v887_v56 = vpack.c.bf16 %v874_v0, %v874_v0  ;;  %v832_v8 = vmax.f32 %v622_v13, %v802_v5 }
 0x129   :  { %901 = vst.msk [vmem:[%s1820_s6 + $0x4] sm:$0xf] %vm899_vm1, %v887_v56  ;;  %v845_v14 = vmax.f32 %v459_v39, %v832_v8  ;;  %v627_v39 = vadd.f32 %v626_v10, %v583_v6 }
 0x12b   :  { %v631_v22 = vpop.f32.mrf.mxu3  ;;  %v862_v26 = vadd.f32 %v1708_v4, %v845_v14 }
 0x12c   :  { %v803_v46 = vpop.f32.mrf.mxu2 }
 0x12d   :  { %v590_v55 = vpop.f32.mrf.mxu1  ;;  %v875_v18 = vmax.f32 %v862_v26, 0.0  ;;  %v804_v25 = vadd.f32 %v803_v46, %v760_v9 }
 0x12e   :  { %v763_v21 = vpop.f32.mrf.mxu0 }
 0x12f   :  { %v888_v29 = vpack.c.bf16 %v875_v18, %v875_v18  ;;  %v833_v30 = vmax.f32 %v624_v12, %v804_v25 }
 0x131   :  { %902 = vst.msk [vmem:[%s1820_s6 + $0x8] sm:$0xf] %vm899_vm1, %v888_v29  ;;  %v846_v27 = vmax.f32 %v460_v52, %v833_v30 }
 0x133   :  { %v633_v37 = vpop.f32.mrf.mxu3  ;;  %v863_v42 = vadd.f32 %v1708_v4, %v846_v27 }
 0x134   :  { %v806_v49 = vpop.f32.mrf.mxu2 }
 0x135   :  { %v593_v58 = vpop.f32.mrf.mxu1  ;;  %v876_v62 = vmax.f32 %v863_v42, 0.0  ;;  %v807_v59 = vadd.f32 %v806_v49, %v763_v21  ;;  %v634_v21 = vadd.f32 %v633_v37, %v590_v55 }
 0x136   :  { %v765_v1 = vpop.f32.mrf.mxu0 }
 0x137   :  { %v889_v13 = vpack.c.bf16 %v876_v62, %v876_v62  ;;  %v834_v54 = vmax.f32 %v627_v39, %v807_v59 }
 0x139   :  { %903 = vst.msk [vmem:[%s1820_s6 + $0xc] sm:$0xf] %vm899_vm1, %v889_v13  ;;  %v847_v40 = vmax.f32 %v461_v2, %v834_v54  ;;  %v632_v2 = vadd.f32 %v631_v22, %v588_v43 }
 0x13b   :  { %v636_v48 = vpop.f32.mrf.mxu3  ;;  %v864_v52 = vadd.f32 %v1708_v4, %v847_v40 }
 0x13c   :  { %v808_v6 = vpop.f32.mrf.mxu2 }
 0x13d   :  { %v595_v10 = vpop.f32.mrf.mxu1  ;;  %v877_v0 = vmax.f32 %v864_v52, 0.0  ;;  %v809_v5 = vadd.f32 %v808_v6, %v765_v1 }
 0x13e   :  { %v768_v9 = vpop.f32.mrf.mxu0 }
 0x13f   :  { %v890_v56 = vpack.c.bf16 %v877_v0, %v877_v0  ;;  %v835_v8 = vmax.f32 %v629_v35, %v809_v5 }
 0x141   :  { %904 = vst.msk [vmem:[%s1820_s6 + $0x10] sm:$0xf] %vm899_vm1, %v890_v56  ;;  %v848_v53 = vmax.f32 %v462_v19, %v835_v8 }
 0x143   :  { %v638_v63 = vpop.f32.mrf.mxu3  ;;  %v865_v14 = vadd.f32 %v1708_v4, %v848_v53 }
 0x144   :  { %v811_v26 = vpop.f32.mrf.mxu2 }
 0x145   :  { %v598_v32 = vpop.f32.mrf.mxu1  ;;  %v878_v11 = vmax.f32 %v865_v14, 0.0  ;;  %v812_v46 = vadd.f32 %v811_v26, %v768_v9 }
 0x146   :  { %v770_v12 = vpop.f32.mrf.mxu0 }
 0x147   :  { %v891_v18 = vpack.c.bf16 %v878_v11, %v878_v11  ;;  %v836_v25 = vmax.f32 %v632_v2, %v812_v46 }
 0x149   :  { %905 = vst.msk [vmem:[%s1820_s6 + $0x14] sm:$0xf] %vm899_vm1, %v891_v18  ;;  %v849_v3 = vmax.f32 %v463_v33, %v836_v25  ;;  %v637_v33 = vadd.f32 %v636_v48, %v593_v58  ;;  %v639_v48 = vadd.f32 %v638_v63, %v595_v10 }
 0x14b   :  { %v641_v15 = vpop.f32.mrf.mxu3  ;;  %v866_v19 = vadd.f32 %v1708_v4, %v849_v3 }
 0x14c   :  { %v813_v43 = vpop.f32.mrf.mxu2 }
 0x14d   :  { %v600_v22 = vpop.f32.mrf.mxu1  ;;  %v879_v29 = vmax.f32 %v866_v19, 0.0  ;;  %v814_v30 = vadd.f32 %v813_v43, %v770_v12 }
 0x14e   :  { %v773_v27 = vpop.f32.mrf.mxu0 }
 0x14f   :  { %v892_v39 = vpack.c.bf16 %v879_v29, %v879_v29  ;;  %v837_v42 = vmax.f32 %v634_v21, %v814_v30 }
 0x151   :  { %906 = vst.msk [vmem:[%s1820_s6 + $0x18] sm:$0xf] %vm899_vm1, %v892_v39  ;;  %v850_v20 = vmax.f32 %v464_v50, %v837_v42 }
 0x153   :  { %v643_v31 = vpop.f32.mrf.mxu3  ;;  %v867_v49 = vadd.f32 %v1708_v4, %v850_v20 }
 0x154   :  { %v816_v62 = vpop.f32.mrf.mxu2  ;;  %v644_v14 = vadd.f32 %v643_v31, %v600_v22 }
 0x155   :  { %v603_v55 = vpop.f32.mrf.mxu1  ;;  %v880_v37 = vmax.f32 %v867_v49, 0.0  ;;  %v817_v59 = vadd.f32 %v816_v62, %v773_v27 }
 0x156   :  { %v775_v1 = vpop.f32.mrf.mxu0 }
 0x157   :  { %v893_v13 = vpack.c.bf16 %v880_v37, %v880_v37  ;;  %v838_v54 = vmax.f32 %v637_v33, %v817_v59 }
 0x159   :  { %907 = vst.msk [vmem:[%s1820_s6 + $0x1c] sm:$0xf] %vm899_vm1, %v893_v13  ;;  %v851_v34 = vmax.f32 %v465_v60, %v838_v54  ;;  %v642_v60 = vadd.f32 %v641_v15, %v598_v32 }
 0x15b   :  { %v646_v45 = vpop.f32.mrf.mxu3  ;;  %v868_v50 = vadd.f32 %v1708_v4, %v851_v34 }
 0x15c   :  { %v818_v58 = vpop.f32.mrf.mxu2  ;;  %v647_v17 = vadd.f32 %v646_v45, %v603_v55 }
 0x15d   :  { %v605_v40 = vpop.f32.mrf.mxu1  ;;  %v881_v52 = vmax.f32 %v868_v50, 0.0  ;;  %v819_v6 = vadd.f32 %v818_v58, %v775_v1 }
 0x15e   :  { %v778_v35 = vpop.f32.mrf.mxu0 }
 0x15f   :  { %v894_v0 = vpack.c.bf16 %v881_v52, %v881_v52  ;;  %v839_v5 = vmax.f32 %v639_v48, %v819_v6 }
 0x161   :  { %908 = vst.msk [vmem:[%s1820_s6 + $0x20] sm:$0xf] %vm899_vm1, %v894_v0  ;;  %v852_v51 = vmax.f32 %v466_v16, %v839_v5 }
 0x163   :  { %v648_v57 = vpop.f32.mrf.mxu3  ;;  %v869_v9 = vadd.f32 %v1708_v4, %v852_v51 }
 0x164   :  { %v821_v56 = vpop.f32.mrf.mxu2 }
 0x165   :  { %v882_v10 = vmax.f32 %v869_v9, 0.0  ;;  %v822_v8 = vadd.f32 %v821_v56, %v778_v35 }
 0x166   :  { %v780_v53 = vpop.f32.mrf.mxu0 }
 0x167   :  { %v895_v63 = vpack.c.bf16 %v882_v10, %v882_v10  ;;  %v840_v2 = vmax.f32 %v642_v60, %v822_v8 }
 0x169   :  { %909 = vst.msk [vmem:[%s1820_s6 + $0x24] sm:$0xf] %vm899_vm1, %v895_v63  ;;  %v853_v61 = vmax.f32 %v467_v24, %v840_v2 }
 0x16b   :  { %v870_v7 = vadd.f32 %v1708_v4, %v853_v61 }
 0x16c   :  { %v823_v16 = vpop.f32.mrf.mxu2 }
 0x16d   :  { %v883_v26 = vmax.f32 %v870_v7, 0.0  ;;  %v824_v32 = vadd.f32 %v823_v16, %v780_v53 }
 0x16e   :  { %v783_v11 = vpop.f32.mrf.mxu0 }
 0x16f   :  { %v896_v46 = vpack.c.bf16 %v883_v26, %v883_v26  ;;  %v841_v12 = vmax.f32 %v644_v14, %v824_v32 }
 0x171   :  { %910 = vst.msk [vmem:[%s1820_s6 + $0x28] sm:$0xf] %vm899_vm1, %v896_v46  ;;  %v854_v18 = vmax.f32 %v468_v38, %v841_v12 }
 0x173   :  { %v871_v23 = vadd.f32 %v1708_v4, %v854_v18 }
 0x174   :  { %v826_v24 = vpop.f32.mrf.mxu2 }
 0x175   :  { %v884_v25 = vmax.f32 %v871_v23, 0.0  ;;  %v827_v3 = vadd.f32 %v826_v24, %v783_v11 }
 0x176   :  { %v785_v15 = vpop.f32.mrf.mxu0 }
 0x177   :  { %v897_v19 = vpack.c.bf16 %v884_v25, %v884_v25  ;;  %v842_v43 = vmax.f32 %v647_v17, %v827_v3 }
 0x179   :  { %911 = vst.msk [vmem:[%s1820_s6 + $0x2c] sm:$0xf] %vm899_vm1, %v897_v19  ;;  %v855_v22 = vmax.f32 %v469_v44, %v842_v43 }
 0x17b   :  { %v872_v28 = vadd.f32 %v1708_v4, %v855_v22 }
 0x17c   :  { %v828_v36 = vpop.f32.mrf.mxu2 }
 0x17d   :  { %v885_v38 = vmax.f32 %v872_v28, 0.0 }
 0x17f   :  { %v898_v21 = vpack.c.bf16 %v885_v38, %v885_v38 }
 0x181   :  { %912 = vst.msk [vmem:[%s1820_s6 + $0x30] sm:$0xf] %vm899_vm1, %v898_v21 }

// kernel: net_forward.6
= control target key start
LH: loop header
LB: loop body
LE: loop exit
PB: predicated region body
PF: predicated region fallthrough
CT: control target
= control target key end

     0   :  { %vm289_vm0 = vcmask 261120   ;;  %vm466_vm1 = vcmask 519168   ;;  %s962_s1 = inlined_call_operand.vmem [shape: bf16[288,64], index: 1, kind: input, shape index: {}]   ;;  %s963_s0 = inlined_call_operand.vmem [shape: bf16[104,288], index: 0, kind: input, shape index: {}]   ;;  %s964_s2 = inlined_call_operand.vmem [shape: f32[1,64], index: 2, kind: input, shape index: {}]   ;;  %s965_s3 = inlined_call_operand.vmem [shape: bf16[104,64], index: 3, kind: output, shape index: {}]  }
   0x1   :  { %v660_v0 = vld [vmem:[%s962_s1 + $0x38] sm:$0xff]  ;;  %v670_v2 = vld [vmem:[%s962_s1 + $0x88] sm:$0xff]  ;;  %v659_v3 = vld [vmem:[%s962_s1 + $0x30] sm:$0xff] }
   0x2   :  { %v668_v1 = vld [vmem:[%s962_s1 + $0x78] sm:$0xff]  ;;  %311 = vmatpush.bf16.msra.mxu0 %v660_v0  ;;  %671 = vmatpush.bf16.msra.mxu3 %v660_v0  ;;  %v667_v4 = vld [vmem:[%s962_s1 + $0x70] sm:$0xff]  ;;  %v669_v5 = vld [vmem:[%s962_s1 + $0x80] sm:$0xff] }
   0x3   :  { %354 = vmatpush.bf16.msra.mxu1 %v668_v1  ;;  %403 = vmatpush.bf16.msra.mxu2 %v670_v2  ;;  %v494_v6 = vld [vmem:[%s963_s0 + $0x8] sm:$0xf]  ;;  %v637_v7 = vld [vmem:[%s963_s0 + $0x10] sm:$0xf0]  ;;  %v657_v11 = vld [vmem:[%s962_s1 + $0x20] sm:$0xff] }
   0x4   :  { %v495_v8 = vor.u32 %v637_v7, %v494_v6  ;;  %v658_v9 = vld [vmem:[%s962_s1 + $0x28] sm:$0xff]  ;;  %v665_v12 = vld [vmem:[%s962_s1 + $0x60] sm:$0xff]  ;;  %v656_v13 = vld [vmem:[%s962_s1 + $0x18] sm:$0xff] }
   0x5   :  { %v666_v10 = vld [vmem:[%s962_s1 + $0x68] sm:$0xff]  ;;  %v664_v14 = vld [vmem:[%s962_s1 + $0x58] sm:$0xff]  ;;  %v655_v15 = vld [vmem:[%s962_s1 + $0x10] sm:$0xff] }
   0x6   :  { %312 = vmatpush.bf16.msra.mxu0 %v659_v3  ;;  %672 = vmatpush.bf16.msra.mxu3 %v659_v3  ;;  %v663_v16 = vld [vmem:[%s962_s1 + $0x50] sm:$0xff]  ;;  %v506_v17 = vld [vmem:[%s963_s0 + $0x20] sm:$0xf]  ;;  %v640_v18 = vld [vmem:[%s963_s0 + $0x28] sm:$0xf0] }
   0x7   :  { %355 = vmatpush.bf16.msra.mxu1 %v667_v4  ;;  %404 = vmatpush.bf16.msra.mxu2 %v669_v5  ;;  %v507_v19 = vor.u32 %v640_v18, %v506_v17  ;;  %v654_v20 = vld [vmem:[%s962_s1 + $0x8] sm:$0xff]  ;;  %v653_v22 = vld [vmem:[%s962_s1] sm:$0xff]  ;;  %v546_v26 = vld [vmem:[%s963_s0 + $0x78] sm:$0xf] }
   0x8   :  { %v662_v21 = vld [vmem:[%s962_s1 + $0x48] sm:$0xff]  ;;  %v661_v23 = vld [vmem:[%s962_s1 + $0x40] sm:$0xff]  ;;  %v488_v29 = vld [vmem:[%s963_s0 + $0xc] sm:$0xf0] }
   0x9   :  { %v486_v24 = vld [vmem:[%s963_s0] sm:$0xf]  ;;  %v636_v25 = vld [vmem:[%s963_s0 + $0x8] sm:$0xf0]  ;;  %v651_v27 = vld [vmem:[%s963_s0 + $0x80] sm:$0xf0] }
   0xa   :  { %628 = vmatmul.msk.bf16.vlgmr.msra.gmra.mxu2 %vm289_vm0, %v495_v8  ;;  %313 = vmatpush.bf16.msra.mxu0 %v658_v9  ;;  %v635_v28 = vld [vmem:[%s963_s0 + $0x4] sm:$0xf]  ;;  %v487_v30 = vor.u32 %v636_v25, %v486_v24  ;;  %v547_v31 = vor.u32 %v651_v27, %v546_v26  ;;  %v518_v33 = vld [vmem:[%s963_s0 + $0x38] sm:$0xf]  ;;  %v39_v36 = vld [vmem:[%s963_s0 + $0x90] sm:$0xff] }
   0xb   :  { %673 = vmatpush.bf16.msra.mxu3 %v658_v9  ;;  %356 = vmatpush.bf16.msra.mxu1 %v666_v10  ;;  %v491_v32 = vor.u32 %v635_v28, %v488_v29  ;;  %v643_v34 = vld [vmem:[%s963_s0 + $0x40] sm:$0xf0]  ;;  %v498_v37 = vld [vmem:[%s963_s0 + $0x18] sm:$0xf]  ;;  %v143_v39 = vunpack.c.l.b16 %v39_v36  ;;  %v638_v40 = vld [vmem:[%s963_s0 + $0x1c] sm:$0xf]  ;;  %v144_v62 = vunpack.c.h.b16 %v39_v36 }
   0xc   :  { %v519_v35 = vor.u32 %v643_v34, %v518_v33  ;;  %v639_v38 = vld [vmem:[%s963_s0 + $0x20] sm:$0xf0]  ;;  %v500_v41 = vld [vmem:[%s963_s0 + $0x24] sm:$0xf0]  ;;  %v530_v45 = vld [vmem:[%s963_s0 + $0x50] sm:$0xf] }
   0xd   :  { %v499_v42 = vor.u32 %v639_v38, %v498_v37  ;;  %v164_v43 = vpack.c.b16 %v143_v39, %v143_v39  ;;  %v503_v44 = vor.u32 %v638_v40, %v500_v41  ;;  %v646_v46 = vld [vmem:[%s963_s0 + $0x58] sm:$0xf0]  ;;  %v510_v48 = vld [vmem:[%s963_s0 + $0x30] sm:$0xf]  ;;  %v641_v50 = vld [vmem:[%s963_s0 + $0x34] sm:$0xf]  ;;  %v165_v3 = vpack.c.b16 %v144_v62, %v144_v62 }
   0xe   :  { %314 = vmatpush.bf16.msra.mxu0 %v657_v11  ;;  %v531_v47 = vor.u32 %v646_v46, %v530_v45  ;;  %v642_v49 = vld [vmem:[%s963_s0 + $0x38] sm:$0xf0]  ;;  %v512_v51 = vld [vmem:[%s963_s0 + $0x3c] sm:$0xf0]  ;;  %v548_v53 = vld [vmem:[%s963_s0 + $0x84] sm:$0xf0] }
   0xf   :  { %674 = vmatpush.bf16.msra.mxu3 %v657_v11  ;;  %357 = vmatpush.bf16.msra.mxu1 %v665_v12  ;;  %v650_v52 = vld [vmem:[%s963_s0 + $0x7c] sm:$0xf]  ;;  %v511_v54 = vor.u32 %v642_v49, %v510_v48  ;;  %v515_v55 = vor.u32 %v641_v50, %v512_v51  ;;  %v542_v57 = vld [vmem:[%s963_s0 + $0x68] sm:$0xf]  ;;  %v649_v58 = vld [vmem:[%s963_s0 + $0x70] sm:$0xf0] }
  0x10   :  { %v551_v56 = vor.u32 %v650_v52, %v548_v53  ;;  %v543_v59 = vor.u32 %v649_v58, %v542_v57  ;;  %v522_v60 = vld [vmem:[%s963_s0 + $0x48] sm:$0xf]  ;;  %v645_v61 = vld [vmem:[%s963_s0 + $0x50] sm:$0xf0]  ;;  %v644_v63 = vld [vmem:[%s963_s0 + $0x4c] sm:$0xf] }
  0x11   :  { %v524_v0 = vld [vmem:[%s963_s0 + $0x54] sm:$0xf0]  ;;  %v652_v5 = vld [vmem:[%s963_s0 + $0x88] sm:$0xf0]  ;;  %v534_v7 = vld [vmem:[%s963_s0 + $0x60] sm:$0xf] }
  0x12   :  { %315 = vmatpush.bf16.msra.mxu0 %v656_v13  ;;  %v527_v2 = vor.u32 %v644_v63, %v524_v0  ;;  %v648_v8 = vld [vmem:[%s963_s0 + $0x68] sm:$0xf0]  ;;  %v647_v9 = vld [vmem:[%s963_s0 + $0x64] sm:$0xf]  ;;  %v886_v18 = vld [vmem:[%s964_s2] ss:$0 sm:$0xff] }
  0x13   :  { %675 = vmatpush.bf16.msra.mxu3 %v656_v13  ;;  %358 = vmatpush.bf16.msra.mxu1 %v664_v14  ;;  %v535_v11 = vor.u32 %v648_v8, %v534_v7  ;;  %v40_v13 = vld [vmem:[%s963_s0 + $0x98] sm:$0xf] }
  0x16   :  { %316 = vmatpush.bf16.msra.mxu0 %v655_v15 }
  0x17   :  { %676 = vmatpush.bf16.msra.mxu3 %v655_v15  ;;  %359 = vmatpush.bf16.msra.mxu1 %v663_v16 }
  0x1a   :  { %629 = vmatmul.msk.bf16.gmra.mxu2 %vm289_vm0, %v507_v19  ;;  %317 = vmatpush.bf16.msra.mxu0 %v654_v20 }
  0x1b   :  { %677 = vmatpush.bf16.msra.mxu3 %v654_v20  ;;  %360 = vmatpush.bf16.msra.mxu1 %v662_v21 }
  0x1e   :  { %318 = vmatpush.bf16.msra.mxu0 %v653_v22 }
  0x1f   :  { %678 = vmatpush.bf16.msra.mxu3 %v653_v22  ;;  %361 = vmatpush.bf16.msra.mxu1 %v661_v23 }
  0x21   :  { %319 = vmatmul.bf16.vlgmr.msra.gmra.mxu0 %v487_v30 }
  0x22   :  { %344 = vmatmul.bf16.vlgmr.msra.gmra.mxu3 %v547_v31  ;;  %362 = vmatmul.bf16.vlgmr.msra.gmra.mxu1 %v491_v32 }
  0x23   :  { %679 = vmatpush.bf16.msrb.mxu3 %v668_v1  ;;  %v523_v1 = vor.u32 %v645_v61, %v522_v60 }
  0x27   :  { %680 = vmatpush.bf16.msrb.mxu3 %v667_v4  ;;  %v554_v4 = vld [vmem:[%s963_s0 + $0x80] sm:$0xf] }
  0x28   :  { %v555_v6 = vor.u32 %v652_v5, %v554_v4 }
  0x2a   :  { %630 = vmatmul.msk.bf16.gmra.mxu2 %vm289_vm0, %v519_v35 }
  0x2b   :  { %681 = vmatpush.bf16.msrb.mxu3 %v666_v10  ;;  %v536_v10 = vld [vmem:[%s963_s0 + $0x6c] sm:$0xf0] }
  0x2f   :  { %682 = vmatpush.bf16.msrb.mxu3 %v665_v12  ;;  %v539_v12 = vor.u32 %v647_v9, %v536_v10 }
  0x31   :  { %324 = vmatmul.bf16.gmra.mxu0 %v499_v42 }
  0x32   :  { %349 = vmatmul.bf16.gmra.mxu3 %v164_v43  ;;  %367 = vmatmul.bf16.gmra.mxu1 %v503_v44 }
  0x33   :  { %683 = vmatpush.bf16.msrb.mxu3 %v664_v14  ;;  %v145_v14 = vunpack.c.l.b16 %v40_v13 }
  0x35   :  { %v166_v15 = vpack.c.b16 %v145_v14, %v145_v14 }
  0x37   :  { %684 = vmatpush.bf16.msrb.mxu3 %v663_v16 }
  0x3a   :  { %631 = vmatmul.msk.bf16.gmra.mxu2 %vm289_vm0, %v531_v47 }
  0x3b   :  { %685 = vmatpush.bf16.msrb.mxu3 %v662_v21 }
  0x3f   :  { %686 = vmatpush.bf16.msrb.mxu3 %v661_v23 }
  0x41   :  { %329 = vmatmul.bf16.gmra.mxu0 %v511_v54 }
  0x42   :  { %372 = vmatmul.bf16.gmra.mxu1 %v515_v55  ;;  %387 = vmatmul.bf16.vlgmr.msrb.gmra.mxu3 %v551_v56 }
  0x4a   :  { %632 = vmatmul.msk.bf16.gmra.mxu2 %vm289_vm0, %v543_v59 }
  0x51   :  { %334 = vmatmul.bf16.gmra.mxu0 %v523_v1 }
  0x52   :  { %377 = vmatmul.bf16.gmra.mxu1 %v527_v2  ;;  %392 = vmatmul.bf16.gmra.mxu3 %v165_v3 }
  0x5a   :  { %633 = vmatmul.msk.bf16.gmra.mxu2 %vm289_vm0, %v555_v6 }
  0x61   :  { %339 = vmatmul.bf16.gmra.mxu0 %v535_v11 }
  0x62   :  { %382 = vmatmul.bf16.gmra.mxu1 %v539_v12 }
  0x6a   :  { %634 = vmatmul.msk.bf16.gmra.mxu2 %vm289_vm0, %v166_v15 }
  0x8d   :  { %v406_v16 = vpop.f32.mrf.mxu2 }
  0x95   :  { %v408_v17 = vpop.f32.mrf.mxu2 }
  0x9d   :  { %v411_v19 = vpop.f32.mrf.mxu2 }
  0x9e   :  { %v320_v20 = vpop.f32.mrf.mxu0 }
  0x9f   :  { %v321_v21 = vadd.f32 %v886_v18, %v320_v20  ;;  %v363_v22 = vpop.f32.mrf.mxu1 }
  0xa1   :  { %v364_v23 = vadd.f32 %v363_v22, %v321_v21 }
  0xa3   :  { %v407_v24 = vadd.f32 %v406_v16, %v364_v23 }
  0xa5   :  { %v440_v25 = vmax.f32 %v407_v24, 0.0  ;;  %v889_v26 = vpop.f32.mrf.mxu3  ;;  %v413_v27 = vpop.f32.mrf.mxu2 }
  0xa6   :  { %v322_v28 = vpop.f32.mrf.mxu0  ;;  %v346_v24 = vadd.f32 %v886_v18, %v889_v26 }
  0xa7   :  { %v453_v29 = vpack.c.bf16 %v440_v25, %v440_v25  ;;  %v323_v30 = vadd.f32 %v886_v18, %v322_v28  ;;  %v365_v31 = vpop.f32.mrf.mxu1 }
  0xa9   :  { %467 = vst.msk [vmem:[%s965_s3] sm:$0xf] %vm466_vm1, %v453_v29  ;;  %v366_v32 = vadd.f32 %v365_v31, %v323_v30 }
  0xab   :  { %v409_v33 = vadd.f32 %v408_v17, %v366_v32 }
  0xad   :  { %v441_v34 = vmax.f32 %v409_v33, 0.0  ;;  %v896_v35 = vpop.f32.mrf.mxu3  ;;  %v416_v36 = vpop.f32.mrf.mxu2 }
  0xae   :  { %v325_v37 = vpop.f32.mrf.mxu0  ;;  %v348_v26 = vadd.f32 %v886_v18, %v896_v35 }
  0xaf   :  { %v454_v38 = vpack.c.bf16 %v441_v34, %v441_v34  ;;  %v326_v39 = vadd.f32 %v886_v18, %v325_v37  ;;  %v368_v40 = vpop.f32.mrf.mxu1 }
  0xb1   :  { %468 = vst.msk [vmem:[%s965_s3 + $0x4] sm:$0xf] %vm466_vm1, %v454_v38  ;;  %v369_v41 = vadd.f32 %v368_v40, %v326_v39 }
  0xb3   :  { %v412_v42 = vadd.f32 %v411_v19, %v369_v41 }
  0xb5   :  { %v442_v43 = vmax.f32 %v412_v42, 0.0  ;;  %v903_v44 = vpop.f32.mrf.mxu3  ;;  %v418_v45 = vpop.f32.mrf.mxu2 }
  0xb6   :  { %v327_v46 = vpop.f32.mrf.mxu0 }
  0xb7   :  { %v455_v47 = vpack.c.bf16 %v442_v43, %v442_v43  ;;  %v328_v48 = vadd.f32 %v886_v18, %v327_v46  ;;  %v370_v49 = vpop.f32.mrf.mxu1 }
  0xb9   :  { %469 = vst.msk [vmem:[%s965_s3 + $0x8] sm:$0xf] %vm466_vm1, %v455_v47  ;;  %v371_v50 = vadd.f32 %v370_v49, %v328_v48 }
  0xbb   :  { %v414_v51 = vadd.f32 %v413_v27, %v371_v50 }
  0xbd   :  { %v443_v52 = vmax.f32 %v414_v51, 0.0  ;;  %v352_v53 = vpop.f32.mrf.mxu3  ;;  %v421_v54 = vpop.f32.mrf.mxu2  ;;  %v351_v51 = vadd.f32 %v886_v18, %v903_v44 }
  0xbe   :  { %v330_v55 = vpop.f32.mrf.mxu0 }
  0xbf   :  { %v456_v56 = vpack.c.bf16 %v443_v52, %v443_v52  ;;  %v331_v57 = vadd.f32 %v886_v18, %v330_v55  ;;  %v373_v58 = vpop.f32.mrf.mxu1 }
  0xc1   :  { %470 = vst.msk [vmem:[%s965_s3 + $0xc] sm:$0xf] %vm466_vm1, %v456_v56  ;;  %v374_v59 = vadd.f32 %v373_v58, %v331_v57 }
  0xc3   :  { %v417_v60 = vadd.f32 %v416_v36, %v374_v59 }
  0xc5   :  { %v444_v61 = vmax.f32 %v417_v60, 0.0  ;;  %v388_v62 = vpop.f32.mrf.mxu3  ;;  %v423_v63 = vpop.f32.mrf.mxu2 }
  0xc6   :  { %v332_v0 = vpop.f32.mrf.mxu0  ;;  %v389_v27 = vadd.f32 %v388_v62, %v346_v24 }
  0xc7   :  { %v457_v1 = vpack.c.bf16 %v444_v61, %v444_v61  ;;  %v333_v2 = vadd.f32 %v886_v18, %v332_v0  ;;  %v375_v3 = vpop.f32.mrf.mxu1 }
  0xc9   :  { %471 = vst.msk [vmem:[%s965_s3 + $0x10] sm:$0xf] %vm466_vm1, %v457_v1  ;;  %v376_v4 = vadd.f32 %v375_v3, %v333_v2 }
  0xcb   :  { %v419_v5 = vadd.f32 %v418_v45, %v376_v4 }
  0xcd   :  { %v445_v6 = vmax.f32 %v419_v5, 0.0  ;;  %v390_v7 = vpop.f32.mrf.mxu3  ;;  %v426_v8 = vpop.f32.mrf.mxu2 }
  0xce   :  { %v335_v9 = vpop.f32.mrf.mxu0  ;;  %v391_v41 = vadd.f32 %v390_v7, %v348_v26 }
  0xcf   :  { %v458_v10 = vpack.c.bf16 %v445_v6, %v445_v6  ;;  %v336_v11 = vadd.f32 %v886_v18, %v335_v9  ;;  %v378_v12 = vpop.f32.mrf.mxu1 }
  0xd1   :  { %472 = vst.msk [vmem:[%s965_s3 + $0x14] sm:$0xf] %vm466_vm1, %v458_v10  ;;  %v379_v13 = vadd.f32 %v378_v12, %v336_v11 }
  0xd3   :  { %v422_v14 = vadd.f32 %v421_v54, %v379_v13 }
  0xd5   :  { %v446_v15 = vmax.f32 %v422_v14, 0.0  ;;  %v393_v16 = vpop.f32.mrf.mxu3  ;;  %v428_v17 = vpop.f32.mrf.mxu2 }
  0xd6   :  { %v337_v19 = vpop.f32.mrf.mxu0  ;;  %v394_v54 = vadd.f32 %v393_v16, %v351_v51 }
  0xd7   :  { %v459_v20 = vpack.c.bf16 %v446_v15, %v446_v15  ;;  %v338_v21 = vadd.f32 %v886_v18, %v337_v19  ;;  %v380_v22 = vpop.f32.mrf.mxu1 }
  0xd9   :  { %473 = vst.msk [vmem:[%s965_s3 + $0x18] sm:$0xf] %vm466_vm1, %v459_v20  ;;  %v381_v23 = vadd.f32 %v380_v22, %v338_v21 }
  0xdb   :  { %v424_v25 = vadd.f32 %v423_v63, %v381_v23 }
  0xdd   :  { %v447_v28 = vmax.f32 %v424_v25, 0.0  ;;  %v431_v29 = vpop.f32.mrf.mxu2  ;;  %v395_v30 = vpop.f32.mrf.mxu3 }
  0xde   :  { %v432_v31 = vadd.f32 %v431_v29, %v389_v27  ;;  %v340_v32 = vpop.f32.mrf.mxu0 }
  0xdf   :  { %v460_v33 = vpack.c.bf16 %v447_v28, %v447_v28  ;;  %v341_v34 = vadd.f32 %v886_v18, %v340_v32  ;;  %v383_v36 = vpop.f32.mrf.mxu1 }
  0xe0   :  { %v450_v37 = vmax.f32 %v432_v31, 0.0 }
  0xe1   :  { %474 = vst.msk [vmem:[%s965_s3 + $0x1c] sm:$0xf] %vm466_vm1, %v460_v33  ;;  %v384_v38 = vadd.f32 %v383_v36, %v341_v34 }
  0xe2   :  { %v463_v39 = vpack.c.bf16 %v450_v37, %v450_v37 }
  0xe3   :  { %v427_v40 = vadd.f32 %v426_v8, %v384_v38 }
  0xe4   :  { %477 = vst.msk [vmem:[%s965_s3 + $0x28] sm:$0xf] %vm466_vm1, %v463_v39 }
  0xe5   :  { %v448_v42 = vmax.f32 %v427_v40, 0.0  ;;  %v433_v43 = vpop.f32.mrf.mxu2 }
  0xe6   :  { %v434_v45 = vadd.f32 %v433_v43, %v391_v41  ;;  %v342_v46 = vpop.f32.mrf.mxu0 }
  0xe7   :  { %v461_v47 = vpack.c.bf16 %v448_v42, %v448_v42  ;;  %v343_v48 = vadd.f32 %v886_v18, %v342_v46  ;;  %v385_v50 = vpop.f32.mrf.mxu1 }
  0xe8   :  { %v451_v49 = vmax.f32 %v434_v45, 0.0 }
  0xe9   :  { %475 = vst.msk [vmem:[%s965_s3 + $0x20] sm:$0xf] %vm466_vm1, %v461_v47  ;;  %v386_v35 = vadd.f32 %v385_v50, %v343_v48 }
  0xea   :  { %v464_v52 = vpack.c.bf16 %v451_v49, %v451_v49 }
  0xeb   :  { %v429_v53 = vadd.f32 %v428_v17, %v386_v35 }
  0xec   :  { %478 = vst.msk [vmem:[%s965_s3 + $0x2c] sm:$0xf] %vm466_vm1, %v464_v52 }
  0xed   :  { %v449_v55 = vmax.f32 %v429_v53, 0.0  ;;  %v436_v56 = vpop.f32.mrf.mxu2 }
  0xee   :  { %v437_v57 = vadd.f32 %v436_v56, %v394_v54 }
  0xef   :  { %v462_v58 = vpack.c.bf16 %v449_v55, %v449_v55 }
  0xf0   :  { %v452_v59 = vmax.f32 %v437_v57, 0.0 }
  0xf1   :  { %476 = vst.msk [vmem:[%s965_s3 + $0x24] sm:$0xf] %vm466_vm1, %v462_v58 }
  0xf2   :  { %v465_v60 = vpack.c.bf16 %v452_v59, %v452_v59 }
  0xf4   :  { %479 = vst.msk [vmem:[%s965_s3 + $0x30] sm:$0xf] %vm466_vm1, %v465_v60 }
  0xf5   :  { %v438_v18 = vpop.f32.mrf.mxu2 }

// kernel: net_forward.7
= control target key start
LH: loop header
LB: loop body
LE: loop exit
PB: predicated region body
PF: predicated region fallthrough
CT: control target
= control target key end

     0   :  { %vm1693_vm0 = vcmask 523264   ;;  %vm2105_vm1 = vcmask 80896   ;;  %s3842_s1 = inlined_call_operand.vmem [shape: bf16[3136,128], index: 1, kind: input, shape index: {}]   ;;  %s3843_s0 = inlined_call_operand.vmem [shape: bf16[8,3136], index: 0, kind: input, shape index: {}]   ;;  %s3844_s2 = inlined_call_operand.vmem [shape: f32[1,128], index: 2, kind: input, shape index: {}]   ;;  %s3845_s4 = inlined_call_operand.vmem [shape: f32[1,10], index: 4, kind: input, shape index: {}]   ;;  %s3846_s3 = inlined_call_operand.vmem [shape: bf16[128,10], index: 3, kind: input, shape index: {}]   ;;  %s3847_s5 = inlined_call_operand.vmem [shape: f32[8,10], index: 5, kind: output, shape index: {}]  }
   0x1   :  { %v2946_v0 = vld [vmem:[%s3842_s1 + $0x38] sm:$0xff]  ;;  %v2945_v4 = vld [vmem:[%s3842_s1 + $0x30] sm:$0xff]  ;;  %v2944_v8 = vld [vmem:[%s3842_s1 + $0x28] sm:$0xff] }
   0x2   :  { %v2962_v1 = vld [vmem:[%s3842_s1 + $0xb8] sm:$0xff]  ;;  %1697 = vmatpush.bf16.msra.mxu0 %v2946_v0  ;;  %v2961_v5 = vld [vmem:[%s3842_s1 + $0xb0] sm:$0xff]  ;;  %v2960_v9 = vld [vmem:[%s3842_s1 + $0xa8] sm:$0xff] }
   0x3   :  { %v2970_v2 = vld [vmem:[%s3842_s1 + $0xf8] sm:$0xff]  ;;  %1723 = vmatpush.bf16.msra.mxu2 %v2962_v1  ;;  %v2969_v6 = vld [vmem:[%s3842_s1 + $0xf0] sm:$0xff]  ;;  %v2968_v10 = vld [vmem:[%s3842_s1 + $0xe8] sm:$0xff] }
   0x4   :  { %v2954_v3 = vld [vmem:[%s3842_s1 + $0x78] sm:$0xff]  ;;  %1736 = vmatpush.bf16.msra.mxu3 %v2970_v2  ;;  %v2953_v7 = vld [vmem:[%s3842_s1 + $0x70] sm:$0xff]  ;;  %v2952_v11 = vld [vmem:[%s3842_s1 + $0x68] sm:$0xff] }
   0x5   :  { %1710 = vmatpush.bf16.msra.mxu1 %v2954_v3  ;;  %v2943_v12 = vld [vmem:[%s3842_s1 + $0x20] sm:$0xff]  ;;  %v2942_v16 = vld [vmem:[%s3842_s1 + $0x18] sm:$0xff]  ;;  %v2941_v20 = vld [vmem:[%s3842_s1 + $0x10] sm:$0xff] }
   0x6   :  { %1698 = vmatpush.bf16.msra.mxu0 %v2945_v4  ;;  %v2959_v13 = vld [vmem:[%s3842_s1 + $0xa0] sm:$0xff]  ;;  %v2958_v17 = vld [vmem:[%s3842_s1 + $0x98] sm:$0xff]  ;;  %v2957_v21 = vld [vmem:[%s3842_s1 + $0x90] sm:$0xff] }
   0x7   :  { %1724 = vmatpush.bf16.msra.mxu2 %v2961_v5  ;;  %v2967_v14 = vld [vmem:[%s3842_s1 + $0xe0] sm:$0xff]  ;;  %v2966_v18 = vld [vmem:[%s3842_s1 + $0xd8] sm:$0xff]  ;;  %v2965_v22 = vld [vmem:[%s3842_s1 + $0xd0] sm:$0xff] }
   0x8   :  { %1737 = vmatpush.bf16.msra.mxu3 %v2969_v6  ;;  %v2951_v15 = vld [vmem:[%s3842_s1 + $0x60] sm:$0xff]  ;;  %v2950_v19 = vld [vmem:[%s3842_s1 + $0x58] sm:$0xff]  ;;  %v2949_v23 = vld [vmem:[%s3842_s1 + $0x50] sm:$0xff] }
   0x9   :  { %1711 = vmatpush.bf16.msra.mxu1 %v2953_v7  ;;  %v2940_v24 = vld [vmem:[%s3842_s1 + $0x8] sm:$0xff]  ;;  %v21_v29 = vld [vmem:[%s3843_s0] sm:$0xff]  ;;  %v2978_v35 = vld [vmem:[%s3842_s1 + $0x138] sm:$0xff] }
   0xa   :  { %1699 = vmatpush.bf16.msra.mxu0 %v2944_v8  ;;  %v2956_v25 = vld [vmem:[%s3842_s1 + $0x88] sm:$0xff]  ;;  %v2939_v31 = vld [vmem:[%s3842_s1] sm:$0xff]  ;;  %v443_v33 = vunpack.c.l.b16 %v21_v29  ;;  %v2994_v37 = vld [vmem:[%s3842_s1 + $0x1b8] sm:$0xff]  ;;  %v444_v41 = vunpack.c.h.b16 %v21_v29 }
   0xb   :  { %1725 = vmatpush.bf16.msra.mxu2 %v2960_v9  ;;  %v22_v26 = vld [vmem:[%s3843_s0 + $0x8] sm:$0xff]  ;;  %v2955_v32 = vld [vmem:[%s3842_s1 + $0x80] sm:$0xff]  ;;  %v3002_v38 = vld [vmem:[%s3842_s1 + $0x1f8] sm:$0xff] }
   0xc   :  { %1738 = vmatpush.bf16.msra.mxu3 %v2968_v10  ;;  %v2964_v27 = vld [vmem:[%s3842_s1 + $0xc8] sm:$0xff]  ;;  %v445_v30 = vunpack.c.l.b16 %v22_v26  ;;  %v2963_v34 = vld [vmem:[%s3842_s1 + $0xc0] sm:$0xff]  ;;  %v446_v36 = vunpack.c.h.b16 %v22_v26  ;;  %v2986_v42 = vld [vmem:[%s3842_s1 + $0x178] sm:$0xff]  ;;  %v468_v43 = vpack.c.b16 %v443_v33, %v443_v33  ;;  %v469_v48 = vpack.c.b16 %v444_v41, %v444_v41 }
   0xd   :  { %1712 = vmatpush.bf16.msra.mxu1 %v2952_v11  ;;  %v2948_v28 = vld [vmem:[%s3842_s1 + $0x48] sm:$0xff]  ;;  %v2947_v39 = vld [vmem:[%s3842_s1 + $0x40] sm:$0xff]  ;;  %v2977_v44 = vld [vmem:[%s3842_s1 + $0x130] sm:$0xff] }
   0xe   :  { %1700 = vmatpush.bf16.msra.mxu0 %v2943_v12  ;;  %v470_v40 = vpack.c.b16 %v445_v30, %v445_v30  ;;  %v471_v45 = vpack.c.b16 %v446_v36, %v446_v36  ;;  %v2993_v46 = vld [vmem:[%s3842_s1 + $0x1b0] sm:$0xff]  ;;  %v2976_v50 = vld [vmem:[%s3842_s1 + $0x128] sm:$0xff]  ;;  %v2975_v54 = vld [vmem:[%s3842_s1 + $0x120] sm:$0xff] }
   0xf   :  { %1726 = vmatpush.bf16.msra.mxu2 %v2959_v13  ;;  %v3001_v47 = vld [vmem:[%s3842_s1 + $0x1f0] sm:$0xff]  ;;  %v2992_v51 = vld [vmem:[%s3842_s1 + $0x1a8] sm:$0xff]  ;;  %v2991_v55 = vld [vmem:[%s3842_s1 + $0x1a0] sm:$0xff] }
  0x10   :  { %1739 = vmatpush.bf16.msra.mxu3 %v2967_v14  ;;  %v2985_v49 = vld [vmem:[%s3842_s1 + $0x170] sm:$0xff]  ;;  %v3000_v52 = vld [vmem:[%s3842_s1 + $0x1e8] sm:$0xff]  ;;  %v2999_v56 = vld [vmem:[%s3842_s1 + $0x1e0] sm:$0xff] }
  0x11   :  { %1713 = vmatpush.bf16.msra.mxu1 %v2951_v15  ;;  %v2984_v53 = vld [vmem:[%s3842_s1 + $0x168] sm:$0xff]  ;;  %v2983_v57 = vld [vmem:[%s3842_s1 + $0x160] sm:$0xff]  ;;  %v2974_v58 = vld [vmem:[%s3842_s1 + $0x118] sm:$0xff] }
  0x12   :  { %1701 = vmatpush.bf16.msra.mxu0 %v2942_v16  ;;  %v2990_v59 = vld [vmem:[%s3842_s1 + $0x198] sm:$0xff]  ;;  %v2973_v62 = vld [vmem:[%s3842_s1 + $0x110] sm:$0xff]  ;;  %v2972_v2 = vld [vmem:[%s3842_s1 + $0x108] sm:$0xff] }
  0x13   :  { %1727 = vmatpush.bf16.msra.mxu2 %v2958_v17  ;;  %v2998_v60 = vld [vmem:[%s3842_s1 + $0x1d8] sm:$0xff]  ;;  %v2989_v63 = vld [vmem:[%s3842_s1 + $0x190] sm:$0xff]  ;;  %v2988_v3 = vld [vmem:[%s3842_s1 + $0x188] sm:$0xff] }
  0x14   :  { %1740 = vmatpush.bf16.msra.mxu3 %v2966_v18  ;;  %v2982_v61 = vld [vmem:[%s3842_s1 + $0x158] sm:$0xff]  ;;  %v2997_v0 = vld [vmem:[%s3842_s1 + $0x1d0] sm:$0xff]  ;;  %v2996_v4 = vld [vmem:[%s3842_s1 + $0x1c8] sm:$0xff] }
  0x15   :  { %1714 = vmatpush.bf16.msra.mxu1 %v2950_v19  ;;  %v2981_v1 = vld [vmem:[%s3842_s1 + $0x150] sm:$0xff]  ;;  %v24_v5 = vld [vmem:[%s3843_s0 + $0x18] sm:$0xff]  ;;  %v2980_v7 = vld [vmem:[%s3842_s1 + $0x148] sm:$0xff] }
  0x16   :  { %1702 = vmatpush.bf16.msra.mxu0 %v2941_v20  ;;  %v23_v6 = vld [vmem:[%s3843_s0 + $0x10] sm:$0xff]  ;;  %v2971_v8 = vld [vmem:[%s3842_s1 + $0x100] sm:$0xff]  ;;  %v449_v9 = vunpack.c.l.b16 %v24_v5  ;;  %v450_v13 = vunpack.c.h.b16 %v24_v5  ;;  %v3010_v14 = vld [vmem:[%s3842_s1 + $0x238] sm:$0xff] }
  0x17   :  { %1728 = vmatpush.bf16.msra.mxu2 %v2957_v21  ;;  %v2987_v10 = vld [vmem:[%s3842_s1 + $0x180] sm:$0xff]  ;;  %v447_v12 = vunpack.c.l.b16 %v23_v6  ;;  %v3026_v15 = vld [vmem:[%s3842_s1 + $0x2b8] sm:$0xff]  ;;  %v448_v18 = vunpack.c.h.b16 %v23_v6  ;;  %v3024_v29 = vld [vmem:[%s3842_s1 + $0x2a8] sm:$0xff] }
  0x18   :  { %1741 = vmatpush.bf16.msra.mxu3 %v2965_v22  ;;  %v2995_v11 = vld [vmem:[%s3842_s1 + $0x1c0] sm:$0xff]  ;;  %v3034_v16 = vld [vmem:[%s3842_s1 + $0x2f8] sm:$0xff]  ;;  %v474_v20 = vpack.c.b16 %v449_v9, %v449_v9  ;;  %v475_v22 = vpack.c.b16 %v450_v13, %v450_v13  ;;  %v3032_v30 = vld [vmem:[%s3842_s1 + $0x2e8] sm:$0xff] }
  0x19   :  { %1715 = vmatpush.bf16.msra.mxu1 %v2949_v23  ;;  %v2979_v17 = vld [vmem:[%s3842_s1 + $0x140] sm:$0xff]  ;;  %v3018_v19 = vld [vmem:[%s3842_s1 + $0x278] sm:$0xff]  ;;  %v472_v21 = vpack.c.b16 %v447_v12, %v447_v12  ;;  %v3009_v23 = vld [vmem:[%s3842_s1 + $0x230] sm:$0xff]  ;;  %v473_v26 = vpack.c.b16 %v448_v18, %v448_v18 }
  0x1a   :  { %1703 = vmatpush.bf16.msra.mxu0 %v2940_v24  ;;  %v3025_v24 = vld [vmem:[%s3842_s1 + $0x2b0] sm:$0xff]  ;;  %v3023_v33 = vld [vmem:[%s3842_s1 + $0x2a0] sm:$0xff]  ;;  %v3006_v36 = vld [vmem:[%s3842_s1 + $0x218] sm:$0xff] }
  0x1b   :  { %1729 = vmatpush.bf16.msra.mxu2 %v2956_v25  ;;  %v3033_v25 = vld [vmem:[%s3842_s1 + $0x2f0] sm:$0xff]  ;;  %v3040_v6 = vld [vmem:[%s3842_s1 + $0x328] sm:$0xff]  ;;  %v3063_v12 = vld [vmem:[%s3842_s1 + $0x3e0] sm:$0xff] }
  0x1c   :  { %1742 = vmatpush.bf16.msra.mxu3 %v2964_v27  ;;  %v3017_v27 = vld [vmem:[%s3842_s1 + $0x270] sm:$0xff]  ;;  %v3048_v9 = vld [vmem:[%s3842_s1 + $0x368] sm:$0xff]  ;;  %v3047_v13 = vld [vmem:[%s3842_s1 + $0x360] sm:$0xff] }
  0x1d   :  { %1716 = vmatpush.bf16.msra.mxu1 %v2948_v28  ;;  %v3008_v28 = vld [vmem:[%s3842_s1 + $0x228] sm:$0xff]  ;;  %v3021_v41 = vld [vmem:[%s3842_s1 + $0x290] sm:$0xff] }
  0x1e   :  { %1704 = vmatpush.bf16.msra.mxu0 %v2939_v31  ;;  %v3016_v31 = vld [vmem:[%s3842_s1 + $0x268] sm:$0xff]  ;;  %v3049_v5 = vld [vmem:[%s3842_s1 + $0x370] sm:$0xff] }
  0x1f   :  { %1730 = vmatpush.bf16.msra.mxu2 %v2955_v32  ;;  %v3007_v32 = vld [vmem:[%s3842_s1 + $0x220] sm:$0xff]  ;;  %v3037_v18 = vld [vmem:[%s3842_s1 + $0x310] sm:$0xff] }
  0x20   :  { %1743 = vmatpush.bf16.msra.mxu3 %v2963_v34  ;;  %v3031_v34 = vld [vmem:[%s3842_s1 + $0x2e0] sm:$0xff] }
  0x21   :  { %1717 = vmatpush.bf16.msra.mxu1 %v2947_v39  ;;  %1705 = vmatmul.bf16.vlgmr.msra.gmra.mxu0 %v468_v43  ;;  %v3014_v39 = vld [vmem:[%s3842_s1 + $0x258] sm:$0xff]  ;;  %v3013_v43 = vld [vmem:[%s3842_s1 + $0x250] sm:$0xff] }
  0x22   :  { %1749 = vmatpush.bf16.msrb.mxu0 %v2978_v35  ;;  %1731 = vmatmul.bf16.vlgmr.msra.gmra.mxu2 %v470_v40  ;;  %v3015_v35 = vld [vmem:[%s3842_s1 + $0x260] sm:$0xff]  ;;  %v3005_v40 = vld [vmem:[%s3842_s1 + $0x210] sm:$0xff] }
  0x23   :  { %1775 = vmatpush.bf16.msrb.mxu2 %v2994_v37  ;;  %1744 = vmatmul.bf16.vlgmr.msra.gmra.mxu3 %v471_v45  ;;  %v3022_v37 = vld [vmem:[%s3842_s1 + $0x298] sm:$0xff]  ;;  %v3020_v45 = vld [vmem:[%s3842_s1 + $0x288] sm:$0xff] }
  0x24   :  { %1788 = vmatpush.bf16.msrb.mxu3 %v3002_v38  ;;  %1718 = vmatmul.bf16.vlgmr.msra.gmra.mxu1 %v469_v48  ;;  %v3030_v38 = vld [vmem:[%s3842_s1 + $0x2d8] sm:$0xff]  ;;  %v26_v48 = vld [vmem:[%s3843_s0 + $0x28] sm:$0xff] }
  0x25   :  { %1762 = vmatpush.bf16.msrb.mxu1 %v2986_v42  ;;  %v3029_v42 = vld [vmem:[%s3842_s1 + $0x2d0] sm:$0xff] }
  0x26   :  { %1750 = vmatpush.bf16.msrb.mxu0 %v2977_v44  ;;  %v3004_v44 = vld [vmem:[%s3842_s1 + $0x208] sm:$0xff] }
  0x27   :  { %1776 = vmatpush.bf16.msrb.mxu2 %v2993_v46  ;;  %v25_v46 = vld [vmem:[%s3843_s0 + $0x20] sm:$0xff] }
  0x28   :  { %1789 = vmatpush.bf16.msrb.mxu3 %v3001_v47  ;;  %v3028_v47 = vld [vmem:[%s3842_s1 + $0x2c8] sm:$0xff] }
  0x29   :  { %1763 = vmatpush.bf16.msrb.mxu1 %v2985_v49  ;;  %v3012_v49 = vld [vmem:[%s3842_s1 + $0x248] sm:$0xff] }
  0x2a   :  { %1751 = vmatpush.bf16.msrb.mxu0 %v2976_v50  ;;  %v451_v50 = vunpack.c.l.b16 %v25_v46 }
  0x2b   :  { %1777 = vmatpush.bf16.msrb.mxu2 %v2992_v51  ;;  %v3003_v51 = vld [vmem:[%s3842_s1 + $0x200] sm:$0xff] }
  0x2c   :  { %1790 = vmatpush.bf16.msrb.mxu3 %v3000_v52  ;;  %v3019_v52 = vld [vmem:[%s3842_s1 + $0x280] sm:$0xff] }
  0x2d   :  { %1764 = vmatpush.bf16.msrb.mxu1 %v2984_v53  ;;  %v453_v53 = vunpack.c.l.b16 %v26_v48 }
  0x2e   :  { %1752 = vmatpush.bf16.msrb.mxu0 %v2975_v54  ;;  %v3027_v54 = vld [vmem:[%s3842_s1 + $0x2c0] sm:$0xff] }
  0x2f   :  { %1778 = vmatpush.bf16.msrb.mxu2 %v2991_v55  ;;  %v3042_v55 = vld [vmem:[%s3842_s1 + $0x338] sm:$0xff] }
  0x30   :  { %1791 = vmatpush.bf16.msrb.mxu3 %v2999_v56  ;;  %v454_v56 = vunpack.c.h.b16 %v26_v48  ;;  %v3072_v48 = vld [vmem:[%s3842_s1 + $0x428] sm:$0xff] }
  0x31   :  { %1765 = vmatpush.bf16.msrb.mxu1 %v2983_v57  ;;  %v3058_v57 = vld [vmem:[%s3842_s1 + $0x3b8] sm:$0xff] }
  0x32   :  { %1753 = vmatpush.bf16.msrb.mxu0 %v2974_v58  ;;  %v3066_v58 = vld [vmem:[%s3842_s1 + $0x3f8] sm:$0xff] }
  0x33   :  { %1779 = vmatpush.bf16.msrb.mxu2 %v2990_v59  ;;  %v452_v59 = vunpack.c.h.b16 %v25_v46  ;;  %v3097_v46 = vld [vmem:[%s3842_s1 + $0x4f0] sm:$0xff] }
  0x34   :  { %1792 = vmatpush.bf16.msrb.mxu3 %v2998_v60  ;;  %v3011_v60 = vld [vmem:[%s3842_s1 + $0x240] sm:$0xff] }
  0x35   :  { %1766 = vmatpush.bf16.msrb.mxu1 %v2982_v61  ;;  %v476_v61 = vpack.c.b16 %v451_v50, %v451_v50  ;;  %v3096_v50 = vld [vmem:[%s3842_s1 + $0x4e8] sm:$0xff] }
  0x36   :  { %1754 = vmatpush.bf16.msrb.mxu0 %v2973_v62  ;;  %v478_v62 = vpack.c.b16 %v453_v53, %v453_v53  ;;  %v3087_v53 = vld [vmem:[%s3842_s1 + $0x4a0] sm:$0xff] }
  0x37   :  { %1780 = vmatpush.bf16.msrb.mxu2 %v2989_v63  ;;  %v3050_v63 = vld [vmem:[%s3842_s1 + $0x378] sm:$0xff] }
  0x38   :  { %1793 = vmatpush.bf16.msrb.mxu3 %v2997_v0  ;;  %v479_v0 = vpack.c.b16 %v454_v56, %v454_v56  ;;  %v3070_v56 = vld [vmem:[%s3842_s1 + $0x418] sm:$0xff] }
  0x39   :  { %1767 = vmatpush.bf16.msrb.mxu1 %v2981_v1  ;;  %v3041_v1 = vld [vmem:[%s3842_s1 + $0x330] sm:$0xff] }
  0x3a   :  { %1755 = vmatpush.bf16.msrb.mxu0 %v2972_v2  ;;  %v477_v2 = vpack.c.b16 %v452_v59, %v452_v59  ;;  %v3078_v59 = vld [vmem:[%s3842_s1 + $0x458] sm:$0xff] }
  0x3b   :  { %1781 = vmatpush.bf16.msrb.mxu2 %v2988_v3  ;;  %v3057_v3 = vld [vmem:[%s3842_s1 + $0x3b0] sm:$0xff] }
  0x3c   :  { %1794 = vmatpush.bf16.msrb.mxu3 %v2996_v4  ;;  %v3065_v4 = vld [vmem:[%s3842_s1 + $0x3f0] sm:$0xff] }
  0x3d   :  { %1768 = vmatpush.bf16.msrb.mxu1 %v2980_v7  ;;  %v3056_v7 = vld [vmem:[%s3842_s1 + $0x3a8] sm:$0xff] }
  0x3e   :  { %1756 = vmatpush.bf16.msrb.mxu0 %v2971_v8  ;;  %v3064_v8 = vld [vmem:[%s3842_s1 + $0x3e8] sm:$0xff] }
  0x3f   :  { %1782 = vmatpush.bf16.msrb.mxu2 %v2987_v10  ;;  %v3039_v10 = vld [vmem:[%s3842_s1 + $0x320] sm:$0xff] }
  0x40   :  { %1795 = vmatpush.bf16.msrb.mxu3 %v2995_v11  ;;  %v3055_v11 = vld [vmem:[%s3842_s1 + $0x3a0] sm:$0xff] }
  0x41   :  { %1769 = vmatpush.bf16.msrb.mxu1 %v2979_v17  ;;  %1757 = vmatmul.bf16.vlgmr.msrb.gmra.mxu0 %v472_v21  ;;  %v3046_v17 = vld [vmem:[%s3842_s1 + $0x358] sm:$0xff]  ;;  %v3045_v21 = vld [vmem:[%s3842_s1 + $0x350] sm:$0xff] }
  0x42   :  { %1801 = vmatpush.bf16.msra.mxu0 %v3010_v14  ;;  %1783 = vmatmul.bf16.vlgmr.msrb.gmra.mxu2 %v474_v20  ;;  %v3038_v14 = vld [vmem:[%s3842_s1 + $0x318] sm:$0xff]  ;;  %v3061_v20 = vld [vmem:[%s3842_s1 + $0x3d0] sm:$0xff] }
  0x43   :  { %1827 = vmatpush.bf16.msra.mxu2 %v3026_v15  ;;  %1796 = vmatmul.bf16.vlgmr.msrb.gmra.mxu3 %v475_v22  ;;  %v3054_v15 = vld [vmem:[%s3842_s1 + $0x398] sm:$0xff]  ;;  %v3036_v22 = vld [vmem:[%s3842_s1 + $0x308] sm:$0xff] }
  0x44   :  { %1840 = vmatpush.bf16.msra.mxu3 %v3034_v16  ;;  %1770 = vmatmul.bf16.vlgmr.msrb.gmra.mxu1 %v473_v26  ;;  %v3062_v16 = vld [vmem:[%s3842_s1 + $0x3d8] sm:$0xff]  ;;  %v3060_v26 = vld [vmem:[%s3842_s1 + $0x3c8] sm:$0xff] }
  0x45   :  { %1814 = vmatpush.bf16.msra.mxu1 %v3018_v19  ;;  %v3053_v19 = vld [vmem:[%s3842_s1 + $0x390] sm:$0xff] }
  0x46   :  { %1802 = vmatpush.bf16.msra.mxu0 %v3009_v23  ;;  %v3052_v23 = vld [vmem:[%s3842_s1 + $0x388] sm:$0xff] }
  0x47   :  { %1828 = vmatpush.bf16.msra.mxu2 %v3025_v24  ;;  %v27_v24 = vld [vmem:[%s3843_s0 + $0x30] sm:$0xff] }
  0x48   :  { %1841 = vmatpush.bf16.msra.mxu3 %v3033_v25  ;;  %v28_v25 = vld [vmem:[%s3843_s0 + $0x38] sm:$0xff] }
  0x49   :  { %1815 = vmatpush.bf16.msra.mxu1 %v3017_v27  ;;  %v3044_v27 = vld [vmem:[%s3842_s1 + $0x348] sm:$0xff] }
  0x4a   :  { %1803 = vmatpush.bf16.msra.mxu0 %v3008_v28  ;;  %v3035_v28 = vld [vmem:[%s3842_s1 + $0x300] sm:$0xff] }
  0x4b   :  { %1829 = vmatpush.bf16.msra.mxu2 %v3024_v29  ;;  %v455_v29 = vunpack.c.l.b16 %v27_v24 }
  0x4c   :  { %1842 = vmatpush.bf16.msra.mxu3 %v3032_v30  ;;  %v457_v30 = vunpack.c.l.b16 %v28_v25 }
  0x4d   :  { %1816 = vmatpush.bf16.msra.mxu1 %v3016_v31  ;;  %v3051_v31 = vld [vmem:[%s3842_s1 + $0x380] sm:$0xff] }
  0x4e   :  { %1804 = vmatpush.bf16.msra.mxu0 %v3007_v32  ;;  %v3074_v32 = vld [vmem:[%s3842_s1 + $0x438] sm:$0xff] }
  0x4f   :  { %1830 = vmatpush.bf16.msra.mxu2 %v3023_v33  ;;  %v458_v33 = vunpack.c.h.b16 %v28_v25  ;;  %v3113_v25 = vld [vmem:[%s3842_s1 + $0x570] sm:$0xff] }
  0x50   :  { %1843 = vmatpush.bf16.msra.mxu3 %v3031_v34  ;;  %v3059_v34 = vld [vmem:[%s3842_s1 + $0x3c0] sm:$0xff] }
  0x51   :  { %1817 = vmatpush.bf16.msra.mxu1 %v3015_v35  ;;  %v3090_v35 = vld [vmem:[%s3842_s1 + $0x4b8] sm:$0xff] }
  0x52   :  { %1805 = vmatpush.bf16.msra.mxu0 %v3006_v36  ;;  %v456_v36 = vunpack.c.h.b16 %v27_v24  ;;  %v3129_v24 = vld [vmem:[%s3842_s1 + $0x5f0] sm:$0xff] }
  0x53   :  { %1831 = vmatpush.bf16.msra.mxu2 %v3022_v37  ;;  %v3098_v37 = vld [vmem:[%s3842_s1 + $0x4f8] sm:$0xff] }
  0x54   :  { %1844 = vmatpush.bf16.msra.mxu3 %v3030_v38  ;;  %v3043_v38 = vld [vmem:[%s3842_s1 + $0x340] sm:$0xff] }
  0x55   :  { %1818 = vmatpush.bf16.msra.mxu1 %v3014_v39  ;;  %v480_v39 = vpack.c.b16 %v455_v29, %v455_v29  ;;  %v3143_v29 = vld [vmem:[%s3844_s2] ss:$0 sm:$0xff] }
  0x56   :  { %1806 = vmatpush.bf16.msra.mxu0 %v3005_v40  ;;  %v482_v40 = vpack.c.b16 %v457_v30, %v457_v30  ;;  %v3112_v30 = vld [vmem:[%s3842_s1 + $0x568] sm:$0xff] }
  0x57   :  { %1832 = vmatpush.bf16.msra.mxu2 %v3021_v41  ;;  %v3082_v41 = vld [vmem:[%s3842_s1 + $0x478] sm:$0xff] }
  0x58   :  { %1845 = vmatpush.bf16.msra.mxu3 %v3029_v42  ;;  %v483_v42 = vpack.c.b16 %v458_v33, %v458_v33  ;;  %v3127_v33 = vld [vmem:[%s3842_s1 + $0x5e0] sm:$0xff] }
  0x59   :  { %1819 = vmatpush.bf16.msra.mxu1 %v3013_v43  ;;  %v481_v43 = vpack.c.b16 %v456_v36, %v456_v36  ;;  %v3111_v36 = vld [vmem:[%s3842_s1 + $0x560] sm:$0xff] }
  0x5a   :  { %1807 = vmatpush.bf16.msra.mxu0 %v3004_v44  ;;  %v3073_v44 = vld [vmem:[%s3842_s1 + $0x430] sm:$0xff] }
  0x5b   :  { %1833 = vmatpush.bf16.msra.mxu2 %v3020_v45  ;;  %v3089_v45 = vld [vmem:[%s3842_s1 + $0x4b0] sm:$0xff] }
  0x5c   :  { %1846 = vmatpush.bf16.msra.mxu3 %v3028_v47  ;;  %v3081_v47 = vld [vmem:[%s3842_s1 + $0x470] sm:$0xff] }
  0x5d   :  { %1820 = vmatpush.bf16.msra.mxu1 %v3012_v49  ;;  %v3088_v49 = vld [vmem:[%s3842_s1 + $0x4a8] sm:$0xff] }
  0x5e   :  { %1808 = vmatpush.bf16.msra.mxu0 %v3003_v51  ;;  %v3080_v51 = vld [vmem:[%s3842_s1 + $0x468] sm:$0xff] }
  0x5f   :  { %1834 = vmatpush.bf16.msra.mxu2 %v3019_v52  ;;  %v3071_v52 = vld [vmem:[%s3842_s1 + $0x420] sm:$0xff] }
  0x60   :  { %1847 = vmatpush.bf16.msra.mxu3 %v3027_v54  ;;  %v3095_v54 = vld [vmem:[%s3842_s1 + $0x4e0] sm:$0xff] }
  0x61   :  { %1821 = vmatpush.bf16.msra.mxu1 %v3011_v60  ;;  %1809 = vmatmul.bf16.vlgmr.msra.gmra.mxu0 %v476_v61  ;;  %v3069_v60 = vld [vmem:[%s3842_s1 + $0x410] sm:$0xff] }
  0x62   :  { %1853 = vmatpush.bf16.msrb.mxu0 %v3042_v55  ;;  %1835 = vmatmul.bf16.vlgmr.msra.gmra.mxu2 %v478_v62  ;;  %v3079_v55 = vld [vmem:[%s3842_s1 + $0x460] sm:$0xff]  ;;  %v3085_v61 = vld [vmem:[%s3842_s1 + $0x490] sm:$0xff] }
  0x63   :  { %1879 = vmatpush.bf16.msrb.mxu2 %v3058_v57  ;;  %1848 = vmatmul.bf16.vlgmr.msra.gmra.mxu3 %v479_v0  ;;  %v3086_v57 = vld [vmem:[%s3842_s1 + $0x498] sm:$0xff]  ;;  %v3093_v62 = vld [vmem:[%s3842_s1 + $0x4d0] sm:$0xff]  ;;  %v3068_v0 = vld [vmem:[%s3842_s1 + $0x408] sm:$0xff] }
  0x64   :  { %1892 = vmatpush.bf16.msrb.mxu3 %v3066_v58  ;;  %1822 = vmatmul.bf16.vlgmr.msra.gmra.mxu1 %v477_v2  ;;  %v3094_v58 = vld [vmem:[%s3842_s1 + $0x4d8] sm:$0xff]  ;;  %v3092_v2 = vld [vmem:[%s3842_s1 + $0x4c8] sm:$0xff] }
  0x65   :  { %1866 = vmatpush.bf16.msrb.mxu1 %v3050_v63  ;;  %v3077_v63 = vld [vmem:[%s3842_s1 + $0x450] sm:$0xff] }
  0x66   :  { %1854 = vmatpush.bf16.msrb.mxu0 %v3041_v1  ;;  %v3084_v1 = vld [vmem:[%s3842_s1 + $0x488] sm:$0xff] }
  0x67   :  { %1880 = vmatpush.bf16.msrb.mxu2 %v3057_v3  ;;  %v29_v3 = vld [vmem:[%s3843_s0 + $0x40] sm:$0xff] }
  0x68   :  { %1893 = vmatpush.bf16.msrb.mxu3 %v3065_v4  ;;  %v30_v4 = vld [vmem:[%s3843_s0 + $0x48] sm:$0xff] }
  0x69   :  { %1867 = vmatpush.bf16.msrb.mxu1 %v3049_v5  ;;  %v3076_v5 = vld [vmem:[%s3842_s1 + $0x448] sm:$0xff] }
  0x6a   :  { %1855 = vmatpush.bf16.msrb.mxu0 %v3040_v6  ;;  %v3067_v6 = vld [vmem:[%s3842_s1 + $0x400] sm:$0xff] }
  0x6b   :  { %1881 = vmatpush.bf16.msrb.mxu2 %v3056_v7  ;;  %v459_v7 = vunpack.c.l.b16 %v29_v3 }
  0x6c   :  { %1894 = vmatpush.bf16.msrb.mxu3 %v3064_v8  ;;  %v461_v8 = vunpack.c.l.b16 %v30_v4 }
  0x6d   :  { %1868 = vmatpush.bf16.msrb.mxu1 %v3048_v9  ;;  %v3083_v9 = vld [vmem:[%s3842_s1 + $0x480] sm:$0xff] }
  0x6e   :  { %1856 = vmatpush.bf16.msrb.mxu0 %v3039_v10  ;;  %v3091_v10 = vld [vmem:[%s3842_s1 + $0x4c0] sm:$0xff] }
  0x6f   :  { %1882 = vmatpush.bf16.msrb.mxu2 %v3055_v11  ;;  %v462_v11 = vunpack.c.h.b16 %v30_v4 }
  0x70   :  { %1895 = vmatpush.bf16.msrb.mxu3 %v3063_v12  ;;  %v3106_v12 = vld [vmem:[%s3842_s1 + $0x538] sm:$0xff] }
  0x71   :  { %1869 = vmatpush.bf16.msrb.mxu1 %v3047_v13  ;;  %v3122_v13 = vld [vmem:[%s3842_s1 + $0x5b8] sm:$0xff] }
  0x72   :  { %1857 = vmatpush.bf16.msrb.mxu0 %v3038_v14  ;;  %v460_v14 = vunpack.c.h.b16 %v29_v3  ;;  %v3134_v3 = vld [vmem:[%s3842_s1 + $0x618] sm:$0xff] }
  0x73   :  { %1883 = vmatpush.bf16.msrb.mxu2 %v3054_v15  ;;  %v3130_v15 = vld [vmem:[%s3842_s1 + $0x5f8] sm:$0xff] }
  0x74   :  { %1896 = vmatpush.bf16.msrb.mxu3 %v3062_v16  ;;  %v3075_v16 = vld [vmem:[%s3842_s1 + $0x440] sm:$0xff] }
  0x75   :  { %1870 = vmatpush.bf16.msrb.mxu1 %v3046_v17  ;;  %v484_v17 = vpack.c.b16 %v459_v7, %v459_v7 }
  0x76   :  { %1858 = vmatpush.bf16.msrb.mxu0 %v3037_v18  ;;  %v486_v18 = vpack.c.b16 %v461_v8, %v461_v8 }
  0x77   :  { %1884 = vmatpush.bf16.msrb.mxu2 %v3053_v19  ;;  %v3114_v19 = vld [vmem:[%s3842_s1 + $0x578] sm:$0xff] }
  0x78   :  { %1897 = vmatpush.bf16.msrb.mxu3 %v3061_v20  ;;  %v487_v20 = vpack.c.b16 %v462_v11, %v462_v11  ;;  %v3132_v11 = vld [vmem:[%s3842_s1 + $0x608] sm:$0xff] }
  0x79   :  { %1871 = vmatpush.bf16.msrb.mxu1 %v3045_v21  ;;  %v485_v21 = vpack.c.b16 %v460_v14, %v460_v14 }
  0x7a   :  { %1859 = vmatpush.bf16.msrb.mxu0 %v3036_v22  ;;  %v3105_v22 = vld [vmem:[%s3842_s1 + $0x530] sm:$0xff] }
  0x7b   :  { %1885 = vmatpush.bf16.msrb.mxu2 %v3052_v23  ;;  %v3121_v23 = vld [vmem:[%s3842_s1 + $0x5b0] sm:$0xff] }
  0x7c   :  { %1898 = vmatpush.bf16.msrb.mxu3 %v3060_v26  ;;  %v3104_v26 = vld [vmem:[%s3842_s1 + $0x528] sm:$0xff] }
  0x7d   :  { %1872 = vmatpush.bf16.msrb.mxu1 %v3044_v27  ;;  %v3120_v27 = vld [vmem:[%s3842_s1 + $0x5a8] sm:$0xff] }
  0x7e   :  { %1860 = vmatpush.bf16.msrb.mxu0 %v3035_v28  ;;  %v3128_v28 = vld [vmem:[%s3842_s1 + $0x5e8] sm:$0xff] }
  0x7f   :  { %1886 = vmatpush.bf16.msrb.mxu2 %v3051_v31  ;;  %v3103_v31 = vld [vmem:[%s3842_s1 + $0x520] sm:$0xff] }
  0x80   :  { %1899 = vmatpush.bf16.msrb.mxu3 %v3059_v34 }
  0x81   :  { %1873 = vmatpush.bf16.msrb.mxu1 %v3043_v38  ;;  %1861 = vmatmul.bf16.vlgmr.msrb.gmra.mxu0 %v480_v39  ;;  %v3118_v39 = vld [vmem:[%s3842_s1 + $0x598] sm:$0xff] }
  0x82   :  { %1905 = vmatpush.bf16.msra.mxu0 %v3074_v32  ;;  %1887 = vmatmul.bf16.vlgmr.msrb.gmra.mxu2 %v482_v40  ;;  %v3119_v32 = vld [vmem:[%s3842_s1 + $0x5a0] sm:$0xff]  ;;  %v3126_v40 = vld [vmem:[%s3842_s1 + $0x5d8] sm:$0xff] }
  0x83   :  { %1931 = vmatpush.bf16.msra.mxu2 %v3090_v35  ;;  %1900 = vmatmul.bf16.vlgmr.msrb.gmra.mxu3 %v483_v42 }
  0x84   :  { %1944 = vmatpush.bf16.msra.mxu3 %v3098_v37  ;;  %1874 = vmatmul.bf16.vlgmr.msrb.gmra.mxu1 %v481_v43  ;;  %v3102_v37 = vld [vmem:[%s3842_s1 + $0x518] sm:$0xff] }
  0x85   :  { %1918 = vmatpush.bf16.msra.mxu1 %v3082_v41  ;;  %v3110_v43 = vld [vmem:[%s3842_s1 + $0x558] sm:$0xff] }
  0x86   :  { %1906 = vmatpush.bf16.msra.mxu0 %v3073_v44 }
  0x87   :  { %1932 = vmatpush.bf16.msra.mxu2 %v3089_v45  ;;  %v3101_v45 = vld [vmem:[%s3842_s1 + $0x510] sm:$0xff] }
  0x88   :  { %1945 = vmatpush.bf16.msra.mxu3 %v3097_v46 }
  0x89   :  { %1919 = vmatpush.bf16.msra.mxu1 %v3081_v47  ;;  %v3117_v47 = vld [vmem:[%s3842_s1 + $0x590] sm:$0xff] }
  0x8a   :  { %1907 = vmatpush.bf16.msra.mxu0 %v3072_v48  ;;  %v3125_v48 = vld [vmem:[%s3842_s1 + $0x5d0] sm:$0xff] }
  0x8b   :  { %1933 = vmatpush.bf16.msra.mxu2 %v3088_v49 }
  0x8c   :  { %1946 = vmatpush.bf16.msra.mxu3 %v3096_v50 }
  0x8d   :  { %1920 = vmatpush.bf16.msra.mxu1 %v3080_v51  ;;  %v3109_v51 = vld [vmem:[%s3842_s1 + $0x550] sm:$0xff] }
  0x8e   :  { %1908 = vmatpush.bf16.msra.mxu0 %v3071_v52  ;;  %v3100_v52 = vld [vmem:[%s3842_s1 + $0x508] sm:$0xff] }
  0x8f   :  { %1934 = vmatpush.bf16.msra.mxu2 %v3087_v53  ;;  %v31_v53 = vld [vmem:[%s3843_s0 + $0x50] sm:$0xff] }
  0x90   :  { %1947 = vmatpush.bf16.msra.mxu3 %v3095_v54  ;;  %v464_v4 = vunpack.c.h.b16 %v31_v53 }
  0x91   :  { %1921 = vmatpush.bf16.msra.mxu1 %v3079_v55  ;;  %v3116_v55 = vld [vmem:[%s3842_s1 + $0x588] sm:$0xff] }
  0x92   :  { %1909 = vmatpush.bf16.msra.mxu0 %v3070_v56  ;;  %v3124_v56 = vld [vmem:[%s3842_s1 + $0x5c8] sm:$0xff] }
  0x93   :  { %1935 = vmatpush.bf16.msra.mxu2 %v3086_v57  ;;  %v32_v57 = vld [vmem:[%s3843_s0 + $0x58] sm:$0xff] }
  0x94   :  { %1948 = vmatpush.bf16.msra.mxu3 %v3094_v58 }
  0x95   :  { %1922 = vmatpush.bf16.msra.mxu1 %v3078_v59  ;;  %v3108_v59 = vld [vmem:[%s3842_s1 + $0x548] sm:$0xff] }
  0x96   :  { %1910 = vmatpush.bf16.msra.mxu0 %v3069_v60  ;;  %v463_v60 = vunpack.c.l.b16 %v31_v53 }
  0x97   :  { %1936 = vmatpush.bf16.msra.mxu2 %v3085_v61  ;;  %v3099_v61 = vld [vmem:[%s3842_s1 + $0x500] sm:$0xff] }
  0x98   :  { %1949 = vmatpush.bf16.msra.mxu3 %v3093_v62  ;;  %v465_v62 = vunpack.c.l.b16 %v32_v57 }
  0x99   :  { %1923 = vmatpush.bf16.msra.mxu1 %v3077_v63  ;;  %v466_v63 = vunpack.c.h.b16 %v32_v57 }
  0x9a   :  { %1911 = vmatpush.bf16.msra.mxu0 %v3068_v0  ;;  %v490_v7 = vpack.c.b16 %v465_v62, %v465_v62 }
  0x9b   :  { %1937 = vmatpush.bf16.msra.mxu2 %v3084_v1  ;;  %v3115_v1 = vld [vmem:[%s3842_s1 + $0x580] sm:$0xff]  ;;  %v491_v8 = vpack.c.b16 %v466_v63, %v466_v63 }
  0x9c   :  { %1950 = vmatpush.bf16.msra.mxu3 %v3092_v2  ;;  %v3123_v2 = vld [vmem:[%s3842_s1 + $0x5c0] sm:$0xff] }
  0x9d   :  { %1924 = vmatpush.bf16.msra.mxu1 %v3076_v5  ;;  %v3107_v5 = vld [vmem:[%s3842_s1 + $0x540] sm:$0xff] }
  0x9e   :  { %1912 = vmatpush.bf16.msra.mxu0 %v3067_v6  ;;  %v1706_v34 = vpop.f32.mrf.mxu0  ;;  %v488_v6 = vpack.c.b16 %v463_v60, %v463_v60 }
  0x9f   :  { %1938 = vmatpush.bf16.msra.mxu2 %v3083_v9  ;;  %v1707_v35 = vadd.f32 %v3143_v29, %v1706_v34  ;;  %v489_v9 = vpack.c.b16 %v464_v4, %v464_v4 }
  0xa0   :  { %1951 = vmatpush.bf16.msra.mxu3 %v3091_v10  ;;  %v3133_v10 = vld [vmem:[%s3842_s1 + $0x610] sm:$0xff] }
  0xa1   :  { %1925 = vmatpush.bf16.msra.mxu1 %v3075_v16  ;;  %1913 = vmatmul.bf16.vlgmr.msra.gmra.mxu0 %v484_v17  ;;  %v1719_v38 = vpop.f32.mrf.mxu1 }
  0xa2   :  { %1957 = vmatpush.bf16.msrb.mxu0 %v3106_v12  ;;  %1939 = vmatmul.bf16.vlgmr.msra.gmra.mxu2 %v486_v18  ;;  %v1720_v41 = vadd.f32 %v1719_v38, %v1707_v35  ;;  %v33_v12 = vld [vmem:[%s3843_s0 + $0x60] sm:$0xf] }
  0xa3   :  { %1983 = vmatpush.bf16.msrb.mxu2 %v3122_v13  ;;  %1952 = vmatmul.bf16.vlgmr.msra.gmra.mxu3 %v487_v20  ;;  %v3131_v13 = vld [vmem:[%s3842_s1 + $0x600] sm:$0xff] }
  0xa4   :  { %1996 = vmatpush.bf16.msrb.mxu3 %v3130_v15  ;;  %1926 = vmatmul.bf16.vlgmr.msra.gmra.mxu1 %v485_v21  ;;  %v467_v15 = vunpack.c.l.b16 %v33_v12 }
  0xa5   :  { %1970 = vmatpush.bf16.msrb.mxu1 %v3114_v19  ;;  %v1732_v42 = vpop.f32.mrf.mxu2 }
  0xa6   :  { %1958 = vmatpush.bf16.msrb.mxu0 %v3105_v22  ;;  %v1733_v44 = vadd.f32 %v1732_v42, %v1720_v41  ;;  %v1745_v46 = vpop.f32.mrf.mxu3  ;;  %v1708_v50 = vpop.f32.mrf.mxu0  ;;  %v492_v19 = vpack.c.b16 %v467_v15, %v467_v15 }
  0xa7   :  { %1984 = vmatpush.bf16.msrb.mxu2 %v3121_v23  ;;  %v3140_v50 = vld [vmem:[%s3846_s3 + $0x28] sm:$0xff] }
  0xa8   :  { %1997 = vmatpush.bf16.msrb.mxu3 %v3129_v24  ;;  %v1746_v49 = vadd.f32 %v1745_v46, %v1733_v44  ;;  %v3142_v44 = vld [vmem:[%s3846_s3 + $0x38] sm:$0xff] }
  0xa9   :  { %1971 = vmatpush.bf16.msrb.mxu1 %v3113_v25  ;;  %v1721_v54 = vpop.f32.mrf.mxu1 }
  0xaa   :  { %1959 = vmatpush.bf16.msrb.mxu0 %v3104_v26  ;;  %v3138_v54 = vld [vmem:[%s3846_s3 + $0x18] sm:$0xff] }
  0xab   :  { %1985 = vmatpush.bf16.msrb.mxu2 %v3120_v27 }
  0xac   :  { %1998 = vmatpush.bf16.msrb.mxu3 %v3128_v28 }
  0xad   :  { %1972 = vmatpush.bf16.msrb.mxu1 %v3112_v30  ;;  %v1734_v58 = vpop.f32.mrf.mxu2 }
  0xae   :  { %1960 = vmatpush.bf16.msrb.mxu0 %v3103_v31  ;;  %v1747_v0 = vpop.f32.mrf.mxu3  ;;  %v3137_v58 = vld [vmem:[%s3846_s3 + $0x10] sm:$0xff] }
  0xaf   :  { %1986 = vmatpush.bf16.msrb.mxu2 %v3119_v32 }
  0xb0   :  { %1999 = vmatpush.bf16.msrb.mxu3 %v3127_v33 }
  0xb1   :  { %1973 = vmatpush.bf16.msrb.mxu1 %v3111_v36 }
  0xb2   :  { %1961 = vmatpush.bf16.msrb.mxu0 %v3102_v37 }
  0xb3   :  { %1987 = vmatpush.bf16.msrb.mxu2 %v3118_v39 }
  0xb4   :  { %2000 = vmatpush.bf16.msrb.mxu3 %v3126_v40 }
  0xb5   :  { %1974 = vmatpush.bf16.msrb.mxu1 %v3110_v43 }
  0xb6   :  { %1962 = vmatpush.bf16.msrb.mxu0 %v3101_v45 }
  0xb7   :  { %1988 = vmatpush.bf16.msrb.mxu2 %v3117_v47  ;;  %v3141_v47 = vld [vmem:[%s3846_s3 + $0x30] sm:$0xff] }
  0xb8   :  { %2001 = vmatpush.bf16.msrb.mxu3 %v3125_v48 }
  0xb9   :  { %1975 = vmatpush.bf16.msrb.mxu1 %v3109_v51 }
  0xba   :  { %1963 = vmatpush.bf16.msrb.mxu0 %v3100_v52  ;;  %v3139_v52 = vld [vmem:[%s3846_s3 + $0x20] sm:$0xff] }
  0xbb   :  { %1989 = vmatpush.bf16.msrb.mxu2 %v3116_v55 }
  0xbc   :  { %2002 = vmatpush.bf16.msrb.mxu3 %v3124_v56 }
  0xbd   :  { %1976 = vmatpush.bf16.msrb.mxu1 %v3108_v59 }
  0xbe   :  { %1964 = vmatpush.bf16.msrb.mxu0 %v3099_v61  ;;  %v1758_v14 = vpop.f32.mrf.mxu0  ;;  %v3136_v61 = vld [vmem:[%s3846_s3 + $0x8] sm:$0xff] }
  0xbf   :  { %1990 = vmatpush.bf16.msrb.mxu2 %v3115_v1  ;;  %v1759_v16 = vadd.f32 %v1758_v14, %v1746_v49 }
  0xc0   :  { %2003 = vmatpush.bf16.msrb.mxu3 %v3123_v2  ;;  %v3135_v2 = vld [vmem:[%s3846_s3] sm:$0xff] }
  0xc1   :  { %1977 = vmatpush.bf16.msrb.mxu1 %v3107_v5  ;;  %1965 = vmatmul.bf16.vlgmr.msrb.gmra.mxu0 %v488_v6  ;;  %v1771_v17 = vpop.f32.mrf.mxu1 }
  0xc2   :  { %2013 = vmatpush.bf16.msra.mxu0 %v3134_v3  ;;  %1991 = vmatmul.bf16.vlgmr.msrb.gmra.mxu2 %v490_v7  ;;  %v1772_v18 = vadd.f32 %v1771_v17, %v1759_v16 }
  0xc3   :  { %2004 = vmatmul.bf16.vlgmr.msrb.gmra.mxu3 %v491_v8 }
  0xc4   :  { %1978 = vmatmul.bf16.vlgmr.msrb.gmra.mxu1 %v489_v9 }
  0xc5   :  { %v1784_v20 = vpop.f32.mrf.mxu2  ;;  %2092 = vmatpush.bf16.msra.mxu1 %v3142_v44 }
  0xc6   :  { %2014 = vmatpush.bf16.msra.mxu0 %v3133_v10  ;;  %v1785_v21 = vadd.f32 %v1784_v20, %v1772_v18  ;;  %v1797_v22 = vpop.f32.mrf.mxu3  ;;  %v1760_v24 = vpop.f32.mrf.mxu0 }
  0xc8   :  { %v1798_v23 = vadd.f32 %v1797_v22, %v1785_v21 }
  0xc9   :  { %v1773_v25 = vpop.f32.mrf.mxu1  ;;  %2093 = vmatpush.bf16.msra.mxu1 %v3141_v47 }
  0xca   :  { %2015 = vmatpush.bf16.msra.mxu0 %v3132_v11  ;;  %v3144_v25 = vld [vmem:[%s3845_s4] ss:$0 sm:$0xff] }
  0xcd   :  { %v1786_v26 = vpop.f32.mrf.mxu2  ;;  %2094 = vmatpush.bf16.msra.mxu1 %v3140_v50 }
  0xce   :  { %2016 = vmatpush.bf16.msra.mxu0 %v3131_v13  ;;  %v1799_v27 = vpop.f32.mrf.mxu3 }
  0xd1   :  { %2906 = vmatmul.msk.bf16.vlgmr.msra.gmra.mxu0 %vm1693_vm0, %v492_v19  ;;  %2095 = vmatpush.bf16.msra.mxu1 %v3139_v52 }
  0xd5   :  { %2096 = vmatpush.bf16.msra.mxu1 %v3138_v54 }
  0xd9   :  { %2097 = vmatpush.bf16.msra.mxu1 %v3137_v58 }
  0xdd   :  { %2098 = vmatpush.bf16.msra.mxu1 %v3136_v61 }
  0xde   :  { %v1810_v28 = vpop.f32.mrf.mxu0 }
  0xdf   :  { %v1811_v29 = vadd.f32 %v1810_v28, %v1798_v23 }
  0xe1   :  { %v1823_v30 = vpop.f32.mrf.mxu1  ;;  %2099 = vmatpush.bf16.msra.mxu1 %v3135_v2 }
  0xe2   :  { %v1824_v31 = vadd.f32 %v1823_v30, %v1811_v29 }
  0xe5   :  { %v1836_v32 = vpop.f32.mrf.mxu2 }
  0xe6   :  { %v1837_v33 = vadd.f32 %v1836_v32, %v1824_v31  ;;  %v1849_v34 = vpop.f32.mrf.mxu3  ;;  %v1812_v35 = vpop.f32.mrf.mxu0 }
  0xe8   :  { %v1850_v36 = vadd.f32 %v1849_v34, %v1837_v33 }
  0xe9   :  { %v1825_v37 = vpop.f32.mrf.mxu1 }
  0xed   :  { %v1838_v38 = vpop.f32.mrf.mxu2 }
  0xee   :  { %v1851_v39 = vpop.f32.mrf.mxu3 }
  0xfe   :  { %v1862_v40 = vpop.f32.mrf.mxu0 }
  0xff   :  { %v1863_v59 = vadd.f32 %v1862_v40, %v1850_v36 }
 0x101   :  { %v1875_v41 = vpop.f32.mrf.mxu1 }
 0x102   :  { %v1876_v62 = vadd.f32 %v1875_v41, %v1863_v59 }
 0x105   :  { %v1888_v42 = vpop.f32.mrf.mxu2 }
 0x106   :  { %v1901_v43 = vpop.f32.mrf.mxu3  ;;  %v1864_v45 = vpop.f32.mrf.mxu0  ;;  %v1889_v1 = vadd.f32 %v1888_v42, %v1876_v62 }
 0x108   :  { %v1902_v3 = vadd.f32 %v1901_v43, %v1889_v1 }
 0x109   :  { %v1877_v46 = vpop.f32.mrf.mxu1 }
 0x10d   :  { %v1890_v48 = vpop.f32.mrf.mxu2 }
 0x10e   :  { %v1903_v49 = vpop.f32.mrf.mxu3 }
 0x11e   :  { %v1914_v51 = vpop.f32.mrf.mxu0 }
 0x11f   :  { %v1915_v4 = vadd.f32 %v1914_v51, %v1902_v3 }
 0x121   :  { %v1927_v53 = vpop.f32.mrf.mxu1 }
 0x122   :  { %v1928_v5 = vadd.f32 %v1927_v53, %v1915_v4 }
 0x125   :  { %v1940_v55 = vpop.f32.mrf.mxu2 }
 0x126   :  { %v1953_v56 = vpop.f32.mrf.mxu3  ;;  %v1916_v57 = vpop.f32.mrf.mxu0  ;;  %v1941_v6 = vadd.f32 %v1940_v55, %v1928_v5 }
 0x128   :  { %v1954_v8 = vadd.f32 %v1953_v56, %v1941_v6 }
 0x129   :  { %v1929_v60 = vpop.f32.mrf.mxu1 }
 0x12d   :  { %v1942_v63 = vpop.f32.mrf.mxu2 }
 0x12e   :  { %v1955_v0 = vpop.f32.mrf.mxu3 }
 0x13e   :  { %v1966_v7 = vpop.f32.mrf.mxu0 }
 0x13f   :  { %v1967_v10 = vadd.f32 %v1966_v7, %v1954_v8 }
 0x141   :  { %v1979_v9 = vpop.f32.mrf.mxu1 }
 0x142   :  { %v1980_v14 = vadd.f32 %v1979_v9, %v1967_v10 }
 0x145   :  { %v1992_v11 = vpop.f32.mrf.mxu2 }
 0x146   :  { %v2005_v12 = vpop.f32.mrf.mxu3  ;;  %v1968_v13 = vpop.f32.mrf.mxu0  ;;  %v1993_v15 = vadd.f32 %v1992_v11, %v1980_v14 }
 0x148   :  { %v2006_v17 = vadd.f32 %v2005_v12, %v1993_v15 }
 0x149   :  { %v1981_v16 = vpop.f32.mrf.mxu1 }
 0x14d   :  { %v1994_v18 = vpop.f32.mrf.mxu2 }
 0x14e   :  { %v2007_v19 = vpop.f32.mrf.mxu3  ;;  %v2018_v20 = vpop.f32.mrf.mxu0 }
 0x14f   :  { %v2019_v21 = vadd.f32 %v2018_v20, %v2006_v17 }
 0x151   :  { %v2022_v22 = vmax.f32 %v2019_v21, 0.0 }
 0x153   :  { %v2023_v23 = vpack.c.bf16 %v2022_v22, %v2022_v22 }
 0x155   :  { %2100 = vmatmul.bf16.vlgmr.msra.gmra.mxu1 %v2023_v23 }
 0x156   :  { %v2020_v24 = vpop.f32.mrf.mxu0 }
 0x1d2   :  { %v2101_v26 = vpop.f32.mrf.mxu1 }
 0x1d3   :  { %v2102_v27 = vadd.f32 %v3144_v25, %v2101_v26 }
 0x1d5   :  { %v2106_v28 = vsel %vm2105_vm1, %v2102_v27, -inf }
 0x1d6   :  { %2107 = vmax.xlane.f32.xlu0 %v2106_v28 }
 0x1da   :  { %v2103_v29 = vpop.f32.mrf.mxu1 }
 0x249   :  { %v2108_v30 = vpop.xlane.xlu0 %2107 }
 0x24a   :  { %v2109_v31 = vsub.f32 %v2102_v27, %v2108_v30 }
 0x24c   :  { %v2110_v32 = vmul.f32 1.442695, %v2109_v31 }
 0x24e   :  { %3145 = vpow2.f32 %v2110_v32 }
 0x254   :  { %v3146_v33 = vpop.eup %3145 }
 0x255   :  { %v2112_v34 = vsel %vm2105_vm1, %v3146_v33, 0.0 }
 0x256   :  { %2113 = vadd.xlane.f32.xlu0 %v2112_v34 }
 0x2c9   :  { %v2114_v35 = vpop.xlane.xlu0 %2113 }
 0x2ca   :  { %3147 = vrcp.f32 %v2114_v35 }
 0x2d0   :  { %v3148_v36 = vpop.eup %3147 }
 0x2d1   :  { %v2116_v37 = vmul.f32 %v3148_v36, %v3146_v33 }
 0x2d3   :  { %2117 = vst.msk [vmem:[%s3847_s5] sm:$0xff] %vm2105_vm1, %v2116_v37 }

</bundles_post_ra>
